<compile_context>
chip_gen: v5e
topology: v5e:2x2
jax: 0.10.0
libtpu: 0.0.40
codegen_flags: <defaults>
</compile_context>

<pallas_src>
import jax
import jax.numpy as jnp
from jax import lax
from jax.experimental import pallas as pl
from jax.experimental.pallas import tpu as pltpu

EPS = 1e-5


def _im2col_3x3(a):
    """(H, W, C) -> (H*W, 9*C) patches for a 3x3 / stride-1 / pad-1 conv.

    Column order is (ky*3 + kx)*C + c, matching the tap-major weight layout
    produced by fold_params(). The 1-pixel zero border is built by
    concatenating zero rows/columns (no padded scratch buffer, no full zero
    fill).
    """
    H, W, C = a.shape
    zrow = jnp.zeros((1, W, C), a.dtype)
    zcol = jnp.zeros((H, 1, C), a.dtype)
    taps = []
    for dy in (-1, 0, 1):            # ky = dy + 1
        if dy < 0:
            av = jnp.concatenate([zrow, a[:H - 1]], axis=0)
        elif dy > 0:
            av = jnp.concatenate([a[1:], zrow], axis=0)
        else:
            av = a
        for dx in (-1, 0, 1):        # kx = dx + 1
            if dx < 0:
                t = jnp.concatenate([zcol, av[:, :W - 1]], axis=1)
            elif dx > 0:
                t = jnp.concatenate([av[:, 1:], zcol], axis=1)
            else:
                t = av
            taps.append(t)
    return jnp.concatenate(taps, axis=-1).reshape(H * W, 9 * C)


def residual_block_kernel(x_ref, w1_ref, s1_ref, b1_ref,
                          w2_ref, s2_ref, b2_ref, out_ref):
    """Fused conv1 -> bn1 -> relu -> conv2 -> bn2 -> (+x) -> relu for one image.

    x_ref  : (1, H, W, C)   NHWC input block (also the residual branch)
    w*_ref : (9*C, C)       tap-major im2col conv weights
    s*/b*  : (1, C)         folded BatchNorm scale / bias
    out_ref: (1, H, W, C)
    """
    _, H, W, C = x_ref.shape
    M = H * W

    x = x_ref[0]                                          # (H, W, C)

    # ---- conv1: one MXU matmul, K = 9*C ----
    acc1 = jnp.dot(_im2col_3x3(x), w1_ref[...],
                   preferred_element_type=jnp.float32)    # (M, C)
    # ---- bn1 (folded, eval mode) + ReLU ----
    h1 = jnp.maximum(acc1 * s1_ref[...] + b1_ref[...], 0.0)

    # ---- conv2: one MXU matmul, K = 9*C ----
    acc2 = jnp.dot(_im2col_3x3(h1.reshape(H, W, C)), w2_ref[...],
                   preferred_element_type=jnp.float32)    # (M, C)
    # ---- bn2 + residual add + ReLU (lane-dense store) ----
    out = jnp.maximum(acc2 * s2_ref[...] + b2_ref[...] + x.reshape(M, C), 0.0)
    out_ref[0] = out.reshape(H, W, C)


def residual_block_forward(x_nchw, folded_params):
    w1, s1, b1, w2, s2, b2 = folded_params
    N, C, H, W = x_nchw.shape
    Cout = w1.shape[1]
    assert C == Cout, "stride-1 / no-downsample block requires Cin == Cout"

    x_nhwc = jnp.transpose(x_nchw, (0, 2, 3, 1)).astype(jnp.float32)

    out_nhwc = pl.pallas_call(
        residual_block_kernel,
        out_shape=jax.ShapeDtypeStruct((N, H, W, C), jnp.float32),
        grid_spec=pltpu.PrefetchScalarGridSpec(
            num_scalar_prefetch=0,
            grid=(N,),                                    # one image per grid step
            in_specs=[
                pl.BlockSpec((1, H, W, C), lambda n: (n, 0, 0, 0)),   # x (+ residual)
                pl.BlockSpec((9 * C, C), lambda n: (0, 0)),           # conv1 weights
                pl.BlockSpec((1, C), lambda n: (0, 0)),               # bn1 scale
                pl.BlockSpec((1, C), lambda n: (0, 0)),               # bn1 bias
                pl.BlockSpec((9 * C, C), lambda n: (0, 0)),           # conv2 weights
                pl.BlockSpec((1, C), lambda n: (0, 0)),               # bn2 scale
                pl.BlockSpec((1, C), lambda n: (0, 0)),               # bn2 bias
            ],
            out_specs=pl.BlockSpec((1, H, W, C), lambda n: (n, 0, 0, 0)),
        ),
        compiler_params=pltpu.CompilerParams(
            dimension_semantics=("parallel",),            # v7x: 2 TCs split the batch
            vmem_limit_bytes=48 * 1024 * 1024,            # explicit budget (v7x-safe)
        ),
    )(x_nhwc, w1, s1, b1, w2, s2, b2)

    return jnp.transpose(out_nhwc, (0, 3, 1, 2))


# ---------------- parameter setup / reference (plain JAX glue) ----------------

def init_raw_params(key, cin, cout):
    ks = jax.random.split(key, 10)
    w1 = jax.random.normal(ks[0], (cout, cin, 3, 3), jnp.float32) * 0.05   # OIHW
    g1 = jax.random.uniform(ks[1], (cout,), minval=0.5, maxval=1.5)
    b1 = jax.random.normal(ks[2], (cout,), jnp.float32) * 0.1
    m1 = jax.random.normal(ks[3], (cout,), jnp.float32) * 0.1
    v1 = jax.random.uniform(ks[4], (cout,), minval=0.5, maxval=1.5)
    w2 = jax.random.normal(ks[5], (cout, cout, 3, 3), jnp.float32) * 0.05
    g2 = jax.random.uniform(ks[6], (cout,), minval=0.5, maxval=1.5)
    b2 = jax.random.normal(ks[7], (cout,), jnp.float32) * 0.1
    m2 = jax.random.normal(ks[8], (cout,), jnp.float32) * 0.1
    v2 = jax.random.uniform(ks[9], (cout,), minval=0.5, maxval=1.5)
    return (w1, g1, b1, m1, v1, w2, g2, b2, m2, v2)


def fold_params(raw):
    """Fold eval-mode BN into scale/bias; re-layout conv weights for im2col."""
    w1, g1, b1, m1, v1, w2, g2, b2, m2, v2 = raw

    def fold_bn(g, b, m, v):
        s = g / jnp.sqrt(v + EPS)
        return s.reshape(1, -1), (b - m * s).reshape(1, -1)

    def tapify(w_oihw):  # OIHW -> (9*Cin, Cout), row index = (ky*3 + kx)*Cin + cin
        o, i, kh, kw = w_oihw.shape
        return jnp.transpose(w_oihw, (2, 3, 1, 0)).reshape(kh * kw * i, o)

    s1, bb1 = fold_bn(g1, b1, m1, v1)
    s2, bb2 = fold_bn(g2, b2, m2, v2)
    return (tapify(w1), s1, bb1, tapify(w2), s2, bb2)


def reference_forward(x, raw):
    """Pure-JAX NCHW reference matching the PyTorch forward (eval-mode BN)."""
    w1, g1, b1, m1, v1, w2, g2, b2, m2, v2 = raw
    dn = ('NCHW', 'OIHW', 'NCHW')

    def bn(y, g, b, m, v):
        sh = (1, -1, 1, 1)
        return (y - m.reshape(sh)) * (g / jnp.sqrt(v + EPS)).reshape(sh) + b.reshape(sh)

    out = lax.conv_general_dilated(x, w1, (1, 1), ((1, 1), (1, 1)),
                                   dimension_numbers=dn)
    out = jnp.maximum(bn(out, g1, b1, m1, v1), 0.0)
    out = lax.conv_general_dilated(out, w2, (1, 1), ((1, 1), (1, 1)),
                                   dimension_numbers=dn)
    out = bn(out, g2, b2, m2, v2)
    return jnp.maximum(out + x, 0.0)


if __name__ == "__main__":
    key = jax.random.PRNGKey(0)
    kx, kp = jax.random.split(key)

    # Stride-1 / no-downsample residual block; C = 128 is a real ResNet layer
    # width and keeps the channel (lane) dimension fully dense on TPU.
    N, C, H, W = 2, 128, 16, 16
    x = jax.random.normal(kx, (N, C, H, W), jnp.float32)

    raw = init_raw_params(kp, C, C)
    folded = fold_params(raw)

    out = residual_block_forward(x, folded)
    out = jax.block_until_ready(out)

    ref = reference_forward(x, raw)
    assert out.shape == (N, C, H, W), out.shape
    err = float(jnp.max(jnp.abs(out - ref)))
    if not jnp.allclose(out, ref, atol=1e-3, rtol=1e-3):
        raise AssertionError(f"Pallas output mismatch vs reference, max|err|={err}")

    print("KERNEL_OK")
</pallas_src>

<mosaic_0001>
module attributes {stable_mosaic.version = 11 : i64} {
  func.func @residual_block_kernel(%arg0: i32, %arg1: memref<1x16x16x128xf32, #tpu.memory_space<vmem>>, %arg2: memref<1152x128xf32, #tpu.memory_space<vmem>>, %arg3: memref<1x128xf32, #tpu.memory_space<vmem>>, %arg4: memref<1x128xf32, #tpu.memory_space<vmem>>, %arg5: memref<1152x128xf32, #tpu.memory_space<vmem>>, %arg6: memref<1x128xf32, #tpu.memory_space<vmem>>, %arg7: memref<1x128xf32, #tpu.memory_space<vmem>>, %arg8: memref<1x16x16x128xf32, #tpu.memory_space<vmem>>) attributes {dimension_semantics = [#tpu.dimension_semantics<parallel>], iteration_bounds = array<i64: 2>, scalar_prefetch = 0 : i64, scratch_operands = 0 : i64, tpu.core_type = #tpu.core_type<tc>, window_params = [{transform_indices = @transform_0, window_bounds = array<i64: 1, 16, 16, 128>}, {pipeline_mode = #tpu.pipeline_mode<synchronous>, transform_indices = @transform_1, window_bounds = array<i64: 1152, 128>}, {pipeline_mode = #tpu.pipeline_mode<synchronous>, transform_indices = @transform_2, window_bounds = array<i64: 1, 128>}, {pipeline_mode = #tpu.pipeline_mode<synchronous>, transform_indices = @transform_3, window_bounds = array<i64: 1, 128>}, {pipeline_mode = #tpu.pipeline_mode<synchronous>, transform_indices = @transform_4, window_bounds = array<i64: 1152, 128>}, {pipeline_mode = #tpu.pipeline_mode<synchronous>, transform_indices = @transform_5, window_bounds = array<i64: 1, 128>}, {pipeline_mode = #tpu.pipeline_mode<synchronous>, transform_indices = @transform_6, window_bounds = array<i64: 1, 128>}, {transform_indices = @transform_7, window_bounds = array<i64: 1, 16, 16, 128>}]} {
    %c0 = arith.constant 0 : index
    %c0_0 = arith.constant 0 : index
    %c0_1 = arith.constant 0 : index
    %c0_2 = arith.constant 0 : index
    %0 = vector.load %arg1[%c0, %c0_0, %c0_1, %c0_2] : memref<1x16x16x128xf32, #tpu.memory_space<vmem>>, vector<1x16x16x128xf32>
    %1 = vector.shape_cast %0 : vector<1x16x16x128xf32> to vector<16x16x128xf32>
    %cst = arith.constant 0.000000e+00 : f32
    %2 = vector.broadcast %cst : f32 to vector<1x16x128xf32>
    %cst_3 = arith.constant 0.000000e+00 : f32
    %3 = vector.broadcast %cst_3 : f32 to vector<16x1x128xf32>
    %4 = vector.extract_strided_slice %1 {offsets = [0, 0, 0], sizes = [15, 16, 128], strides = [1, 1, 1]} : vector<16x16x128xf32> to vector<15x16x128xf32>
    %5 = tpu.concatenate %2, %4 in 0 : vector<1x16x128xf32>, vector<15x16x128xf32> -> vector<16x16x128xf32>
    %6 = vector.extract_strided_slice %5 {offsets = [0, 0, 0], sizes = [16, 15, 128], strides = [1, 1, 1]} : vector<16x16x128xf32> to vector<16x15x128xf32>
    %7 = tpu.concatenate %3, %6 in 1 : vector<16x1x128xf32>, vector<16x15x128xf32> -> vector<16x16x128xf32>
    %8 = vector.extract_strided_slice %5 {offsets = [0, 1, 0], sizes = [16, 15, 128], strides = [1, 1, 1]} : vector<16x16x128xf32> to vector<16x15x128xf32>
    %9 = tpu.concatenate %8, %3 in 1 : vector<16x15x128xf32>, vector<16x1x128xf32> -> vector<16x16x128xf32>
    %10 = vector.extract_strided_slice %1 {offsets = [0, 0, 0], sizes = [16, 15, 128], strides = [1, 1, 1]} : vector<16x16x128xf32> to vector<16x15x128xf32>
    %11 = tpu.concatenate %3, %10 in 1 : vector<16x1x128xf32>, vector<16x15x128xf32> -> vector<16x16x128xf32>
    %12 = vector.extract_strided_slice %1 {offsets = [0, 1, 0], sizes = [16, 15, 128], strides = [1, 1, 1]} : vector<16x16x128xf32> to vector<16x15x128xf32>
    %13 = tpu.concatenate %12, %3 in 1 : vector<16x15x128xf32>, vector<16x1x128xf32> -> vector<16x16x128xf32>
    %14 = vector.extract_strided_slice %1 {offsets = [1, 0, 0], sizes = [15, 16, 128], strides = [1, 1, 1]} : vector<16x16x128xf32> to vector<15x16x128xf32>
    %15 = tpu.concatenate %14, %2 in 0 : vector<15x16x128xf32>, vector<1x16x128xf32> -> vector<16x16x128xf32>
    %16 = vector.extract_strided_slice %15 {offsets = [0, 0, 0], sizes = [16, 15, 128], strides = [1, 1, 1]} : vector<16x16x128xf32> to vector<16x15x128xf32>
    %17 = tpu.concatenate %3, %16 in 1 : vector<16x1x128xf32>, vector<16x15x128xf32> -> vector<16x16x128xf32>
    %18 = vector.extract_strided_slice %15 {offsets = [0, 1, 0], sizes = [16, 15, 128], strides = [1, 1, 1]} : vector<16x16x128xf32> to vector<16x15x128xf32>
    %19 = tpu.concatenate %18, %3 in 1 : vector<16x15x128xf32>, vector<16x1x128xf32> -> vector<16x16x128xf32>
    %20 = tpu.concatenate %7, %5, %9, %11, %1, %13, %17, %15, %19 in 2 : vector<16x16x128xf32>, vector<16x16x128xf32>, vector<16x16x128xf32>, vector<16x16x128xf32>, vector<16x16x128xf32>, vector<16x16x128xf32>, vector<16x16x128xf32>, vector<16x16x128xf32>, vector<16x16x128xf32> -> vector<16x16x1152xf32>
    %21 = vector.shape_cast %20 : vector<16x16x1152xf32> to vector<256x1152xf32>
    %c0_4 = arith.constant 0 : index
    %c0_5 = arith.constant 0 : index
    %22 = vector.load %arg2[%c0_4, %c0_5] : memref<1152x128xf32, #tpu.memory_space<vmem>>, vector<1152x128xf32>
    %cst_6 = arith.constant dense<0.000000e+00> : vector<256x128xf32>
    %23 = tpu.matmul %21, %22, %cst_6 {dimension_numbers = #tpu.dot_dimension_numbers<[1], [0], [0], [1], [0, 0, 1, 1], [], []>} : vector<256x1152xf32>, vector<1152x128xf32>, vector<256x128xf32> -> vector<256x128xf32>
    %c0_7 = arith.constant 0 : index
    %c0_8 = arith.constant 0 : index
    %24 = vector.load %arg3[%c0_7, %c0_8] : memref<1x128xf32, #tpu.memory_space<vmem>>, vector<1x128xf32>
    %25 = vector.broadcast %24 : vector<1x128xf32> to vector<256x128xf32>
    %26 = arith.mulf %23, %25 : vector<256x128xf32>
    %c0_9 = arith.constant 0 : index
    %c0_10 = arith.constant 0 : index
    %27 = vector.load %arg4[%c0_9, %c0_10] : memref<1x128xf32, #tpu.memory_space<vmem>>, vector<1x128xf32>
    %28 = vector.broadcast %27 : vector<1x128xf32> to vector<256x128xf32>
    %29 = arith.addf %26, %28 : vector<256x128xf32>
    %cst_11 = arith.constant 0.000000e+00 : f32
    %30 = vector.broadcast %cst_11 : f32 to vector<256x128xf32>
    %31 = arith.maximumf %29, %30 : vector<256x128xf32>
    %32 = vector.shape_cast %31 : vector<256x128xf32> to vector<16x16x128xf32>
    %cst_12 = arith.constant 0.000000e+00 : f32
    %33 = vector.broadcast %cst_12 : f32 to vector<1x16x128xf32>
    %cst_13 = arith.constant 0.000000e+00 : f32
    %34 = vector.broadcast %cst_13 : f32 to vector<16x1x128xf32>
    %35 = vector.extract_strided_slice %32 {offsets = [0, 0, 0], sizes = [15, 16, 128], strides = [1, 1, 1]} : vector<16x16x128xf32> to vector<15x16x128xf32>
    %36 = tpu.concatenate %33, %35 in 0 : vector<1x16x128xf32>, vector<15x16x128xf32> -> vector<16x16x128xf32>
    %37 = vector.extract_strided_slice %36 {offsets = [0, 0, 0], sizes = [16, 15, 128], strides = [1, 1, 1]} : vector<16x16x128xf32> to vector<16x15x128xf32>
    %38 = tpu.concatenate %34, %37 in 1 : vector<16x1x128xf32>, vector<16x15x128xf32> -> vector<16x16x128xf32>
    %39 = vector.extract_strided_slice %36 {offsets = [0, 1, 0], sizes = [16, 15, 128], strides = [1, 1, 1]} : vector<16x16x128xf32> to vector<16x15x128xf32>
    %40 = tpu.concatenate %39, %34 in 1 : vector<16x15x128xf32>, vector<16x1x128xf32> -> vector<16x16x128xf32>
    %41 = vector.extract_strided_slice %32 {offsets = [0, 0, 0], sizes = [16, 15, 128], strides = [1, 1, 1]} : vector<16x16x128xf32> to vector<16x15x128xf32>
    %42 = tpu.concatenate %34, %41 in 1 : vector<16x1x128xf32>, vector<16x15x128xf32> -> vector<16x16x128xf32>
    %43 = vector.extract_strided_slice %32 {offsets = [0, 1, 0], sizes = [16, 15, 128], strides = [1, 1, 1]} : vector<16x16x128xf32> to vector<16x15x128xf32>
    %44 = tpu.concatenate %43, %34 in 1 : vector<16x15x128xf32>, vector<16x1x128xf32> -> vector<16x16x128xf32>
    %45 = vector.extract_strided_slice %32 {offsets = [1, 0, 0], sizes = [15, 16, 128], strides = [1, 1, 1]} : vector<16x16x128xf32> to vector<15x16x128xf32>
    %46 = tpu.concatenate %45, %33 in 0 : vector<15x16x128xf32>, vector<1x16x128xf32> -> vector<16x16x128xf32>
    %47 = vector.extract_strided_slice %46 {offsets = [0, 0, 0], sizes = [16, 15, 128], strides = [1, 1, 1]} : vector<16x16x128xf32> to vector<16x15x128xf32>
    %48 = tpu.concatenate %34, %47 in 1 : vector<16x1x128xf32>, vector<16x15x128xf32> -> vector<16x16x128xf32>
    %49 = vector.extract_strided_slice %46 {offsets = [0, 1, 0], sizes = [16, 15, 128], strides = [1, 1, 1]} : vector<16x16x128xf32> to vector<16x15x128xf32>
    %50 = tpu.concatenate %49, %34 in 1 : vector<16x15x128xf32>, vector<16x1x128xf32> -> vector<16x16x128xf32>
    %51 = tpu.concatenate %38, %36, %40, %42, %32, %44, %48, %46, %50 in 2 : vector<16x16x128xf32>, vector<16x16x128xf32>, vector<16x16x128xf32>, vector<16x16x128xf32>, vector<16x16x128xf32>, vector<16x16x128xf32>, vector<16x16x128xf32>, vector<16x16x128xf32>, vector<16x16x128xf32> -> vector<16x16x1152xf32>
    %52 = vector.shape_cast %51 : vector<16x16x1152xf32> to vector<256x1152xf32>
    %c0_14 = arith.constant 0 : index
    %c0_15 = arith.constant 0 : index
    %53 = vector.load %arg5[%c0_14, %c0_15] : memref<1152x128xf32, #tpu.memory_space<vmem>>, vector<1152x128xf32>
    %cst_16 = arith.constant dense<0.000000e+00> : vector<256x128xf32>
    %54 = tpu.matmul %52, %53, %cst_16 {dimension_numbers = #tpu.dot_dimension_numbers<[1], [0], [0], [1], [0, 0, 1, 1], [], []>} : vector<256x1152xf32>, vector<1152x128xf32>, vector<256x128xf32> -> vector<256x128xf32>
    %c0_17 = arith.constant 0 : index
    %c0_18 = arith.constant 0 : index
    %55 = vector.load %arg6[%c0_17, %c0_18] : memref<1x128xf32, #tpu.memory_space<vmem>>, vector<1x128xf32>
    %56 = vector.broadcast %55 : vector<1x128xf32> to vector<256x128xf32>
    %57 = arith.mulf %54, %56 : vector<256x128xf32>
    %c0_19 = arith.constant 0 : index
    %c0_20 = arith.constant 0 : index
    %58 = vector.load %arg7[%c0_19, %c0_20] : memref<1x128xf32, #tpu.memory_space<vmem>>, vector<1x128xf32>
    %59 = vector.broadcast %58 : vector<1x128xf32> to vector<256x128xf32>
    %60 = arith.addf %57, %59 : vector<256x128xf32>
    %61 = vector.shape_cast %1 : vector<16x16x128xf32> to vector<256x128xf32>
    %62 = arith.addf %60, %61 : vector<256x128xf32>
    %cst_21 = arith.constant 0.000000e+00 : f32
    %63 = vector.broadcast %cst_21 : f32 to vector<256x128xf32>
    %64 = arith.maximumf %62, %63 : vector<256x128xf32>
    %65 = vector.shape_cast %64 : vector<256x128xf32> to vector<16x16x128xf32>
    %c0_22 = arith.constant 0 : index
    %c0_23 = arith.constant 0 : index
    %c0_24 = arith.constant 0 : index
    %c0_25 = arith.constant 0 : index
    %66 = vector.load %arg8[%c0_22, %c0_23, %c0_24, %c0_25] : memref<1x16x16x128xf32, #tpu.memory_space<vmem>>, vector<1x16x16x128xf32>
    %67 = vector.shape_cast %66 : vector<1x16x16x128xf32> to vector<16x16x128xf32>
    %68 = vector.shape_cast %65 : vector<16x16x128xf32> to vector<1x16x16x128xf32>
    tpu.vector_store %arg8[%c0_22, %c0_23, %c0_24, %c0_25], %68 {strides = array<i32>} : memref<1x16x16x128xf32, #tpu.memory_space<vmem>>, vector<1x16x16x128xf32>,
    return
  }
  func.func @transform_0(%arg0: i32) -> (i32, i32, i32, i32) {
    %c0_i32 = arith.constant 0 : i32
    %c0_i32_0 = arith.constant 0 : i32
    %c0_i32_1 = arith.constant 0 : i32
    %c0_i32_2 = arith.constant 0 : i32
    return %arg0, %c0_i32, %c0_i32_0, %c0_i32_1 : i32, i32, i32, i32
  }
  func.func @transform_1(%arg0: i32) -> (i32, i32) {
    %c0_i32 = arith.constant 0 : i32
    %c0_i32_0 = arith.constant 0 : i32
    %c0_i32_1 = arith.constant 0 : i32
    return %c0_i32, %c0_i32_0 : i32, i32
  }
  func.func @transform_2(%arg0: i32) -> (i32, i32) {
    %c0_i32 = arith.constant 0 : i32
    %c0_i32_0 = arith.constant 0 : i32
    %c0_i32_1 = arith.constant 0 : i32
    return %c0_i32, %c0_i32_0 : i32, i32
  }
  func.func @transform_3(%arg0: i32) -> (i32, i32) {
    %c0_i32 = arith.constant 0 : i32
    %c0_i32_0 = arith.constant 0 : i32
    %c0_i32_1 = arith.constant 0 : i32
    return %c0_i32, %c0_i32_0 : i32, i32
  }
  func.func @transform_4(%arg0: i32) -> (i32, i32) {
    %c0_i32 = arith.constant 0 : i32
    %c0_i32_0 = arith.constant 0 : i32
    %c0_i32_1 = arith.constant 0 : i32
    return %c0_i32, %c0_i32_0 : i32, i32
  }
  func.func @transform_5(%arg0: i32) -> (i32, i32) {
    %c0_i32 = arith.constant 0 : i32
    %c0_i32_0 = arith.constant 0 : i32
    %c0_i32_1 = arith.constant 0 : i32
    return %c0_i32, %c0_i32_0 : i32, i32
  }
  func.func @transform_6(%arg0: i32) -> (i32, i32) {
    %c0_i32 = arith.constant 0 : i32
    %c0_i32_0 = arith.constant 0 : i32
    %c0_i32_1 = arith.constant 0 : i32
    return %c0_i32, %c0_i32_0 : i32, i32
  }
  func.func @transform_7(%arg0: i32) -> (i32, i32, i32, i32) {
    %c0_i32 = arith.constant 0 : i32
    %c0_i32_0 = arith.constant 0 : i32
    %c0_i32_1 = arith.constant 0 : i32
    %c0_i32_2 = arith.constant 0 : i32
    return %arg0, %c0_i32, %c0_i32_0, %c0_i32_1 : i32, i32, i32, i32
  }
}

</mosaic_0001>

<bundles_post_ra>
// kernel: tpu_custom_call.1
= control target key start
LH: loop header
LB: loop body
LE: loop exit
PB: predicated region body
PF: predicated region fallthrough
CT: control target
= control target key end

     0   :  { %s6891_s0 = inlined_call_operand.hbm [shape: f32[2,16,16,128], index: 0, kind: input, shape index: {}]   ;;  %s6892_s1 = inlined_call_operand.hbm [shape: f32[1152,128], index: 1, kind: input, shape index: {}]   ;;  %s6893_s2 = inlined_call_operand.vmem [shape: f32[1,128], index: 2, kind: input, shape index: {}]   ;;  %s6894_s3 = inlined_call_operand.vmem [shape: f32[1,128], index: 3, kind: input, shape index: {}]   ;;  %s6895_s4 = inlined_call_operand.hbm [shape: f32[1152,128], index: 4, kind: input, shape index: {}]   ;;  %s6896_s5 = inlined_call_operand.vmem [shape: f32[1,128], index: 5, kind: input, shape index: {}]   ;;  %s6897_s6 = inlined_call_operand.vmem [shape: f32[1,128], index: 6, kind: input, shape index: {}]   ;;  %s6898_s7 = inlined_call_operand.hbm [shape: f32[2,16,16,128], index: 7, kind: output, shape index: {}]  }
   0x1   :  { %7043 = sst [smem:[#allocation91_spill]] %s6892_s1 }
   0x2   :  { %12 = vsyncpa [#allocation3], 0 }
   0x3   :  { %14 = vsyncpa [#allocation3 + $0x1], 0 }
   0x4   :  { %15 = vsyncpa [#allocation6], 0 }
   0x5   :  { %16 = vsyncpa [#allocation4], 0 }
   0x6   :  { %18 = vsyncpa [#allocation4 + $0x1], 0  ;;  %s4215_s24 = smov 0   ;;  %s4217_s25 = smov 0  }
   0x7   :  { %s4219_s26 = smov 0   ;;  %s4221_s27 = smov 0  }
   0x8 LB: > { %s4236_s28 = sadd.s32 4294967295, %s4166_s27   ;;  %s3527_s29 = sadd.s32 4294967294, %s4166_s27   ;;  %s4166_s27 = sphi %s4221_s27, %s7475_s27   ;;  %s4162_s26 = sphi %s4219_s26, %s7474_s26   ;;  %s4158_s25 = sphi %s4217_s25, %s7473_s25   ;;  %s4154_s24 = sphi %s4215_s24, %s7472_s24  }
   0x9   : > { %p44_p0 = scmp.ne.s32.totalorder %s4158_s25, %s4154_s24  ;;  %p45_p1 = scmp.eq.s32.totalorder %s4236_s28, 0 }
   0xa   : > { %p194_p2 = scmp.eq.s32.totalorder %s4236_s28, 1  ;;  %p200_p3 = scmp.eq.s32.totalorder %s3527_s29, 1 }
   0xb   : > { %p4245_p4 = por %p45_p1, %p44_p0  ;;  %p3528_p5 = scmp.ge.s32.totalorder %s4166_s27, 1 }
   0xc   : > { %p4250_p6 = por %p200_p3, %p44_p0  ;;  %p207_p7 = scmp.lt.s32.totalorder %s4166_s27, 3 }
   0xd   : > { %s7046_s1 = sld [smem:[#allocation91_spill]]  ;;  %s4168_s13 = smov [#allocation5]  }
   0xe   : > { %p4258_p8 = pnand %p3528_p5, %p207_p7  ;;  %s220_s14 = sshll.u32 %s4168_s13, 4  ;;  %s221_s14 = int_to_ptr.vmem [resolvable:$true] %s220_s14 }
   0xf   : > { %s238_s17 = sshll.u32 %s6895_s4, 4  ;;  %s6899_s18 = smov 128   ;;  %s239_s17 = int_to_ptr.hbm [resolvable:$true] %s238_s17 }
  0x10   : > { %p3879_p9 = pneg %p4258_p8  ;;  %s6900_s19 = smov 8  }
  0x11   : > { %s4171_s20 = smov [#allocation7]   ;;  %s4277_s22 = sadd.s32 1, %s4166_s27  }
  0x12   : > { %p3880_p10 = pnand %p3879_p9, %p45_p1  ;;  %s240_s21 = sshll.u32 %s4171_s20, 4  ;;  %s241_s21 = int_to_ptr.vmem [resolvable:$true] %s240_s21 }
  0x13   : > { %s218_s11 = sshll.u32 %s7046_s1, 4  ;;  %s31_s23 = sadd.s32 1, %s4162_s26  ;;  %s219_s11 = int_to_ptr.hbm [resolvable:$true] %s218_s11 }
  0x14   : > { %3882 = dma.hbm_to_vmem [thread:$0]  (!%p3880_p10), %s219_s11, 18432, %s221_s14, [#allocation6], %s6899_s18, %s6899_s18, %s6900_s19  }
  0x15   : > { %3885 = dma.hbm_to_vmem [thread:$0]  (!%p3880_p10), %s239_s17, 18432, %s241_s21, [#allocation6], %s6899_s18, %s6899_s18, %s6900_s19  }
  0x16   : > { %s28_s29 = ssub.s32 %s4166_s27, %s4277_s22  ;;  %p38_p12 = scmp.ne.s32.totalorder %s4162_s26, %s4158_s25 }
  0x17   : > { %p29_p13 = scmp.eq.s32.totalorder %s28_s29, 0  ;;  %p39_p0 = scmp.eq.s32.totalorder %s4166_s27, 0 }
  0x18   : > { %p4287_p3 = por %p194_p2, %p38_p12  ;;  %p3896_p5 = scmp.lt.s32.totalorder %s4166_s27, 2 }
  0x19   : > { %s4293_s10 = scalar_select %p29_p13, %s4162_s26, %s31_s23  }
  0x1a   : > { %p40_p7 = por %p39_p0, %p38_p12  ;;  %s260_s11 = sand.u32 1, %s4162_s26  }
  0x1b   : > { %s3532_s13 = sshll.u32 %s260_s11, 8  ;;  %s3833_s14 = sshll.u32 %s4166_s27, 8 }
  0x1c   : > { %s269_s17 = scalar_lea.hbm %s6891_s0, %s3833_s14  ;;  %s264_s20 = scalar_lea.vmem [#allocation2], %s3532_s13 }
  0x1d   : > { %s272_s21 = sshll.u32 %s264_s20, 4  ;;  %s270_s29 = sshll.u32 %s269_s17, 4  ;;  %s273_s21 = int_to_ptr.vmem [resolvable:$true] %s272_s21  ;;  %s271_s29 = int_to_ptr.hbm [resolvable:$true] %s270_s29 }
  0x1e   : > { %p4300_p2 = pnand %p3896_p5, %p40_p7  ;;  %s261_s23 = scalar_lea.sflag [#allocation3], %s260_s11 }
  0x1f   : > { %s4066_s19 = sshra.s32 %s271_s29, 4  ;;  %s4073_s15 = scalar_lea.hbm %s6891_s0, 512  ;;  %s4067_s19 = int_to_ptr.hbm [resolvable:$true] %s4066_s19 }
  0x20   : > { %s4068_s1 = scalar_lea.hbm %s4067_s19, 256  ;;  %p4070_p10 = pneg %p4300_p2 }
  0x21   : > { %p4069_p9 = scmp.ne.s32.totalorder %s4067_s19, %s4068_s1  ;;  %p4074_p0 = scmp.lt.s32.totalorder %s4067_s19, %s6891_s0 }
  0x22   : > { %p4075_p5 = scmp.lt.s32.totalorder %s4073_s15, %s4068_s1 }
  0x23   : > { %p4071_p12 = pnand %p4070_p10, %p4069_p9 }
  0x24   : > { %p4076_p7 = por %p4075_p5, %p4074_p0 }
  0x25   : > { %p4072_p13 = pneg %p4071_p12 }
  0x27   : > { %p4077_p11 = pnand %p4076_p7, %p4072_p13 }
  0x29   : > { %4080 = shalt.err (!%p4077_p11)
}
  0x2a   : > { %s7050_s11 = smov 8   ;;  %s7051_s20 = smov 128  }
  0x2b   : > { %3889 = dma.hbm_to_vmem [thread:$0]  (!%p4300_p2), %s271_s29, 4096, %s273_s21, %s261_s23, %s7051_s20, %s7051_s20, %s7050_s11  }
  0x2c   : > { %284 = sbr.rel (%p4258_p8) target bundleno = 1503 (0x5df), region = 48 }
  0x31   : > { %s4320_s14 = sand.u32 1, %s4158_s25  }
  0x32   : > { %s3536_s1 = sshll.u32 %s4320_s14, 8  ;;  %s287_s19 = scalar_lea.sflag [#allocation3], %s4320_s14 }
  0x33   : > { %s4326_s13 = scalar_lea.vmem [#allocation2], %s3536_s1 }
  0x34   : > { %4141 = dma.done.wait (%p4245_p4), %s287_s19, 4096  }
  0x35   : > { %4143 = vsyncadd (%p4245_p4), %s287_s19, 4294963200 }
  0x36   : > { %4145 = dma.done.wait (%p45_p1), [#allocation6], 36864  }
  0x37   : > { %4147 = vsyncadd (%p45_p1), [#allocation6], 4294930432  ;;  %v616_v0 = vld [vmem:[#allocation5 + $0x78] sm:$0xff]  ;;  %v615_v2 = vld [vmem:[#allocation5 + $0x70] sm:$0xff]  ;;  %vm395_vm0 = vcmask 1040384   ;;  %v6901_v32 = vmov 0.0  }
  0x38   : > { %v632_v1 = vld [vmem:[#allocation5 + $0xf8] sm:$0xff]  ;;  %745 = vmatpush.msra.mxu0 %v616_v0  ;;  %3835 = vmatpush.msra.mxu2 %v616_v0  ;;  %v631_v3 = vld [vmem:[#allocation5 + $0xf0] sm:$0xff]  ;;  %v614_v4 = vld [vmem:[#allocation5 + $0x68] sm:$0xff]  ;;  %v4340_v33 = vrot.slane %v6901_v32, 7  ;;  %vm491_vm2 = vcmask 1046528   ;;  %s6563_s30 = scalar_lea.vmem [#allocation8], %s3536_s1 }
  0x39   : > { %3851 = vmatpush.msra.mxu3 %v632_v1  ;;  %858 = vmatpush.msra.mxu1 %v632_v1  ;;  %v630_v5 = vld [vmem:[#allocation5 + $0xe8] sm:$0xff]  ;;  %v613_v6 = vld [vmem:[#allocation5 + $0x60] sm:$0xff]  ;;  %v612_v8 = vld [vmem:[#allocation5 + $0x58] sm:$0xff]  ;;  %s3834_s1 = sshll.u32 %s4236_s28, 8  ;;  %s3432_s29 = sshll.u32 %s6563_s30, 4  ;;  %s3433_s29 = int_to_ptr.vmem [resolvable:$true] %s3432_s29 }
  0x3a   : > { %746 = vmatpush.msra.mxu0 %v615_v2  ;;  %3836 = vmatpush.msra.mxu2 %v615_v2  ;;  %v629_v7 = vld [vmem:[#allocation5 + $0xe0] sm:$0xff]  ;;  %v628_v9 = vld [vmem:[#allocation5 + $0xd8] sm:$0xff]  ;;  %v611_v10 = vld [vmem:[#allocation5 + $0x50] sm:$0xff]  ;;  %7052 = vst [vmem:[#allocation12_spill] sm:$0xff] %v4340_v33  ;;  %s3431_s21 = scalar_lea.hbm %s6898_s7, %s3834_s1  ;;  %s3420_s28 = scalar_lea.sflag [#allocation4], %s4320_s14 }
  0x3b   : > { %3852 = vmatpush.msra.mxu3 %v631_v3  ;;  %859 = vmatpush.msra.mxu1 %v631_v3  ;;  %v627_v11 = vld [vmem:[#allocation5 + $0xd0] sm:$0xff]  ;;  %v610_v12 = vld [vmem:[#allocation5 + $0x48] sm:$0xff]  ;;  %v609_v14 = vld [vmem:[#allocation5 + $0x40] sm:$0xff]  ;;  %s3434_s23 = sshll.u32 %s3431_s21, 4  ;;  %s4116_s20 = scalar_lea.hbm %s6898_s7, 512  ;;  %s3435_s23 = int_to_ptr.hbm [resolvable:$true] %s3434_s23 }
  0x3c   : > { %747 = vmatpush.msra.mxu0 %v614_v4  ;;  %3837 = vmatpush.msra.mxu2 %v614_v4  ;;  %v626_v13 = vld [vmem:[#allocation5 + $0xc8] sm:$0xff]  ;;  %v625_v15 = vld [vmem:[#allocation5 + $0xc0] sm:$0xff]  ;;  %v608_v16 = vld [vmem:[#allocation5 + $0x38] sm:$0xff]  ;;  %s4110_s15 = sshra.s32 %s3435_s23, 4  ;;  %s4111_s15 = int_to_ptr.hbm [resolvable:$true] %s4110_s15 }
  0x3d   : > { %3853 = vmatpush.msra.mxu3 %v630_v5  ;;  %860 = vmatpush.msra.mxu1 %v630_v5  ;;  %v624_v17 = vld [vmem:[#allocation5 + $0xb8] sm:$0xff]  ;;  %v607_v18 = vld [vmem:[#allocation5 + $0x30] sm:$0xff]  ;;  %v606_v20 = vld [vmem:[#allocation5 + $0x28] sm:$0xff]  ;;  %s4112_s16 = scalar_lea.hbm %s4111_s15, 256  ;;  %p4117_p11 = scmp.lt.s32.totalorder %s4111_s15, %s6898_s7 }
  0x3e   : > { %748 = vmatpush.msra.mxu0 %v613_v6  ;;  %3838 = vmatpush.msra.mxu2 %v613_v6  ;;  %v623_v19 = vld [vmem:[#allocation5 + $0xb0] sm:$0xff]  ;;  %v622_v21 = vld [vmem:[#allocation5 + $0xa8] sm:$0xff]  ;;  %v605_v22 = vld [vmem:[#allocation5 + $0x20] sm:$0xff]  ;;  %p4113_p1 = scmp.ne.s32.totalorder %s4111_s15, %s4112_s16  ;;  %p4118_p2 = scmp.lt.s32.totalorder %s4116_s20, %s4112_s16 }
  0x3f   : > { %3854 = vmatpush.msra.mxu3 %v629_v7  ;;  %861 = vmatpush.msra.mxu1 %v629_v7  ;;  %v621_v23 = vld [vmem:[#allocation5 + $0xa0] sm:$0xff]  ;;  %v604_v24 = vld [vmem:[#allocation5 + $0x18] sm:$0xff]  ;;  %v603_v26 = vld [vmem:[#allocation5 + $0x10] sm:$0xff] }
  0x40   : > { %749 = vmatpush.msra.mxu0 %v612_v8  ;;  %3839 = vmatpush.msra.mxu2 %v612_v8  ;;  %v620_v25 = vld [vmem:[#allocation5 + $0x98] sm:$0xff]  ;;  %v619_v27 = vld [vmem:[#allocation5 + $0x90] sm:$0xff]  ;;  %v602_v28 = vld [vmem:[#allocation5 + $0x8] sm:$0xff]  ;;  %p4114_p4 = pnand %p4113_p1, %p4287_p3  ;;  %p4119_p9 = por %p4118_p2, %p4117_p11 }
  0x41   : > { %3855 = vmatpush.msra.mxu3 %v628_v9  ;;  %862 = vmatpush.msra.mxu1 %v628_v9  ;;  %v4337_v29 = vld [vmem:[%s4326_s13 + $0x70] sm:$0xff]  ;;  %v618_v30 = vld [vmem:[#allocation5 + $0x88] sm:$0xff]  ;;  %v601_v31 = vld [vmem:[#allocation5] sm:$0xff] }
  0x42   : > { %750 = vmatpush.msra.mxu0 %v611_v10  ;;  %3840 = vmatpush.msra.mxu2 %v611_v10  ;;  %v617_v34 = vld [vmem:[#allocation5 + $0x80] sm:$0xff]  ;;  %vm4343_vm1 = vmneg %vm395_vm0  ;;  %v4348_v36 = vrot.slane %v4337_v29, 7  ;;  %v648_v37 = vld [vmem:[#allocation5 + $0x178] sm:$0xff]  ;;  %p4115_p8 = pneg %p4114_p4 }
  0x43   : > { %3856 = vmatpush.msra.mxu3 %v627_v11  ;;  %863 = vmatpush.msra.mxu1 %v627_v11  ;;  %v664_v38 = vld [vmem:[#allocation5 + $0x1f8] sm:$0xff]  ;;  %v647_v41 = vld [vmem:[#allocation5 + $0x170] sm:$0xff]  ;;  %v646_v45 = vld [vmem:[#allocation5 + $0x168] sm:$0xff] }
  0x44   : > { %751 = vmatpush.msra.mxu0 %v610_v12  ;;  %3841 = vmatpush.msra.mxu2 %v610_v12  ;;  %7055 = vst [vmem:[#allocation13_spill] sm:$0xff] %v4348_v36  ;;  %v4351_v39 = vld [vmem:[%s4326_s13 + $0x78] sm:$0xff]  ;;  %v663_v43 = vld [vmem:[#allocation5 + $0x1f0] sm:$0xff]  ;;  %v662_v46 = vld [vmem:[#allocation5 + $0x1e8] sm:$0xff]  ;;  %p4120_p10 = pnand %p4119_p9, %p4115_p8 }
  0x45   : > { %3857 = vmatpush.msra.mxu3 %v626_v13  ;;  %864 = vmatpush.msra.mxu1 %v626_v13  ;;  %v680_v40 = vld [vmem:[#allocation5 + $0x278] sm:$0xff]  ;;  %v420_v42 = vrot.slane %v4351_v39, 7  ;;  %v679_v44 = vld [vmem:[#allocation5 + $0x270] sm:$0xff]  ;;  %v678_v47 = vld [vmem:[#allocation5 + $0x268] sm:$0xff] }
  0x46   : > { %752 = vmatpush.msra.mxu0 %v609_v14  ;;  %3842 = vmatpush.msra.mxu2 %v609_v14  ;;  %v645_v48 = vld [vmem:[#allocation5 + $0x160] sm:$0xff]  ;;  %v644_v51 = vld [vmem:[#allocation5 + $0x158] sm:$0xff]  ;;  %v643_v56 = vld [vmem:[#allocation5 + $0x150] sm:$0xff] }
  0x47   : > { %3858 = vmatpush.msra.mxu3 %v625_v15  ;;  %865 = vmatpush.msra.mxu1 %v625_v15  ;;  %v4364_v49 = vsel %vm395_vm0, %v4348_v36, %v420_v42  ;;  %v661_v50 = vld [vmem:[#allocation5 + $0x1e0] sm:$0xff]  ;;  %v660_v54 = vld [vmem:[#allocation5 + $0x1d8] sm:$0xff]  ;;  %v659_v58 = vld [vmem:[#allocation5 + $0x1d0] sm:$0xff] }
  0x48   : > { %753 = vmatpush.msra.mxu0 %v608_v16  ;;  %3843 = vmatpush.msra.mxu2 %v608_v16  ;;  %7056 = vst [vmem:[#allocation14_spill] sm:$0xff] %v4364_v49  ;;  %v677_v52 = vld [vmem:[#allocation5 + $0x260] sm:$0xff]  ;;  %v676_v57 = vld [vmem:[#allocation5 + $0x258] sm:$0xff]  ;;  %v4383_v61 = vld [vmem:[%s4326_s13 + $0x8] sm:$0xff] }
  0x49   : > { %3859 = vmatpush.msra.mxu3 %v624_v17  ;;  %866 = vmatpush.msra.mxu1 %v624_v17  ;;  %v4370_v53 = vld [vmem:[%s4326_s13] sm:$0xff]  ;;  %v4386_v62 = vld [vmem:[%s4326_s13 + $0x88] sm:$0xff]  ;;  %v399_v63 = vrot.slane %v4383_v61, 7  ;;  %v675_v2 = vld [vmem:[#allocation5 + $0x250] sm:$0xff] }
  0x4a   : > { %754 = vmatpush.msra.mxu0 %v607_v18  ;;  %3844 = vmatpush.msra.mxu2 %v607_v18  ;;  %v4373_v55 = vld [vmem:[%s4326_s13 + $0x80] sm:$0xff]  ;;  %v4376_v59 = vrot.slane %v4370_v53, 7  ;;  %v642_v0 = vld [vmem:[#allocation5 + $0x148] sm:$0xff]  ;;  %v423_v3 = vrot.slane %v4386_v62, 7  ;;  %v4408_v6 = vld [vmem:[%s4326_s13 + $0x10] sm:$0xff] }
  0x4b   : > { %3860 = vmatpush.msra.mxu3 %v623_v19  ;;  %867 = vmatpush.msra.mxu1 %v623_v19  ;;  %v4380_v60 = vrot.slane %v4373_v55, 7  ;;  %v658_v1 = vld [vmem:[#allocation5 + $0x1c8] sm:$0xff]  ;;  %v641_v7 = vld [vmem:[#allocation5 + $0x140] sm:$0xff]  ;;  %v4413_v10 = vld [vmem:[%s4326_s13 + $0x90] sm:$0xff]  ;;  %v4416_v11 = vrot.slane %v4408_v6, 7 }
  0x4c   : > { %755 = vmatpush.msra.mxu0 %v606_v20  ;;  %3845 = vmatpush.msra.mxu2 %v606_v20  ;;  %v4400_v4 = vsel %vm395_vm0, %v4376_v59, %v399_v63  ;;  %v657_v8 = vld [vmem:[#allocation5 + $0x1c0] sm:$0xff]  ;;  %v674_v9 = vld [vmem:[#allocation5 + $0x248] sm:$0xff]  ;;  %v4420_v12 = vrot.slane %v4413_v10, 7  ;;  %v4423_v13 = vld [vmem:[%s4326_s13 + $0x18] sm:$0xff] }
  0x4d   : > { %3861 = vmatpush.msra.mxu3 %v622_v21  ;;  %868 = vmatpush.msra.mxu1 %v622_v21  ;;  %7057 = vst [vmem:[#allocation15_spill] sm:$0xff] %v4380_v60  ;;  %v4404_v5 = vsel %vm395_vm0, %v4380_v60, %v423_v3  ;;  %v4426_v14 = vld [vmem:[%s4326_s13 + $0x98] sm:$0xff]  ;;  %v402_v15 = vrot.slane %v4423_v13, 7  ;;  %v673_v18 = vld [vmem:[#allocation5 + $0x240] sm:$0xff] }
  0x4e   : > { %756 = vmatpush.msra.mxu0 %v605_v22  ;;  %3846 = vmatpush.msra.mxu2 %v605_v22  ;;  %7058 = vst [vmem:[#allocation16_spill] sm:$0xff] %v4416_v11  ;;  %v640_v16 = vld [vmem:[#allocation5 + $0x138] sm:$0xff]  ;;  %v426_v19 = vrot.slane %v4426_v14, 7  ;;  %v4448_v22 = vld [vmem:[%s4326_s13 + $0x20] sm:$0xff] }
  0x4f   : > { %3862 = vmatpush.msra.mxu3 %v621_v23  ;;  %869 = vmatpush.msra.mxu1 %v621_v23  ;;  %v656_v17 = vld [vmem:[#allocation5 + $0x1b8] sm:$0xff]  ;;  %v4440_v20 = vsel %vm395_vm0, %v4416_v11, %v402_v15  ;;  %v639_v23 = vld [vmem:[#allocation5 + $0x130] sm:$0xff]  ;;  %v669_v63 = vld [vmem:[#allocation5 + $0x220] sm:$0xff] }
  0x50   : > { %757 = vmatpush.msra.mxu0 %v604_v24  ;;  %3847 = vmatpush.msra.mxu2 %v604_v24  ;;  %7059 = vst [vmem:[#allocation17_spill] sm:$0xff] %v4440_v20  ;;  %v4444_v21 = vsel %vm395_vm0, %v4420_v12, %v426_v19  ;;  %v655_v24 = vld [vmem:[#allocation5 + $0x1b0] sm:$0xff]  ;;  %v4528_v3 = vld [vmem:[%s4326_s13 + $0x40] sm:$0xff] }
  0x51   : > { %3863 = vmatpush.msra.mxu3 %v620_v25  ;;  %870 = vmatpush.msra.mxu1 %v620_v25  ;;  %v672_v25 = vld [vmem:[#allocation5 + $0x238] sm:$0xff]  ;;  %v4533_v15 = vld [vmem:[%s4326_s13 + $0xc0] sm:$0xff] }
  0x52   : > { %758 = vmatpush.msra.mxu0 %v603_v26  ;;  %3848 = vmatpush.msra.mxu2 %v603_v26  ;;  %v4453_v26 = vld [vmem:[%s4326_s13 + $0xa0] sm:$0xff]  ;;  %v4540_v19 = vrot.slane %v4533_v15, 7 }
  0x53   : > { %3864 = vmatpush.msra.mxu3 %v619_v27  ;;  %871 = vmatpush.msra.mxu1 %v619_v27  ;;  %v4456_v27 = vrot.slane %v4448_v22, 7 }
  0x54   : > { %759 = vmatpush.msra.mxu0 %v602_v28  ;;  %3849 = vmatpush.msra.mxu2 %v602_v28  ;;  %v4460_v28 = vrot.slane %v4453_v26, 7 }
  0x55   : > { %3865 = vmatpush.msra.mxu3 %v618_v30  ;;  %872 = vmatpush.msra.mxu1 %v618_v30  ;;  %7060 = vst [vmem:[#allocation18_spill] sm:$0xff] %v4456_v27  ;;  %v4463_v30 = vld [vmem:[%s4326_s13 + $0x28] sm:$0xff] }
  0x56   : > { %760 = vmatpush.msra.mxu0 %v601_v31  ;;  %3850 = vmatpush.msra.mxu2 %v601_v31  ;;  %v4466_v31 = vld [vmem:[%s4326_s13 + $0xa8] sm:$0xff] }
  0x57   : > { %3866 = vmatpush.msra.mxu3 %v617_v34  ;;  %3541 = vmatmul.msk.f32.vlgmr.msra.gmra.mxu0 %vm4343_vm1, %v4340_v33 }
  0x58   : > { %3557 = vmatmul.msk.f32.vlgmr.msra.gmra.mxu2 %vm4343_vm1, %v4348_v36  ;;  %922 = vmatmul.f32.vlgmr.msra.gmra.mxu3 %v4337_v29 }
  0x59   : > { %971 = vmatpush.msrb.mxu2 %v648_v37  ;;  %1084 = vmatpush.msrb.mxu3 %v664_v38  ;;  %v638_v37 = vld [vmem:[#allocation5 + $0x128] sm:$0xff] }
  0x5a   : > { %873 = vmatpush.msra.mxu1 %v617_v34  ;;  %1197 = vmatpush.msrb.mxu0 %v680_v40  ;;  %v405_v34 = vrot.slane %v4463_v30, 7  ;;  %v654_v38 = vld [vmem:[#allocation5 + $0x1a8] sm:$0xff]  ;;  %v671_v40 = vld [vmem:[#allocation5 + $0x230] sm:$0xff] }
  0x5b   : > { %972 = vmatpush.msrb.mxu2 %v647_v41  ;;  %874 = vmatmul.f32.vlgmr.msra.gmra.mxu1 %v6901_v32  ;;  %v429_v41 = vrot.slane %v4466_v31, 7 }
  0x5c   : > { %1085 = vmatpush.msrb.mxu3 %v663_v43  ;;  %1198 = vmatpush.msrb.mxu0 %v679_v44  ;;  %v4480_v42 = vsel %vm395_vm0, %v4456_v27, %v405_v34  ;;  %v4488_v44 = vld [vmem:[%s4326_s13 + $0x30] sm:$0xff]  ;;  %v634_v34 = vld [vmem:[#allocation5 + $0x108] sm:$0xff] }
  0x5d   : > { %973 = vmatpush.msrb.mxu2 %v646_v45  ;;  %7061 = vst [vmem:[#allocation19_spill] sm:$0xff] %v4480_v42  ;;  %v4484_v43 = vsel %vm395_vm0, %v4460_v28, %v429_v41  ;;  %v637_v45 = vld [vmem:[#allocation5 + $0x120] sm:$0xff]  ;;  %v667_v41 = vld [vmem:[#allocation5 + $0x210] sm:$0xff] }
  0x5e   : > { %1086 = vmatpush.msrb.mxu3 %v662_v46  ;;  %1199 = vmatpush.msrb.mxu0 %v678_v47  ;;  %v653_v46 = vld [vmem:[#allocation5 + $0x1a0] sm:$0xff]  ;;  %v670_v47 = vld [vmem:[#allocation5 + $0x228] sm:$0xff] }
  0x5f   : > { %764 = vmatmul.f32.gmra.mxu0 %v4340_v33  ;;  %974 = vmatpush.msrb.mxu2 %v645_v48  ;;  %v4493_v48 = vld [vmem:[%s4326_s13 + $0xb0] sm:$0xff]  ;;  %v682_v33 = vld [vmem:[#allocation5 + $0x288] sm:$0xff] }
  0x60   : > { %812 = vmatmul.f32.gmra.mxu2 %v4364_v49  ;;  %925 = vmatmul.f32.gmra.mxu3 %v4351_v39 }
  0x61   : > { %1087 = vmatpush.msrb.mxu3 %v661_v50  ;;  %975 = vmatpush.msrb.mxu2 %v644_v51  ;;  %v4496_v50 = vrot.slane %v4488_v44, 7  ;;  %v4500_v51 = vrot.slane %v4493_v48, 7 }
  0x62   : > { %1200 = vmatpush.msrb.mxu0 %v677_v52  ;;  %v4503_v52 = vld [vmem:[%s4326_s13 + $0x38] sm:$0xff] }
  0x63   : > { %877 = vmatmul.f32.gmra.mxu1 %v6901_v32  ;;  %1088 = vmatpush.msrb.mxu3 %v660_v54  ;;  %7062 = vst [vmem:[#allocation20_spill] sm:$0xff] %v4496_v50  ;;  %v4506_v54 = vld [vmem:[%s4326_s13 + $0xb8] sm:$0xff]  ;;  %v4626_v32 = vld [vmem:[%s4326_s13 + $0xe8] sm:$0xff] }
  0x64   : > { %976 = vmatpush.msrb.mxu2 %v643_v56  ;;  %1201 = vmatpush.msrb.mxu0 %v676_v57  ;;  %v408_v56 = vrot.slane %v4503_v52, 7  ;;  %v636_v57 = vld [vmem:[#allocation5 + $0x118] sm:$0xff]  ;;  %7076 = vst [vmem:[#allocation34_spill] sm:$0xff] %v4626_v32 }
  0x65   : > { %1089 = vmatpush.msrb.mxu3 %v659_v58  ;;  %v652_v58 = vld [vmem:[#allocation5 + $0x198] sm:$0xff] }
  0x66   : > { %977 = vmatpush.msrb.mxu2 %v642_v0  ;;  %1202 = vmatpush.msrb.mxu0 %v675_v2  ;;  %v432_v0 = vrot.slane %v4506_v54, 7 }
  0x67   : > { %3543 = vmatmul.msk.f32.gmra.mxu0 %vm4343_vm1, %v4376_v59  ;;  %1090 = vmatpush.msrb.mxu3 %v658_v1  ;;  %v4520_v1 = vsel %vm395_vm0, %v4496_v50, %v408_v56 }
  0x68   : > { %3559 = vmatmul.msk.f32.gmra.mxu2 %vm4343_vm1, %v4380_v60  ;;  %928 = vmatmul.f32.gmra.mxu3 %v4373_v55  ;;  %7063 = vst [vmem:[#allocation21_spill] sm:$0xff] %v4520_v1  ;;  %v4524_v2 = vsel %vm395_vm0, %v4500_v51, %v432_v0  ;;  %v649_v0 = vld [vmem:[#allocation5 + $0x180] sm:$0xff] }
  0x69   : > { %978 = vmatpush.msrb.mxu2 %v641_v7  ;;  %1091 = vmatpush.msrb.mxu3 %v657_v8  ;;  %v635_v7 = vld [vmem:[#allocation5 + $0x110] sm:$0xff] }
  0x6a   : > { %1203 = vmatpush.msrb.mxu0 %v674_v9  ;;  %v651_v8 = vld [vmem:[#allocation5 + $0x190] sm:$0xff]  ;;  %v668_v9 = vld [vmem:[#allocation5 + $0x218] sm:$0xff] }
  0x6b   : > { %880 = vmatmul.f32.gmra.mxu1 %v4370_v53  ;;  %979 = vmatpush.msrb.mxu2 %v640_v16  ;;  %v696_v16 = vld [vmem:[#allocation5 + $0x2f8] sm:$0xff] }
  0x6c   : > { %1092 = vmatpush.msrb.mxu3 %v656_v17  ;;  %1204 = vmatpush.msrb.mxu0 %v673_v18  ;;  %v695_v17 = vld [vmem:[#allocation5 + $0x2f0] sm:$0xff]  ;;  %v4536_v18 = vrot.slane %v4528_v3, 7 }
  0x6d   : > { %980 = vmatpush.msrb.mxu2 %v639_v23  ;;  %1310 = vmatpush.msrb.mxu1 %v696_v16  ;;  %v4543_v23 = vld [vmem:[%s4326_s13 + $0x48] sm:$0xff] }
  0x6e   : > { %1093 = vmatpush.msrb.mxu3 %v655_v24  ;;  %1205 = vmatpush.msrb.mxu0 %v672_v25  ;;  %7064 = vst [vmem:[#allocation22_spill] sm:$0xff] %v4536_v18  ;;  %v4546_v24 = vld [vmem:[%s4326_s13 + $0xc8] sm:$0xff]  ;;  %v411_v25 = vrot.slane %v4543_v23, 7 }
  0x6f   : > { %770 = vmatmul.f32.gmra.mxu0 %v4400_v4  ;;  %981 = vmatpush.msrb.mxu2 %v638_v37  ;;  %v694_v37 = vld [vmem:[#allocation5 + $0x2e8] sm:$0xff] }
  0x70   : > { %818 = vmatmul.f32.gmra.mxu2 %v4404_v5  ;;  %931 = vmatmul.f32.gmra.mxu3 %v4386_v62 }
  0x71   : > { %1094 = vmatpush.msrb.mxu3 %v654_v38  ;;  %1206 = vmatpush.msrb.mxu0 %v671_v40  ;;  %v650_v38 = vld [vmem:[#allocation5 + $0x188] sm:$0xff]  ;;  %v435_v40 = vrot.slane %v4546_v24, 7 }
  0x72   : > { %982 = vmatpush.msrb.mxu2 %v637_v45  ;;  %1311 = vmatpush.msrb.mxu1 %v695_v17  ;;  %v693_v45 = vld [vmem:[#allocation5 + $0x2e0] sm:$0xff] }
  0x73   : > { %883 = vmatmul.f32.gmra.mxu1 %v4383_v61  ;;  %1095 = vmatpush.msrb.mxu3 %v653_v46  ;;  %v692_v46 = vld [vmem:[#allocation5 + $0x2d8] sm:$0xff]  ;;  %v4564_v56 = vsel %vm395_vm0, %v4540_v19, %v435_v40  ;;  %v689_v17 = vld [vmem:[#allocation5 + $0x2c0] sm:$0xff] }
  0x74   : > { %1207 = vmatpush.msrb.mxu0 %v670_v47  ;;  %983 = vmatpush.msrb.mxu2 %v636_v57  ;;  %v4560_v47 = vsel %vm395_vm0, %v4536_v18, %v411_v25  ;;  %7066 = vst [vmem:[#allocation24_spill] sm:$0xff] %v4564_v56  ;;  %v691_v57 = vld [vmem:[#allocation5 + $0x2d0] sm:$0xff]  ;;  %v688_v40 = vld [vmem:[#allocation5 + $0x2b8] sm:$0xff] }
  0x75   : > { %1096 = vmatpush.msrb.mxu3 %v652_v58  ;;  %1312 = vmatpush.msrb.mxu1 %v694_v37  ;;  %7065 = vst [vmem:[#allocation23_spill] sm:$0xff] %v4560_v47  ;;  %v4570_v58 = vld [vmem:[%s4326_s13 + $0x50] sm:$0xff]  ;;  %v4583_v37 = vld [vmem:[%s4326_s13 + $0x58] sm:$0xff] }
  0x76   : > { %1208 = vmatpush.msrb.mxu0 %v669_v63  ;;  %984 = vmatpush.msrb.mxu2 %v635_v7  ;;  %v633_v63 = vld [vmem:[#allocation5 + $0x100] sm:$0xff]  ;;  %v4573_v7 = vld [vmem:[%s4326_s13 + $0xd0] sm:$0xff]  ;;  %v4576_v16 = vrot.slane %v4570_v58, 7 }
  0x77   : > { %3545 = vmatmul.msk.f32.gmra.mxu0 %vm4343_vm1, %v4416_v11  ;;  %1097 = vmatpush.msrb.mxu3 %v651_v8  ;;  %7067 = vst [vmem:[#allocation25_spill] sm:$0xff] %v4573_v7  ;;  %v690_v8 = vld [vmem:[#allocation5 + $0x2c8] sm:$0xff]  ;;  %v4580_v25 = vrot.slane %v4573_v7, 7 }
  0x78   : > { %3561 = vmatmul.msk.f32.gmra.mxu2 %vm4343_vm1, %v4420_v12  ;;  %934 = vmatmul.f32.gmra.mxu3 %v4413_v10  ;;  %7068 = vst [vmem:[#allocation26_spill] sm:$0xff] %v4576_v16 }
  0x79   : > { %1209 = vmatpush.msrb.mxu0 %v668_v9  ;;  %985 = vmatpush.msrb.mxu2 %v634_v34  ;;  %v666_v9 = vld [vmem:[#allocation5 + $0x208] sm:$0xff]  ;;  %7069 = vst [vmem:[#allocation27_spill] sm:$0xff] %v4580_v25  ;;  %v665_v34 = vld [vmem:[#allocation5 + $0x200] sm:$0xff] }
  0x7a   : > { %1098 = vmatpush.msrb.mxu3 %v650_v38  ;;  %1313 = vmatpush.msrb.mxu1 %v693_v45  ;;  %v4586_v38 = vld [vmem:[%s4326_s13 + $0xd8] sm:$0xff] }
  0x7b   : > { %886 = vmatmul.f32.gmra.mxu1 %v4408_v6  ;;  %1210 = vmatpush.msrb.mxu0 %v667_v41  ;;  %7070 = vst [vmem:[#allocation28_spill] sm:$0xff] %v4586_v38  ;;  %v414_v41 = vrot.slane %v4583_v37, 7  ;;  %v712_v45 = vld [vmem:[#allocation5 + $0x378] sm:$0xff] }
  0x7c   : > { %1314 = vmatpush.msrb.mxu1 %v692_v46  ;;  %986 = vmatpush.msrb.mxu2 %v633_v63  ;;  %v728_v46 = vld [vmem:[#allocation5 + $0x3f8] sm:$0xff]  ;;  %v687_v63 = vld [vmem:[#allocation5 + $0x2b0] sm:$0xff] }
  0x7d   : > { %1099 = vmatpush.msrb.mxu3 %v649_v0  ;;  %1211 = vmatpush.msrb.mxu0 %v666_v9  ;;  %v686_v0 = vld [vmem:[#allocation5 + $0x2a8] sm:$0xff] }
  0x7e   : > { %1315 = vmatpush.msrb.mxu1 %v691_v57  ;;  %v438_v57 = vrot.slane %v4586_v38, 7  ;;  %1423 = vmatpush.msra.mxu2 %v712_v45  ;;  %v684_v45 = vld [vmem:[#allocation5 + $0x298] sm:$0xff] }
  0x7f   : > { %776 = vmatmul.f32.gmra.mxu0 %v4440_v20  ;;  %1536 = vmatpush.msra.mxu3 %v728_v46 }
  0x80   : > { %824 = vmatmul.f32.gmra.mxu2 %v4444_v21  ;;  %937 = vmatmul.f32.gmra.mxu3 %v4426_v14  ;;  %v4604_v9 = vsel %vm395_vm0, %v4580_v25, %v438_v57  ;;  %v683_v57 = vld [vmem:[#allocation5 + $0x290] sm:$0xff] }
  0x81   : > { %1316 = vmatpush.msrb.mxu1 %v690_v8  ;;  %1212 = vmatpush.msrb.mxu0 %v665_v34  ;;  %v4600_v8 = vsel %vm395_vm0, %v4576_v16, %v414_v41  ;;  %7072 = vst [vmem:[#allocation30_spill] sm:$0xff] %v4604_v9  ;;  %v4610_v34 = vld [vmem:[%s4326_s13 + $0x60] sm:$0xff] }
  0x82   : > { %7071 = vst [vmem:[#allocation29_spill] sm:$0xff] %v4600_v8  ;;  %v4613_v41 = vld [vmem:[%s4326_s13 + $0xe0] sm:$0xff]  ;;  %v4616_v46 = vrot.slane %v4610_v34, 7 }
  0x83   : > { %889 = vmatmul.f32.gmra.mxu1 %v4423_v13  ;;  %7073 = vst [vmem:[#allocation31_spill] sm:$0xff] %v4613_v41 }
  0x84   : > { %1317 = vmatpush.msrb.mxu1 %v689_v17  ;;  %v685_v17 = vld [vmem:[#allocation5 + $0x2a0] sm:$0xff]  ;;  %7074 = vst [vmem:[#allocation32_spill] sm:$0xff] %v4616_v46 }
  0x86   : > { %1318 = vmatpush.msrb.mxu1 %v688_v40  ;;  %v744_v40 = vld [vmem:[#allocation5 + $0x478] sm:$0xff] }
  0x87   : > { %3547 = vmatmul.msk.f32.gmra.mxu0 %vm4343_vm1, %v4456_v27 }
  0x88   : > { %3563 = vmatmul.msk.f32.gmra.mxu2 %vm4343_vm1, %v4460_v28  ;;  %940 = vmatmul.f32.gmra.mxu3 %v4453_v26 }
  0x89   : > { %1319 = vmatpush.msrb.mxu1 %v687_v63  ;;  %1649 = vmatpush.msra.mxu0 %v744_v40  ;;  %v4620_v63 = vrot.slane %v4613_v41, 7  ;;  %v711_v40 = vld [vmem:[#allocation5 + $0x370] sm:$0xff] }
  0x8a   : > { %1424 = vmatpush.msra.mxu2 %v711_v40 }
  0x8b   : > { %892 = vmatmul.f32.gmra.mxu1 %v4448_v22  ;;  %7075 = vst [vmem:[#allocation33_spill] sm:$0xff] %v4620_v63 }
  0x8c   : > { %1320 = vmatpush.msrb.mxu1 %v686_v0  ;;  %v4623_v0 = vld [vmem:[%s4326_s13 + $0x68] sm:$0xff] }
  0x8e   : > { %1321 = vmatpush.msrb.mxu1 %v685_v17  ;;  %v417_v17 = vrot.slane %v4623_v0, 7 }
  0x8f   : > { %782 = vmatmul.f32.gmra.mxu0 %v4480_v42 }
  0x90   : > { %830 = vmatmul.f32.gmra.mxu2 %v4484_v43  ;;  %943 = vmatmul.f32.gmra.mxu3 %v4466_v31 }
  0x91   : > { %1322 = vmatpush.msrb.mxu1 %v684_v45  ;;  %v727_v45 = vld [vmem:[#allocation5 + $0x3f0] sm:$0xff] }
  0x92   : > { %1537 = vmatpush.msra.mxu3 %v727_v45  ;;  %v7079_v45 = vmov 0.0  }
  0x93   : > { %895 = vmatmul.f32.gmra.mxu1 %v4463_v30 }
  0x94   : > { %1323 = vmatpush.msrb.mxu1 %v683_v57  ;;  %v4640_v57 = vsel %vm395_vm0, %v4616_v46, %v417_v17  ;;  %v4653_v17 = vrot.slane %v7079_v45, 1  ;;  %v726_v45 = vld [vmem:[#allocation5 + $0x3e8] sm:$0xff] }
  0x95   : > { %7077 = vst [vmem:[#allocation35_spill] sm:$0xff] %v4640_v57  ;;  %1538 = vmatpush.msra.mxu3 %v726_v45 }
  0x96   : > { %1324 = vmatpush.msrb.mxu1 %v682_v33  ;;  %v743_v33 = vld [vmem:[#allocation5 + $0x470] sm:$0xff]  ;;  %7080 = vst [vmem:[#allocation37_spill] sm:$0xff] %v4653_v17 }
  0x97   : > { %3549 = vmatmul.msk.f32.gmra.mxu0 %vm4343_vm1, %v4496_v50 }
  0x98   : > { %3565 = vmatmul.msk.f32.gmra.mxu2 %vm4343_vm1, %v4500_v51  ;;  %946 = vmatmul.f32.gmra.mxu3 %v4493_v48 }
  0x99   : > { %1650 = vmatpush.msra.mxu0 %v743_v33 }
  0x9b   : > { %898 = vmatmul.f32.gmra.mxu1 %v4488_v44 }
  0x9f   : > { %788 = vmatmul.f32.gmra.mxu0 %v4520_v1 }
  0xa0   : > { %836 = vmatmul.f32.gmra.mxu2 %v4524_v2  ;;  %949 = vmatmul.f32.gmra.mxu3 %v4506_v54 }
  0xa3   : > { %901 = vmatmul.f32.gmra.mxu1 %v4503_v52 }
  0xa7   : > { %3551 = vmatmul.msk.f32.gmra.mxu0 %vm4343_vm1, %v4536_v18 }
  0xa8   : > { %3567 = vmatmul.msk.f32.gmra.mxu2 %vm4343_vm1, %v4540_v19  ;;  %952 = vmatmul.f32.gmra.mxu3 %v4533_v15 }
  0xab   : > { %904 = vmatmul.f32.gmra.mxu1 %v4528_v3 }
  0xaf   : > { %794 = vmatmul.f32.gmra.mxu0 %v4560_v47 }
  0xb0   : > { %842 = vmatmul.f32.gmra.mxu2 %v4564_v56  ;;  %955 = vmatmul.f32.gmra.mxu3 %v4546_v24 }
  0xb3   : > { %907 = vmatmul.f32.gmra.mxu1 %v4543_v23 }
  0xb7   : > { %3553 = vmatmul.msk.f32.gmra.mxu0 %vm4343_vm1, %v4576_v16 }
  0xb8   : > { %3569 = vmatmul.msk.f32.gmra.mxu2 %vm4343_vm1, %v4580_v25  ;;  %958 = vmatmul.f32.gmra.mxu3 %v4573_v7  ;;  %v681_v25 = vld [vmem:[#allocation5 + $0x280] sm:$0xff] }
  0xb9   : > { %1325 = vmatpush.msrb.mxu1 %v681_v25  ;;  %v494_v25 = vrot.slane %v4370_v53, 1 }
  0xbb   : > { %910 = vmatmul.f32.gmra.mxu1 %v4570_v58 }
  0xbf   : > { %800 = vmatmul.f32.gmra.mxu0 %v4600_v8 }
  0xc0   : > { %848 = vmatmul.f32.gmra.mxu2 %v4604_v9  ;;  %961 = vmatmul.f32.gmra.mxu3 %v4586_v38  ;;  %v441_v9 = vrot.slane %v4626_v32, 7 }
  0xc3   : > { %913 = vmatmul.f32.gmra.mxu1 %v4583_v37 }
  0xc7   : > { %3555 = vmatmul.msk.f32.gmra.mxu0 %vm4343_vm1, %v4616_v46 }
  0xc8   : > { %3571 = vmatmul.msk.f32.gmra.mxu2 %vm4343_vm1, %v4620_v63  ;;  %964 = vmatmul.f32.gmra.mxu3 %v4613_v41  ;;  %v4644_v41 = vsel %vm395_vm0, %v4620_v63, %v441_v9  ;;  %v495_v9 = vrot.slane %v4383_v61, 1  ;;  %v710_v63 = vld [vmem:[#allocation5 + $0x368] sm:$0xff] }
  0xc9   : > { %7078 = vst [vmem:[#allocation36_spill] sm:$0xff] %v4644_v41  ;;  %1425 = vmatpush.msra.mxu2 %v710_v63 }
  0xcb   : > { %916 = vmatmul.f32.gmra.mxu1 %v4610_v34 }
  0xcf   : > { %806 = vmatmul.f32.gmra.mxu0 %v4640_v57 }
  0xd0   : > { %854 = vmatmul.f32.gmra.mxu2 %v4644_v41  ;;  %967 = vmatmul.f32.gmra.mxu3 %v4626_v32  ;;  %v496_v41 = vsel %vm491_vm2, %v494_v25, %v495_v9  ;;  %v742_v25 = vld [vmem:[#allocation5 + $0x468] sm:$0xff] }
  0xd1   : > { %1651 = vmatpush.msra.mxu0 %v742_v25 }
  0xd3   : > { %919 = vmatmul.f32.gmra.mxu1 %v4623_v0 }
  0xd4   : > { %v4650_v40 = vpop.f32.mrf.mxu0 }
  0xd7   : > { %1213 = vmatmul.f32.vlgmr.msrb.gmra.mxu0 %v4370_v53 }
  0xd8   : > { %987 = vmatmul.f32.vlgmr.msrb.gmra.mxu2 %v4653_v17  ;;  %3589 = vmatmul.msk.f32.vlgmr.msrb.gmra.mxu3 %vm4343_vm1, %v4376_v59  ;;  %v4662_v33 = vpop.f32.mrf.mxu1 }
  0xdb   : > { %v810_v32 = vpop.f32.mrf.mxu2  ;;  %v923_v38 = vpop.f32.mrf.mxu3  ;;  %1326 = vmatmul.f32.vlgmr.msrb.gmra.mxu1 %v496_v41 }
  0xdc   : > { %v4665_v7 = vadd.f32 %v923_v38, %v810_v32  ;;  %v4667_v53 = vpop.f32.mrf.mxu0  ;;  %v497_v38 = vrot.slane %v4408_v6, 1 }
  0xde   : > { %7081 = vst [vmem:[#allocation38_spill] sm:$0xff] %v4665_v7  ;;  %v741_v7 = vld [vmem:[#allocation5 + $0x460] sm:$0xff] }
  0xdf   : > { %1216 = vmatmul.f32.gmra.mxu0 %v4383_v61  ;;  %v4682_v61 = vrot.slane %v4423_v13, 1 }
  0xe0   : > { %3572 = vmatmul.msk.f32.gmra.mxu2 %vm491_vm2, %v4653_v17  ;;  %1103 = vmatmul.f32.gmra.mxu3 %v4400_v4  ;;  %v4673_v59 = vpop.f32.mrf.mxu1 }
  0xe1   : > { %7083 = vst [vmem:[#allocation40_spill] sm:$0xff] %v4682_v61  ;;  %v4692_v25 = vsel %vm491_vm2, %v497_v38, %v4682_v61  ;;  %1652 = vmatpush.msra.mxu0 %v741_v7 }
  0xe2   : > { %7084 = vst [vmem:[#allocation41_spill] sm:$0xff] %v4692_v25 }
  0xe3   : > { %v813_v63 = vpop.f32.mrf.mxu2  ;;  %v926_v45 = vpop.f32.mrf.mxu3  ;;  %3620 = vmatmul.msk.f32.gmra.mxu1 %vm491_vm2, %v495_v9 }
  0xe4   : > { %v4676_v56 = vadd.f32 %v926_v45, %v813_v63  ;;  %v4678_v32 = vpop.f32.mrf.mxu0  ;;  %v709_v63 = vld [vmem:[#allocation5 + $0x360] sm:$0xff] }
  0xe5   : > { %v725_v45 = vld [vmem:[#allocation5 + $0x3e0] sm:$0xff]  ;;  %1426 = vmatpush.msra.mxu2 %v709_v63 }
  0xe6   : > { %7082 = vst [vmem:[#allocation39_spill] sm:$0xff] %v4676_v56  ;;  %1539 = vmatpush.msra.mxu3 %v725_v45 }
  0xe7   : > { %1219 = vmatmul.f32.gmra.mxu0 %v4408_v6 }
  0xe8   : > { %993 = vmatmul.f32.gmra.mxu2 %v496_v41  ;;  %3591 = vmatmul.msk.f32.gmra.mxu3 %vm4343_vm1, %v4416_v11  ;;  %v4688_v4 = vpop.f32.mrf.mxu1 }
  0xeb   : > { %v816_v17 = vpop.f32.mrf.mxu2  ;;  %v929_v56 = vpop.f32.mrf.mxu3  ;;  %1332 = vmatmul.f32.gmra.mxu1 %v4692_v25 }
  0xec   : > { %v4695_v6 = vadd.f32 %v929_v56, %v816_v17  ;;  %v4697_v41 = vpop.f32.mrf.mxu0  ;;  %v500_v17 = vrot.slane %v4448_v22, 1 }
  0xee   : > { %7085 = vst [vmem:[#allocation42_spill] sm:$0xff] %v4695_v6 }
  0xef   : > { %1222 = vmatmul.f32.gmra.mxu0 %v4423_v13  ;;  %v4712_v13 = vrot.slane %v4463_v30, 1 }
  0xf0   : > { %3573 = vmatmul.msk.f32.gmra.mxu2 %vm491_vm2, %v495_v9  ;;  %1109 = vmatmul.f32.gmra.mxu3 %v4440_v20  ;;  %v4702_v38 = vpop.f32.mrf.mxu1 }
  0xf1   : > { %7087 = vst [vmem:[#allocation44_spill] sm:$0xff] %v4712_v13  ;;  %v4723_v9 = vsel %vm491_vm2, %v500_v17, %v4712_v13 }
  0xf2   : > { %7088 = vst [vmem:[#allocation45_spill] sm:$0xff] %v4723_v9 }
  0xf3   : > { %v819_v63 = vpop.f32.mrf.mxu2  ;;  %v932_v45 = vpop.f32.mrf.mxu3  ;;  %3621 = vmatmul.msk.f32.gmra.mxu1 %vm491_vm2, %v4682_v61 }
  0xf4   : > { %v4706_v11 = vadd.f32 %v932_v45, %v819_v63  ;;  %v4708_v56 = vpop.f32.mrf.mxu0  ;;  %v708_v63 = vld [vmem:[#allocation5 + $0x358] sm:$0xff] }
  0xf5   : > { %v724_v45 = vld [vmem:[#allocation5 + $0x3d8] sm:$0xff]  ;;  %1427 = vmatpush.msra.mxu2 %v708_v63 }
  0xf6   : > { %7086 = vst [vmem:[#allocation43_spill] sm:$0xff] %v4706_v11  ;;  %1540 = vmatpush.msra.mxu3 %v724_v45 }
  0xf7   : > { %1225 = vmatmul.f32.gmra.mxu0 %v4448_v22 }
  0xf8   : > { %999 = vmatmul.f32.gmra.mxu2 %v4692_v25  ;;  %3593 = vmatmul.msk.f32.gmra.mxu3 %vm4343_vm1, %v4456_v27  ;;  %v4719_v7 = vpop.f32.mrf.mxu1  ;;  %v740_v27 = vld [vmem:[#allocation5 + $0x458] sm:$0xff] }
  0xf9   : > { %1653 = vmatpush.msra.mxu0 %v740_v27  ;;  %v2105_v25 = vld [vmem:[#allocation7 + $0x78] sm:$0xff] }
  0xfa   : > { %2234 = vmatpush.msra.mxu1 %v2105_v25  ;;  %v4872_v25 = vrot.slane %v4351_v39, 1 }
  0xfb   : > { %v822_v11 = vpop.f32.mrf.mxu2  ;;  %v935_v6 = vpop.f32.mrf.mxu3  ;;  %1338 = vmatmul.f32.gmra.mxu1 %v4723_v9 }
  0xfc   : > { %v4726_v22 = vadd.f32 %v935_v6, %v822_v11  ;;  %v4728_v20 = vpop.f32.mrf.mxu0 }
  0xfe   : > { %7089 = vst [vmem:[#allocation46_spill] sm:$0xff] %v4726_v22  ;;  %v4744_v22 = vrot.slane %v4503_v52, 1 }
  0xff   : > { %1228 = vmatmul.f32.gmra.mxu0 %v4463_v30  ;;  %v503_v30 = vrot.slane %v4488_v44, 1 }
 0x100   : > { %3574 = vmatmul.msk.f32.gmra.mxu2 %vm491_vm2, %v4682_v61  ;;  %1115 = vmatmul.f32.gmra.mxu3 %v4480_v42  ;;  %v4734_v17 = vpop.f32.mrf.mxu1  ;;  %7091 = vst [vmem:[#allocation48_spill] sm:$0xff] %v4744_v22 }
 0x103   : > { %v825_v63 = vpop.f32.mrf.mxu2  ;;  %v938_v45 = vpop.f32.mrf.mxu3  ;;  %3622 = vmatmul.msk.f32.gmra.mxu1 %vm491_vm2, %v4712_v13 }
 0x104   : > { %v4738_v11 = vadd.f32 %v938_v45, %v825_v63  ;;  %v4740_v6 = vpop.f32.mrf.mxu0  ;;  %v4755_v63 = vsel %vm491_vm2, %v503_v30, %v4744_v22  ;;  %v707_v45 = vld [vmem:[#allocation5 + $0x350] sm:$0xff] }
 0x105   : > { %7092 = vst [vmem:[#allocation49_spill] sm:$0xff] %v4755_v63  ;;  %1428 = vmatpush.msra.mxu2 %v707_v45 }
 0x106   : > { %7090 = vst [vmem:[#allocation47_spill] sm:$0xff] %v4738_v11  ;;  %v723_v11 = vld [vmem:[#allocation5 + $0x3d0] sm:$0xff] }
 0x107   : > { %1231 = vmatmul.f32.gmra.mxu0 %v4488_v44  ;;  %1541 = vmatpush.msra.mxu3 %v723_v11 }
 0x108   : > { %1005 = vmatmul.f32.gmra.mxu2 %v4723_v9  ;;  %3595 = vmatmul.msk.f32.gmra.mxu3 %vm4343_vm1, %v4496_v50  ;;  %v4751_v27 = vpop.f32.mrf.mxu1  ;;  %v739_v50 = vld [vmem:[#allocation5 + $0x450] sm:$0xff] }
 0x109   : > { %1654 = vmatpush.msra.mxu0 %v739_v50 }
 0x10b   : > { %v828_v42 = vpop.f32.mrf.mxu2  ;;  %v941_v61 = vpop.f32.mrf.mxu3  ;;  %1344 = vmatmul.f32.gmra.mxu1 %v4755_v63 }
 0x10c   : > { %v4758_v44 = vadd.f32 %v941_v61, %v828_v42  ;;  %v4760_v9 = vpop.f32.mrf.mxu0 }
 0x10e   : > { %7093 = vst [vmem:[#allocation50_spill] sm:$0xff] %v4758_v44  ;;  %v4776_v44 = vrot.slane %v4543_v23, 1 }
 0x10f   : > { %1234 = vmatmul.f32.gmra.mxu0 %v4503_v52  ;;  %v506_v52 = vrot.slane %v4528_v3, 1 }
 0x110   : > { %3575 = vmatmul.msk.f32.gmra.mxu2 %vm491_vm2, %v4712_v13  ;;  %1121 = vmatmul.f32.gmra.mxu3 %v4520_v1  ;;  %v4766_v30 = vpop.f32.mrf.mxu1  ;;  %7095 = vst [vmem:[#allocation52_spill] sm:$0xff] %v4776_v44 }
 0x113   : > { %v831_v11 = vpop.f32.mrf.mxu2  ;;  %v944_v45 = vpop.f32.mrf.mxu3  ;;  %3623 = vmatmul.msk.f32.gmra.mxu1 %vm491_vm2, %v4744_v22 }
 0x114   : > { %v4770_v42 = vadd.f32 %v944_v45, %v831_v11  ;;  %v4772_v61 = vpop.f32.mrf.mxu0  ;;  %v4787_v11 = vsel %vm491_vm2, %v506_v52, %v4776_v44  ;;  %v706_v45 = vld [vmem:[#allocation5 + $0x348] sm:$0xff] }
 0x115   : > { %7096 = vst [vmem:[#allocation53_spill] sm:$0xff] %v4787_v11  ;;  %1429 = vmatpush.msra.mxu2 %v706_v45 }
 0x116   : > { %7094 = vst [vmem:[#allocation51_spill] sm:$0xff] %v4770_v42  ;;  %v722_v42 = vld [vmem:[#allocation5 + $0x3c8] sm:$0xff] }
 0x117   : > { %1237 = vmatmul.f32.gmra.mxu0 %v4528_v3  ;;  %1542 = vmatpush.msra.mxu3 %v722_v42 }
 0x118   : > { %1011 = vmatmul.f32.gmra.mxu2 %v4755_v63  ;;  %3597 = vmatmul.msk.f32.gmra.mxu3 %vm4343_vm1, %v4536_v18  ;;  %v4783_v50 = vpop.f32.mrf.mxu1  ;;  %v738_v18 = vld [vmem:[#allocation5 + $0x448] sm:$0xff] }
 0x119   : > { %1655 = vmatpush.msra.mxu0 %v738_v18 }
 0x11b   : > { %v834_v1 = vpop.f32.mrf.mxu2  ;;  %v947_v13 = vpop.f32.mrf.mxu3  ;;  %1350 = vmatmul.f32.gmra.mxu1 %v4787_v11 }
 0x11c   : > { %v4790_v3 = vadd.f32 %v947_v13, %v834_v1  ;;  %v4792_v63 = vpop.f32.mrf.mxu0 }
 0x11e   : > { %7097 = vst [vmem:[#allocation54_spill] sm:$0xff] %v4790_v3  ;;  %v4808_v3 = vrot.slane %v4583_v37, 1 }
 0x11f   : > { %1240 = vmatmul.f32.gmra.mxu0 %v4543_v23  ;;  %v509_v23 = vrot.slane %v4570_v58, 1 }
 0x120   : > { %3576 = vmatmul.msk.f32.gmra.mxu2 %vm491_vm2, %v4744_v22  ;;  %1127 = vmatmul.f32.gmra.mxu3 %v4560_v47  ;;  %v4798_v52 = vpop.f32.mrf.mxu1  ;;  %7099 = vst [vmem:[#allocation56_spill] sm:$0xff] %v4808_v3 }
 0x123   : > { %v837_v42 = vpop.f32.mrf.mxu2  ;;  %v950_v45 = vpop.f32.mrf.mxu3  ;;  %3624 = vmatmul.msk.f32.gmra.mxu1 %vm491_vm2, %v4776_v44 }
 0x124   : > { %v4802_v1 = vadd.f32 %v950_v45, %v837_v42  ;;  %v4804_v13 = vpop.f32.mrf.mxu0  ;;  %v4819_v42 = vsel %vm491_vm2, %v509_v23, %v4808_v3  ;;  %v705_v45 = vld [vmem:[#allocation5 + $0x340] sm:$0xff] }
 0x125   : > { %7100 = vst [vmem:[#allocation57_spill] sm:$0xff] %v4819_v42  ;;  %1430 = vmatpush.msra.mxu2 %v705_v45 }
 0x126   : > { %7098 = vst [vmem:[#allocation55_spill] sm:$0xff] %v4802_v1  ;;  %v721_v1 = vld [vmem:[#allocation5 + $0x3c0] sm:$0xff] }
 0x127   : > { %1243 = vmatmul.f32.gmra.mxu0 %v4570_v58  ;;  %1543 = vmatpush.msra.mxu3 %v721_v1 }
 0x128   : > { %1017 = vmatmul.f32.gmra.mxu2 %v4787_v11  ;;  %3599 = vmatmul.msk.f32.gmra.mxu3 %vm4343_vm1, %v4576_v16  ;;  %v4815_v18 = vpop.f32.mrf.mxu1  ;;  %v737_v16 = vld [vmem:[#allocation5 + $0x440] sm:$0xff] }
 0x129   : > { %1656 = vmatpush.msra.mxu0 %v737_v16 }
 0x12b   : > { %v840_v47 = vpop.f32.mrf.mxu2  ;;  %v953_v22 = vpop.f32.mrf.mxu3  ;;  %1356 = vmatmul.f32.gmra.mxu1 %v4819_v42 }
 0x12c   : > { %v4822_v58 = vadd.f32 %v953_v22, %v840_v47  ;;  %v4824_v11 = vpop.f32.mrf.mxu0 }
 0x12e   : > { %7101 = vst [vmem:[#allocation58_spill] sm:$0xff] %v4822_v58  ;;  %v4840_v58 = vrot.slane %v4623_v0, 1 }
 0x12f   : > { %1246 = vmatmul.f32.gmra.mxu0 %v4583_v37  ;;  %v512_v37 = vrot.slane %v4610_v34, 1 }
 0x130   : > { %3577 = vmatmul.msk.f32.gmra.mxu2 %vm491_vm2, %v4776_v44  ;;  %1133 = vmatmul.f32.gmra.mxu3 %v4600_v8  ;;  %v4830_v23 = vpop.f32.mrf.mxu1  ;;  %7103 = vst [vmem:[#allocation60_spill] sm:$0xff] %v4840_v58 }
 0x133   : > { %v843_v1 = vpop.f32.mrf.mxu2  ;;  %v956_v45 = vpop.f32.mrf.mxu3  ;;  %3625 = vmatmul.msk.f32.gmra.mxu1 %vm491_vm2, %v4808_v3 }
 0x134   : > { %v4834_v47 = vadd.f32 %v956_v45, %v843_v1  ;;  %v4836_v22 = vpop.f32.mrf.mxu0  ;;  %v4851_v1 = vsel %vm491_vm2, %v512_v37, %v4840_v58  ;;  %v704_v45 = vld [vmem:[#allocation5 + $0x338] sm:$0xff] }
 0x135   : > { %7104 = vst [vmem:[#allocation61_spill] sm:$0xff] %v4851_v1  ;;  %1431 = vmatpush.msra.mxu2 %v704_v45 }
 0x136   : > { %7102 = vst [vmem:[#allocation59_spill] sm:$0xff] %v4834_v47  ;;  %v720_v47 = vld [vmem:[#allocation5 + $0x3b8] sm:$0xff] }
 0x137   : > { %1249 = vmatmul.f32.gmra.mxu0 %v4610_v34  ;;  %1544 = vmatpush.msra.mxu3 %v720_v47  ;;  %v736_v47 = vld [vmem:[#allocation5 + $0x438] sm:$0xff] }
 0x138   : > { %1023 = vmatmul.f32.gmra.mxu2 %v4819_v42  ;;  %3601 = vmatmul.msk.f32.gmra.mxu3 %vm4343_vm1, %v4616_v46  ;;  %v4847_v16 = vpop.f32.mrf.mxu1 }
 0x139   : > { %1657 = vmatpush.msra.mxu0 %v736_v47  ;;  %v703_v47 = vld [vmem:[#allocation5 + $0x330] sm:$0xff] }
 0x13a   : > { %1432 = vmatpush.msra.mxu2 %v703_v47  ;;  %v735_v47 = vld [vmem:[#allocation5 + $0x430] sm:$0xff] }
 0x13b   : > { %v846_v8 = vpop.f32.mrf.mxu2  ;;  %v959_v44 = vpop.f32.mrf.mxu3  ;;  %1362 = vmatmul.f32.gmra.mxu1 %v4851_v1  ;;  %1658 = vmatpush.msra.mxu0 %v735_v47 }
 0x13c   : > { %v4854_v34 = vadd.f32 %v959_v44, %v846_v8  ;;  %v4856_v42 = vpop.f32.mrf.mxu0 }
 0x13e   : > { %7105 = vst [vmem:[#allocation62_spill] sm:$0xff] %v4854_v34 }
 0x13f   : > { %1252 = vmatmul.f32.gmra.mxu0 %v4623_v0  ;;  %v515_v0 = vrot.slane %v4337_v29, 1 }
 0x140   : > { %3578 = vmatmul.msk.f32.gmra.mxu2 %vm491_vm2, %v4808_v3  ;;  %1139 = vmatmul.f32.gmra.mxu3 %v4640_v57  ;;  %v4862_v37 = vpop.f32.mrf.mxu1  ;;  %v2104_v3 = vld [vmem:[#allocation7 + $0x70] sm:$0xff] }
 0x141   : > { %2235 = vmatpush.msra.mxu1 %v2104_v3  ;;  %v4902_v3 = vrot.slane %v4386_v62, 1 }
 0x143   : > { %v849_v45 = vpop.f32.mrf.mxu2  ;;  %v962_v46 = vpop.f32.mrf.mxu3  ;;  %3626 = vmatmul.msk.f32.gmra.mxu1 %vm491_vm2, %v4840_v58 }
 0x144   : > { %v4866_v8 = vadd.f32 %v962_v46, %v849_v45  ;;  %v4868_v44 = vpop.f32.mrf.mxu0  ;;  %v4883_v46 = vsel %vm491_vm2, %v515_v0, %v4872_v25  ;;  %v719_v45 = vld [vmem:[#allocation5 + $0x3b0] sm:$0xff] }
 0x145   : > { %7108 = vst [vmem:[#allocation65_spill] sm:$0xff] %v4883_v46  ;;  %1545 = vmatpush.msra.mxu3 %v719_v45 }
 0x146   : > { %7106 = vst [vmem:[#allocation63_spill] sm:$0xff] %v4866_v8 }
 0x147   : > { %1255 = vmatmul.f32.gmra.mxu0 %v4337_v29 }
 0x148   : > { %1029 = vmatmul.f32.gmra.mxu2 %v4851_v1  ;;  %3603 = vmatmul.msk.f32.gmra.mxu3 %vm4343_vm1, %v4348_v36  ;;  %v4879_v34 = vpop.f32.mrf.mxu1 }
 0x149   : > { %7107 = vst [vmem:[#allocation64_spill] sm:$0xff] %v4879_v34 }
 0x14b   : > { %v852_v8 = vpop.f32.mrf.mxu2  ;;  %v965_v57 = vpop.f32.mrf.mxu3  ;;  %1368 = vmatmul.f32.gmra.mxu1 %v4883_v46 }
 0x14c   : > { %v4886_v29 = vadd.f32 %v965_v57, %v852_v8  ;;  %v4888_v1 = vpop.f32.mrf.mxu0 }
 0x14e   : > { %7109 = vst [vmem:[#allocation66_spill] sm:$0xff] %v4886_v29 }
 0x14f   : > { %1258 = vmatmul.f32.gmra.mxu0 %v4351_v39  ;;  %v518_v39 = vrot.slane %v4373_v55, 1 }
 0x150   : > { %3579 = vmatmul.msk.f32.gmra.mxu2 %vm491_vm2, %v4840_v58  ;;  %1145 = vmatmul.f32.gmra.mxu3 %v4364_v49  ;;  %v4894_v0 = vpop.f32.mrf.mxu1 }
 0x151   : > { %v4911_v47 = vsel %vm491_vm2, %v518_v39, %v4902_v3 }
 0x153   : > { %v855_v36 = vpop.f32.mrf.mxu2  ;;  %v968_v34 = vpop.f32.mrf.mxu3  ;;  %3627 = vmatmul.msk.f32.gmra.mxu1 %vm491_vm2, %v4872_v25 }
 0x154   : > { %v4898_v57 = vadd.f32 %v968_v34, %v855_v36  ;;  %v1214_v8 = vpop.f32.mrf.mxu0  ;;  %v702_v36 = vld [vmem:[#allocation5 + $0x328] sm:$0xff]  ;;  %v876_v34 = vadd.f32 %v4662_v33, %v4650_v40  ;;  %v879_v33 = vadd.f32 %v4673_v59, %v4667_v53 }
 0x155   : > { %1433 = vmatpush.msra.mxu2 %v702_v36 }
 0x156   : > { %7110 = vst [vmem:[#allocation67_spill] sm:$0xff] %v4898_v57  ;;  %v718_v57 = vld [vmem:[#allocation5 + $0x3a8] sm:$0xff] }
 0x157   : > { %1261 = vmatmul.f32.gmra.mxu0 %v4373_v55  ;;  %1546 = vmatpush.msra.mxu3 %v718_v57  ;;  %v734_v57 = vld [vmem:[#allocation5 + $0x428] sm:$0xff] }
 0x158   : > { %1035 = vmatmul.f32.gmra.mxu2 %v4883_v46  ;;  %3605 = vmatmul.msk.f32.gmra.mxu3 %vm4343_vm1, %v4380_v60  ;;  %v1327_v45 = vpop.f32.mrf.mxu1  ;;  %v2103_v60 = vld [vmem:[#allocation7 + $0x68] sm:$0xff] }
 0x159   : > { %2236 = vmatpush.msra.mxu1 %v2103_v60  ;;  %1659 = vmatpush.msra.mxu0 %v734_v57 }
 0x15b   : > { %v988_v29 = vpop.f32.mrf.mxu2  ;;  %v1101_v49 = vpop.f32.mrf.mxu3  ;;  %1374 = vmatmul.f32.gmra.mxu1 %v4911_v47 }
 0x15c   : > { %v989_v55 = vadd.f32 %v988_v29, %v876_v34  ;;  %v1217_v46 = vpop.f32.mrf.mxu0 }
 0x15e   : > { %v1102_v58 = vadd.f32 %v1101_v49, %v989_v55  ;;  %v4928_v55 = vrot.slane %v4426_v14, 1 }
 0x15f   : > { %1264 = vmatmul.f32.gmra.mxu0 %v4386_v62  ;;  %v521_v62 = vrot.slane %v4413_v10, 1 }
 0x160   : > { %3580 = vmatmul.msk.f32.gmra.mxu2 %vm491_vm2, %v4872_v25  ;;  %1151 = vmatmul.f32.gmra.mxu3 %v4404_v5  ;;  %v1215_v39 = vadd.f32 %v1214_v8, %v1102_v58  ;;  %v1330_v40 = vpop.f32.mrf.mxu1 }
 0x161   : > { %v4937_v8 = vsel %vm491_vm2, %v521_v62, %v4928_v55 }
 0x162   : > { %v4922_v36 = vadd.f32 %v1327_v45, %v1215_v39  ;;  %v701_v45 = vld [vmem:[#allocation5 + $0x320] sm:$0xff]  ;;  %v882_v39 = vadd.f32 %v4688_v4, %v4678_v32 }
 0x163   : > { %v991_v29 = vpop.f32.mrf.mxu2  ;;  %v1104_v34 = vpop.f32.mrf.mxu3  ;;  %3628 = vmatmul.msk.f32.gmra.mxu1 %vm491_vm2, %v4902_v3  ;;  %1434 = vmatpush.msra.mxu2 %v701_v45 }
 0x164   : > { %v992_v49 = vadd.f32 %v991_v29, %v879_v33  ;;  %v1220_v60 = vpop.f32.mrf.mxu0 }
 0x166   : > { %v1105_v58 = vadd.f32 %v1104_v34, %v992_v49 }
 0x167   : > { %1267 = vmatmul.f32.gmra.mxu0 %v4413_v10  ;;  %v717_v10 = vld [vmem:[#allocation5 + $0x3a0] sm:$0xff] }
 0x168   : > { %1041 = vmatmul.f32.gmra.mxu2 %v4911_v47  ;;  %3607 = vmatmul.msk.f32.gmra.mxu3 %vm4343_vm1, %v4420_v12  ;;  %v1218_v53 = vadd.f32 %v1217_v46, %v1105_v58  ;;  %v1333_v59 = vpop.f32.mrf.mxu1  ;;  %v2102_v58 = vld [vmem:[#allocation7 + $0x60] sm:$0xff] }
 0x169   : > { %1547 = vmatpush.msra.mxu3 %v717_v10  ;;  %2237 = vmatpush.msra.mxu1 %v2102_v58 }
 0x16a   : > { %v4941_v33 = vadd.f32 %v1330_v40, %v1218_v53  ;;  %v885_v40 = vadd.f32 %v4702_v38, %v4697_v41  ;;  %v733_v53 = vld [vmem:[#allocation5 + $0x420] sm:$0xff] }
 0x16b   : > { %v994_v57 = vpop.f32.mrf.mxu2  ;;  %v1107_v29 = vpop.f32.mrf.mxu3  ;;  %1380 = vmatmul.f32.gmra.mxu1 %v4937_v8  ;;  %1660 = vmatpush.msra.mxu0 %v733_v53 }
 0x16c   : > { %v995_v34 = vadd.f32 %v994_v57, %v882_v39  ;;  %v1223_v46 = vpop.f32.mrf.mxu0  ;;  %v524_v57 = vrot.slane %v4453_v26, 1 }
 0x16e   : > { %v1108_v49 = vadd.f32 %v1107_v29, %v995_v34  ;;  %v4956_v29 = vrot.slane %v4466_v31, 1  ;;  %v700_v34 = vld [vmem:[#allocation5 + $0x318] sm:$0xff] }
 0x16f   : > { %1270 = vmatmul.f32.gmra.mxu0 %v4426_v14  ;;  %1435 = vmatpush.msra.mxu2 %v700_v34 }
 0x170   : > { %3581 = vmatmul.msk.f32.gmra.mxu2 %vm491_vm2, %v4902_v3  ;;  %1157 = vmatmul.f32.gmra.mxu3 %v4444_v21  ;;  %v1221_v32 = vadd.f32 %v1220_v60, %v1108_v49  ;;  %v1336_v4 = vpop.f32.mrf.mxu1  ;;  %v888_v49 = vadd.f32 %v4719_v7, %v4708_v56  ;;  %v891_v7 = vadd.f32 %v4734_v17, %v4728_v20 }
 0x172   : > { %v4950_v62 = vadd.f32 %v1333_v59, %v1221_v32  ;;  %v4965_v59 = vsel %vm491_vm2, %v524_v57, %v4956_v29  ;;  %v732_v57 = vld [vmem:[#allocation5 + $0x418] sm:$0xff] }
 0x173   : > { %v997_v45 = vpop.f32.mrf.mxu2  ;;  %v1110_v39 = vpop.f32.mrf.mxu3  ;;  %3629 = vmatmul.msk.f32.gmra.mxu1 %vm491_vm2, %v4928_v55  ;;  %1661 = vmatpush.msra.mxu0 %v732_v57  ;;  %v2100_v57 = vld [vmem:[#allocation7 + $0x50] sm:$0xff] }
 0x174   : > { %v998_v14 = vadd.f32 %v997_v45, %v885_v40  ;;  %v1226_v10 = vpop.f32.mrf.mxu0 }
 0x176   : > { %v1111_v60 = vadd.f32 %v1110_v39, %v998_v14  ;;  %v2101_v39 = vld [vmem:[#allocation7 + $0x58] sm:$0xff] }
 0x177   : > { %1273 = vmatmul.f32.gmra.mxu0 %v4453_v26  ;;  %v716_v26 = vld [vmem:[#allocation5 + $0x398] sm:$0xff]  ;;  %2238 = vmatpush.msra.mxu1 %v2101_v39 }
 0x178   : > { %1047 = vmatmul.f32.gmra.mxu2 %v4937_v8  ;;  %3609 = vmatmul.msk.f32.gmra.mxu3 %vm4343_vm1, %v4460_v28  ;;  %v1224_v41 = vadd.f32 %v1223_v46, %v1111_v60  ;;  %v1339_v38 = vpop.f32.mrf.mxu1 }
 0x179   : > { %1548 = vmatpush.msra.mxu3 %v716_v26  ;;  %v4984_v26 = vrot.slane %v4506_v54, 1  ;;  %2239 = vmatpush.msra.mxu1 %v2100_v57  ;;  %v2099_v57 = vld [vmem:[#allocation7 + $0x48] sm:$0xff] }
 0x17a   : > { %v4969_v58 = vadd.f32 %v1336_v4, %v1224_v41 }
 0x17b   : > { %v1000_v32 = vpop.f32.mrf.mxu2  ;;  %v1113_v40 = vpop.f32.mrf.mxu3  ;;  %1386 = vmatmul.f32.gmra.mxu1 %v4965_v59 }
 0x17c   : > { %v1001_v53 = vadd.f32 %v1000_v32, %v888_v49  ;;  %v1229_v46 = vpop.f32.mrf.mxu0  ;;  %v527_v49 = vrot.slane %v4493_v48, 1  ;;  %v894_v32 = vadd.f32 %v4751_v27, %v4740_v6  ;;  %v897_v27 = vadd.f32 %v4766_v30, %v4760_v9  ;;  %2240 = vmatpush.msra.mxu1 %v2099_v57 }
 0x17e   : > { %v1114_v45 = vadd.f32 %v1113_v40, %v1001_v53  ;;  %v4993_v17 = vsel %vm491_vm2, %v527_v49, %v4984_v26  ;;  %v715_v53 = vld [vmem:[#allocation5 + $0x390] sm:$0xff] }
 0x17f   : > { %1276 = vmatmul.f32.gmra.mxu0 %v4466_v31  ;;  %1549 = vmatpush.msra.mxu3 %v715_v53  ;;  %v900_v53 = vadd.f32 %v4783_v50, %v4772_v61  ;;  %v903_v50 = vadd.f32 %v4798_v52, %v4792_v63  ;;  %v7114_v63 = vld [vmem:[#allocation27_spill] sm:$0xff] }
 0x180   : > { %3582 = vmatmul.msk.f32.gmra.mxu2 %vm491_vm2, %v4928_v55  ;;  %1163 = vmatmul.f32.gmra.mxu3 %v4484_v43  ;;  %v1227_v56 = vadd.f32 %v1226_v10, %v1114_v45  ;;  %v1342_v14 = vpop.f32.mrf.mxu1 }
 0x182   : > { %v4978_v4 = vadd.f32 %v1339_v38, %v1227_v56  ;;  %v699_v38 = vld [vmem:[#allocation5 + $0x310] sm:$0xff] }
 0x183   : > { %v1003_v60 = vpop.f32.mrf.mxu2  ;;  %v1116_v41 = vpop.f32.mrf.mxu3  ;;  %3630 = vmatmul.msk.f32.gmra.mxu1 %vm491_vm2, %v4956_v29  ;;  %1436 = vmatpush.msra.mxu2 %v699_v38 }
 0x184   : > { %v1004_v31 = vadd.f32 %v1003_v60, %v891_v7  ;;  %v1232_v34 = vpop.f32.mrf.mxu0  ;;  %v731_v60 = vld [vmem:[#allocation5 + $0x410] sm:$0xff] }
 0x185   : > { %1662 = vmatpush.msra.mxu0 %v731_v60 }
 0x186   : > { %v1117_v10 = vadd.f32 %v1116_v41, %v1004_v31 }
 0x187   : > { %1279 = vmatmul.f32.gmra.mxu0 %v4493_v48 }
 0x188   : > { %1053 = vmatmul.f32.gmra.mxu2 %v4965_v59  ;;  %3611 = vmatmul.msk.f32.gmra.mxu3 %vm4343_vm1, %v4500_v51  ;;  %v1230_v20 = vadd.f32 %v1229_v46, %v1117_v10  ;;  %v1345_v46 = vpop.f32.mrf.mxu1  ;;  %v530_v10 = vrot.slane %v4533_v15, 1 }
 0x18a   : > { %v4997_v40 = vadd.f32 %v1342_v14, %v1230_v20  ;;  %v5012_v20 = vrot.slane %v4546_v24, 1 }
 0x18b   : > { %v1006_v48 = vpop.f32.mrf.mxu2  ;;  %v1119_v45 = vpop.f32.mrf.mxu3  ;;  %1392 = vmatmul.f32.gmra.mxu1 %v4993_v17 }
 0x18c   : > { %v1007_v39 = vadd.f32 %v1006_v48, %v894_v32  ;;  %v1235_v56 = vpop.f32.mrf.mxu0  ;;  %v5021_v38 = vsel %vm491_vm2, %v530_v10, %v5012_v20  ;;  %v698_v32 = vld [vmem:[#allocation5 + $0x308] sm:$0xff] }
 0x18d   : > { %1437 = vmatpush.msra.mxu2 %v698_v32  ;;  %v697_v32 = vld [vmem:[#allocation5 + $0x300] sm:$0xff] }
 0x18e   : > { %v1120_v7 = vadd.f32 %v1119_v45, %v1007_v39 }
 0x18f   : > { %1282 = vmatmul.f32.gmra.mxu0 %v4506_v54  ;;  %1438 = vmatpush.msra.mxu2 %v697_v32 }
 0x190   : > { %3583 = vmatmul.msk.f32.gmra.mxu2 %vm491_vm2, %v4956_v29  ;;  %1169 = vmatmul.f32.gmra.mxu3 %v4524_v2  ;;  %v1233_v6 = vadd.f32 %v1232_v34, %v1120_v7  ;;  %v1348_v9 = vpop.f32.mrf.mxu1 }
 0x192   : > { %v5006_v14 = vadd.f32 %v1345_v46, %v1233_v6  ;;  %v7111_v6 = vld [vmem:[#allocation24_spill] sm:$0xff] }
 0x193   : > { %v1009_v41 = vpop.f32.mrf.mxu2  ;;  %v1122_v31 = vpop.f32.mrf.mxu3  ;;  %3631 = vmatmul.msk.f32.gmra.mxu1 %vm491_vm2, %v4984_v26 }
 0x194   : > { %v1010_v54 = vadd.f32 %v1009_v41, %v897_v27  ;;  %v1238_v49 = vpop.f32.mrf.mxu0  ;;  %v730_v27 = vld [vmem:[#allocation5 + $0x408] sm:$0xff] }
 0x195   : > { %1663 = vmatpush.msra.mxu0 %v730_v27 }
 0x196   : > { %v1123_v34 = vadd.f32 %v1122_v31, %v1010_v54  ;;  %v7112_v54 = vld [vmem:[#allocation25_spill] sm:$0xff] }
 0x197   : > { %1285 = vmatmul.f32.gmra.mxu0 %v4533_v15  ;;  %v714_v15 = vld [vmem:[#allocation5 + $0x388] sm:$0xff]  ;;  %v533_v10 = vrot.slane %v7112_v54, 1 }
 0x198   : > { %1059 = vmatmul.f32.gmra.mxu2 %v4993_v17  ;;  %3613 = vmatmul.msk.f32.gmra.mxu3 %vm4343_vm1, %v4540_v19  ;;  %v1236_v30 = vadd.f32 %v1235_v56, %v1123_v34  ;;  %v7113_v34 = vld [vmem:[#allocation28_spill] sm:$0xff] }
 0x199   : > { %1550 = vmatpush.msra.mxu3 %v714_v15  ;;  %v713_v15 = vld [vmem:[#allocation5 + $0x380] sm:$0xff] }
 0x19a   : > { %v5025_v48 = vadd.f32 %v1348_v9, %v1236_v30  ;;  %v5040_v9 = vrot.slane %v7113_v34, 1 }
 0x19b   : > { %v1012_v45 = vpop.f32.mrf.mxu2  ;;  %v1125_v39 = vpop.f32.mrf.mxu3  ;;  %1398 = vmatmul.f32.gmra.mxu1 %v5021_v38  ;;  %1551 = vmatpush.msra.mxu3 %v713_v15  ;;  %v912_v15 = vadd.f32 %v4847_v16, %v4836_v22  ;;  %v5091_v22 = vld [vmem:[%s4326_s13 + $0xf0] sm:$0xff]  ;;  %v915_v16 = vadd.f32 %v4862_v37, %v4856_v42 }
 0x19c   : > { %v1013_v46 = vadd.f32 %v1012_v45, %v900_v53  ;;  %v1241_v7 = vpop.f32.mrf.mxu0  ;;  %v906_v53 = vadd.f32 %v4815_v18, %v4804_v13  ;;  %v909_v13 = vadd.f32 %v4830_v23, %v4824_v11  ;;  %v729_v18 = vld [vmem:[#allocation5 + $0x400] sm:$0xff]  ;;  %v7118_v11 = vld [vmem:[#allocation33_spill] sm:$0xff]  ;;  %7121 = vst [vmem:[#allocation25_spill] sm:$0xff] %v5091_v22 }
 0x19d   : > { %1664 = vmatpush.msra.mxu0 %v729_v18 }
 0x19e   : > { %v1126_v56 = vadd.f32 %v1125_v39, %v1013_v46 }
 0x19f   : > { %1288 = vmatmul.f32.gmra.mxu0 %v4546_v24 }
 0x1a0   : > { %3584 = vmatmul.msk.f32.gmra.mxu2 %vm491_vm2, %v4984_v26  ;;  %1175 = vmatmul.f32.gmra.mxu3 %v7111_v6  ;;  %v5032_v61 = vadd.f32 %v1238_v49, %v1126_v56  ;;  %v5051_v49 = vsel %vm491_vm2, %v533_v10, %v5040_v9  ;;  %v7116_v10 = vld [vmem:[#allocation31_spill] sm:$0xff] }
 0x1a3   : > { %v1015_v60 = vpop.f32.mrf.mxu2  ;;  %v1128_v41 = vpop.f32.mrf.mxu3  ;;  %3632 = vmatmul.msk.f32.gmra.mxu1 %vm491_vm2, %v5012_v20 }
 0x1a4   : > { %v1016_v31 = vadd.f32 %v1015_v60, %v903_v50  ;;  %v1244_v24 = vpop.f32.mrf.mxu0  ;;  %v7115_v50 = vld [vmem:[#allocation30_spill] sm:$0xff] }
 0x1a6   : > { %v1129_v30 = vadd.f32 %v1128_v41, %v1016_v31 }
 0x1a7   : > { %1291 = vmatmul.f32.gmra.mxu0 %v7112_v54 }
 0x1a8   : > { %1065 = vmatmul.f32.gmra.mxu2 %v5021_v38  ;;  %3615 = vmatmul.msk.f32.gmra.mxu3 %vm4343_vm1, %v7114_v63  ;;  %v5047_v52 = vadd.f32 %v1241_v7, %v1129_v30  ;;  %v2098_v7 = vld [vmem:[#allocation7 + $0x40] sm:$0xff]  ;;  %v7117_v30 = vld [vmem:[#allocation34_spill] sm:$0xff] }
 0x1a9   : > { %2241 = vmatpush.msra.mxu1 %v2098_v7  ;;  %v5068_v32 = vrot.slane %v7117_v30, 1 }
 0x1ab   : > { %v1018_v45 = vpop.f32.mrf.mxu2  ;;  %v1131_v39 = vpop.f32.mrf.mxu3  ;;  %1404 = vmatmul.f32.gmra.mxu1 %v5051_v49 }
 0x1ac   : > { %v1019_v46 = vadd.f32 %v1018_v45, %v906_v53  ;;  %v1247_v56 = vpop.f32.mrf.mxu0 }
 0x1ae   : > { %v1132_v57 = vadd.f32 %v1131_v39, %v1019_v46 }
 0x1af   : > { %1294 = vmatmul.f32.gmra.mxu0 %v7113_v34  ;;  %v536_v34 = vrot.slane %v7116_v10, 1 }
 0x1b0   : > { %3585 = vmatmul.msk.f32.gmra.mxu2 %vm491_vm2, %v5012_v20  ;;  %1181 = vmatmul.f32.gmra.mxu3 %v7115_v50  ;;  %v5060_v27 = vadd.f32 %v1244_v24, %v1132_v57 }
 0x1b1   : > { %v5079_v24 = vsel %vm491_vm2, %v536_v34, %v5068_v32 }
 0x1b3   : > { %v1021_v60 = vpop.f32.mrf.mxu2  ;;  %v1134_v41 = vpop.f32.mrf.mxu3  ;;  %3633 = vmatmul.msk.f32.gmra.mxu1 %vm491_vm2, %v5040_v9 }
 0x1b4   : > { %v1022_v31 = vadd.f32 %v1021_v60, %v909_v13  ;;  %v1250_v54 = vpop.f32.mrf.mxu0  ;;  %v2097_v13 = vld [vmem:[#allocation7 + $0x38] sm:$0xff] }
 0x1b5   : > { %2242 = vmatpush.msra.mxu1 %v2097_v13 }
 0x1b6   : > { %v1135_v53 = vadd.f32 %v1134_v41, %v1022_v31  ;;  %v363_v31 = vld [vmem:[%s4326_s13 + $0xf8] sm:$0xff] }
 0x1b7   : > { %1297 = vmatmul.f32.gmra.mxu0 %v7116_v10 }
 0x1b8   : > { %1071 = vmatmul.f32.gmra.mxu2 %v5051_v49  ;;  %3617 = vmatmul.msk.f32.gmra.mxu3 %vm4343_vm1, %v7118_v11  ;;  %v5075_v23 = vadd.f32 %v1247_v56, %v1135_v53  ;;  %v7119_v56 = vld [vmem:[#allocation36_spill] sm:$0xff]  ;;  %v595_v53 = vrot.slane %v5091_v22, 1 }
 0x1bb   : > { %v1024_v45 = vpop.f32.mrf.mxu2  ;;  %v1137_v39 = vpop.f32.mrf.mxu3  ;;  %1410 = vmatmul.f32.gmra.mxu1 %v5079_v24 }
 0x1bc   : > { %v1025_v46 = vadd.f32 %v1024_v45, %v912_v15  ;;  %v1253_v57 = vpop.f32.mrf.mxu0  ;;  %v590_v45 = vrot.slane %v363_v31, 7 }
 0x1be   : > { %v1138_v7 = vadd.f32 %v1137_v39, %v1025_v46  ;;  %v7124_v39 = vld [vmem:[#allocation64_spill] sm:$0xff] }
 0x1bf   : > { %1300 = vmatmul.f32.gmra.mxu0 %v7117_v30  ;;  %v5099_v30 = vrot.slane %v5091_v22, 7  ;;  %v918_v46 = vadd.f32 %v7124_v39, %v4868_v44 }
 0x1c0   : > { %3586 = vmatmul.msk.f32.gmra.mxu2 %vm491_vm2, %v5040_v9  ;;  %1187 = vmatmul.f32.gmra.mxu3 %v7119_v56  ;;  %v5088_v18 = vadd.f32 %v1250_v54, %v1138_v7  ;;  %v5102_v54 = vrot.slane %v363_v31, 1 }
 0x1c2   : > { %7120 = vst [vmem:[#allocation24_spill] sm:$0xff] %v5088_v18  ;;  %v5113_v37 = vsel %vm491_vm2, %v595_v53, %v5102_v54  ;;  %v921_v53 = vadd.f32 %v4894_v0, %v4888_v1  ;;  %v7152_v18 = vld [vmem:[#allocation22_spill] sm:$0xff] }
 0x1c3   : > { %v1027_v60 = vpop.f32.mrf.mxu2  ;;  %v1140_v41 = vpop.f32.mrf.mxu3  ;;  %3634 = vmatmul.msk.f32.gmra.mxu1 %vm491_vm2, %v5068_v32  ;;  %7122 = vst [vmem:[#allocation28_spill] sm:$0xff] %v5102_v54 }
 0x1c4   : > { %v1028_v10 = vadd.f32 %v1027_v60, %v915_v16  ;;  %v1256_v34 = vpop.f32.mrf.mxu0 }
 0x1c6   : > { %v1141_v15 = vadd.f32 %v1140_v41, %v1028_v10  ;;  %v5120_v41 = vsel %vm395_vm0, %v5099_v30, %v590_v45  ;;  %v2096_v10 = vld [vmem:[#allocation7 + $0x30] sm:$0xff] }
 0x1c7   : > { %1303 = vmatmul.f32.gmra.mxu0 %v5091_v22  ;;  %7125 = vst [vmem:[#allocation30_spill] sm:$0xff] %v5120_v41  ;;  %2243 = vmatpush.msra.mxu1 %v2096_v10 }
 0x1c8   : > { %1077 = vmatmul.f32.gmra.mxu2 %v5079_v24  ;;  %3619 = vmatmul.msk.f32.gmra.mxu3 %vm4343_vm1, %v5099_v30  ;;  %v5109_v42 = vadd.f32 %v1253_v57, %v1141_v15 }
 0x1ca   : > { %7123 = vst [vmem:[#allocation27_spill] sm:$0xff] %v5109_v42 }
 0x1cb   : > { %v1030_v7 = vpop.f32.mrf.mxu2  ;;  %v1143_v13 = vpop.f32.mrf.mxu3  ;;  %1416 = vmatmul.f32.gmra.mxu1 %v5113_v37 }
 0x1cc   : > { %v1031_v16 = vadd.f32 %v1030_v7, %v918_v46  ;;  %v1259_v60 = vpop.f32.mrf.mxu0  ;;  %v7127_v7 = vld [vmem:[#allocation41_spill] sm:$0xff] }
 0x1ce   : > { %v1144_v57 = vadd.f32 %v1143_v13, %v1031_v16  ;;  %v7128_v13 = vld [vmem:[#allocation16_spill] sm:$0xff] }
 0x1cf   : > { %1306 = vmatmul.f32.gmra.mxu0 %v363_v31 }
 0x1d0   : > { %3587 = vmatmul.msk.f32.gmra.mxu2 %vm491_vm2, %v5068_v32  ;;  %1193 = vmatmul.f32.gmra.mxu3 %v5120_v41  ;;  %v5125_v44 = vadd.f32 %v1256_v34, %v1144_v57  ;;  %v3943_v34 = vld [vmem:[%s4326_s13 + $0x10] sm:$0xff] }
 0x1d1   : > { %v7130_v57 = vld [vmem:[#allocation38_spill] sm:$0xff] }
 0x1d2   : > { %7126 = vst [vmem:[#allocation31_spill] sm:$0xff] %v5125_v44 }
 0x1d3   : > { %v1033_v15 = vpop.f32.mrf.mxu2  ;;  %v1146_v39 = vpop.f32.mrf.mxu3  ;;  %3635 = vmatmul.msk.f32.gmra.mxu1 %vm491_vm2, %v5102_v54  ;;  %v7143_v54 = vld [vmem:[#allocation49_spill] sm:$0xff] }
 0x1d4   : > { %v1034_v45 = vadd.f32 %v1033_v15, %v921_v53  ;;  %v1262_v46 = vpop.f32.mrf.mxu0  ;;  %v2095_v53 = vld [vmem:[#allocation7 + $0x28] sm:$0xff]  ;;  %v7131_v15 = vld [vmem:[#allocation40_spill] sm:$0xff] }
 0x1d5   : > { %2244 = vmatpush.msra.mxu1 %v2095_v53  ;;  %v3945_v53 = vld [vmem:[%s4326_s13 + $0x20] sm:$0xff] }
 0x1d6   : > { %v1147_v31 = vadd.f32 %v1146_v39, %v1034_v45  ;;  %v7132_v39 = vld [vmem:[#allocation17_spill] sm:$0xff]  ;;  %v3944_v45 = vld [vmem:[%s4326_s13 + $0x18] sm:$0xff] }
 0x1d7   : > { %1665 = vmatmul.f32.vlgmr.msra.gmra.mxu0 %v7127_v7 }
 0x1d8   : > { %3637 = vmatmul.msk.f32.vlgmr.msra.gmra.mxu2 %vm4343_vm1, %v7128_v13  ;;  %1552 = vmatmul.f32.vlgmr.msra.gmra.mxu3 %v3943_v34  ;;  %v5136_v16 = vadd.f32 %v1259_v60, %v1147_v31  ;;  %v5145_v13 = vpop.f32.mrf.mxu1  ;;  %v7134_v34 = vld [vmem:[#allocation39_spill] sm:$0xff] }
 0x1da   : > { %7129 = vst [vmem:[#allocation34_spill] sm:$0xff] %v5136_v16  ;;  %v7136_v16 = vld [vmem:[#allocation18_spill] sm:$0xff] }
 0x1db   : > { %v1036_v1 = vpop.f32.mrf.mxu2  ;;  %v1149_v0 = vpop.f32.mrf.mxu3 }
 0x1dc   : > { %v1037_v10 = vadd.f32 %v1036_v1, %v7130_v57  ;;  %v1265_v44 = vpop.f32.mrf.mxu0 }
 0x1de   : > { %v1150_v42 = vadd.f32 %v1149_v0, %v1037_v10  ;;  %v7135_v10 = vld [vmem:[#allocation45_spill] sm:$0xff] }
 0x1df   : > { %3668 = vmatmul.msk.f32.gmra.mxu0 %vm491_vm2, %v7131_v15 }
 0x1e0   : > { %1442 = vmatmul.f32.gmra.mxu2 %v7132_v39  ;;  %1555 = vmatmul.f32.gmra.mxu3 %v3944_v45  ;;  %v5143_v7 = vadd.f32 %v1262_v46, %v1150_v42  ;;  %v7138_v39 = vld [vmem:[#allocation42_spill] sm:$0xff]  ;;  %v5156_v41 = vpop.f32.mrf.mxu1 }
 0x1e2   : > { %7133 = vst [vmem:[#allocation33_spill] sm:$0xff] %v5143_v7 }
 0x1e3   : > { %v1039_v60 = vpop.f32.mrf.mxu2  ;;  %v1152_v31 = vpop.f32.mrf.mxu3 }
 0x1e4   : > { %v1040_v1 = vadd.f32 %v1039_v60, %v7134_v34  ;;  %v1268_v57 = vpop.f32.mrf.mxu0  ;;  %v7139_v34 = vld [vmem:[#allocation44_spill] sm:$0xff] }
 0x1e6   : > { %v1153_v0 = vadd.f32 %v1152_v31, %v1040_v1  ;;  %v2094_v31 = vld [vmem:[#allocation7 + $0x20] sm:$0xff]  ;;  %v7140_v1 = vld [vmem:[#allocation19_spill] sm:$0xff] }
 0x1e7   : > { %1671 = vmatmul.f32.gmra.mxu0 %v7135_v10  ;;  %2245 = vmatpush.msra.mxu1 %v2094_v31  ;;  %v3947_v31 = vld [vmem:[%s4326_s13 + $0x30] sm:$0xff] }
 0x1e8   : > { %3639 = vmatmul.msk.f32.gmra.mxu2 %vm4343_vm1, %v7136_v16  ;;  %1558 = vmatmul.f32.gmra.mxu3 %v3945_v53  ;;  %v5153_v15 = vadd.f32 %v1265_v44, %v1153_v0  ;;  %v3946_v16 = vld [vmem:[%s4326_s13 + $0x28] sm:$0xff]  ;;  %v7142_v53 = vld [vmem:[#allocation43_spill] sm:$0xff] }
 0x1ea   : > { %7137 = vst [vmem:[#allocation36_spill] sm:$0xff] %v5153_v15 }
 0x1eb   : > { %v1042_v42 = vpop.f32.mrf.mxu2  ;;  %v1155_v46 = vpop.f32.mrf.mxu3 }
 0x1ec   : > { %v1043_v45 = vadd.f32 %v1042_v42, %v7138_v39  ;;  %v1271_v7 = vpop.f32.mrf.mxu0 }
 0x1ee   : > { %v1156_v60 = vadd.f32 %v1155_v46, %v1043_v45  ;;  %v5166_v46 = vpop.f32.mrf.mxu1  ;;  %v7144_v45 = vld [vmem:[#allocation20_spill] sm:$0xff] }
 0x1ef   : > { %3669 = vmatmul.msk.f32.gmra.mxu0 %vm491_vm2, %v7139_v34 }
 0x1f0   : > { %1448 = vmatmul.f32.gmra.mxu2 %v7140_v1  ;;  %1561 = vmatmul.f32.gmra.mxu3 %v3946_v16  ;;  %v5162_v44 = vadd.f32 %v1268_v57, %v1156_v60  ;;  %v7146_v1 = vld [vmem:[#allocation46_spill] sm:$0xff] }
 0x1f2   : > { %7141 = vst [vmem:[#allocation64_spill] sm:$0xff] %v5162_v44  ;;  %v3948_v44 = vld [vmem:[%s4326_s13 + $0x38] sm:$0xff] }
 0x1f3   : > { %v1045_v0 = vpop.f32.mrf.mxu2  ;;  %v1158_v10 = vpop.f32.mrf.mxu3 }
 0x1f4   : > { %v1046_v42 = vadd.f32 %v1045_v0, %v7142_v53  ;;  %v1274_v39 = vpop.f32.mrf.mxu0 }
 0x1f6   : > { %v1159_v15 = vadd.f32 %v1158_v10, %v1046_v42  ;;  %v2093_v10 = vld [vmem:[#allocation7 + $0x18] sm:$0xff]  ;;  %v7147_v42 = vld [vmem:[#allocation48_spill] sm:$0xff] }
 0x1f7   : > { %1677 = vmatmul.f32.gmra.mxu0 %v7143_v54  ;;  %2246 = vmatpush.msra.mxu1 %v2093_v10  ;;  %v7148_v54 = vld [vmem:[#allocation21_spill] sm:$0xff]  ;;  %v3949_v10 = vld [vmem:[%s4326_s13 + $0x40] sm:$0xff] }
 0x1f8   : > { %3641 = vmatmul.msk.f32.gmra.mxu2 %vm4343_vm1, %v7144_v45  ;;  %1564 = vmatmul.f32.gmra.mxu3 %v3947_v31  ;;  %v5172_v34 = vadd.f32 %v1271_v7, %v1159_v15  ;;  %v5181_v7 = vpop.f32.mrf.mxu1 }
 0x1fa   : > { %7145 = vst [vmem:[#allocation41_spill] sm:$0xff] %v5172_v34  ;;  %v7150_v34 = vld [vmem:[#allocation47_spill] sm:$0xff] }
 0x1fb   : > { %v1048_v57 = vpop.f32.mrf.mxu2  ;;  %v1161_v60 = vpop.f32.mrf.mxu3 }
 0x1fc   : > { %v1049_v16 = vadd.f32 %v1048_v57, %v7146_v1  ;;  %v1277_v0 = vpop.f32.mrf.mxu0 }
 0x1fe   : > { %v1162_v53 = vadd.f32 %v1161_v60, %v1049_v16  ;;  %v7151_v16 = vld [vmem:[#allocation53_spill] sm:$0xff] }
 0x1ff   : > { %3670 = vmatmul.msk.f32.gmra.mxu0 %vm491_vm2, %v7147_v42 }
 0x200   : > { %1454 = vmatmul.f32.gmra.mxu2 %v7148_v54  ;;  %1567 = vmatmul.f32.gmra.mxu3 %v3948_v44  ;;  %v5179_v45 = vadd.f32 %v1274_v39, %v1162_v53  ;;  %v5191_v42 = vpop.f32.mrf.mxu1  ;;  %v7155_v54 = vld [vmem:[#allocation50_spill] sm:$0xff] }
 0x201   : > { %7154 = vst [vmem:[#allocation40_spill] sm:$0xff] %v5191_v42 }
 0x202   : > { %7149 = vst [vmem:[#allocation16_spill] sm:$0xff] %v5179_v45 }
 0x203   : > { %v1051_v15 = vpop.f32.mrf.mxu2  ;;  %v1164_v31 = vpop.f32.mrf.mxu3 }
 0x204   : > { %v1052_v57 = vadd.f32 %v1051_v15, %v7150_v34  ;;  %v1280_v1 = vpop.f32.mrf.mxu0 }
 0x206   : > { %v1165_v60 = vadd.f32 %v1164_v31, %v1052_v57  ;;  %v2092_v31 = vld [vmem:[#allocation7 + $0x10] sm:$0xff]  ;;  %v7156_v57 = vld [vmem:[#allocation52_spill] sm:$0xff] }
 0x207   : > { %1683 = vmatmul.f32.gmra.mxu0 %v7151_v16  ;;  %2247 = vmatpush.msra.mxu1 %v2092_v31  ;;  %v7157_v16 = vld [vmem:[#allocation23_spill] sm:$0xff]  ;;  %v3951_v31 = vld [vmem:[%s4326_s13 + $0x50] sm:$0xff] }
 0x208   : > { %3643 = vmatmul.msk.f32.gmra.mxu2 %vm4343_vm1, %v7152_v18  ;;  %1570 = vmatmul.f32.gmra.mxu3 %v3949_v10  ;;  %v5189_v44 = vadd.f32 %v1277_v0, %v1165_v60  ;;  %v3950_v18 = vld [vmem:[%s4326_s13 + $0x48] sm:$0xff] }
 0x20a   : > { %7153 = vst [vmem:[#allocation38_spill] sm:$0xff] %v5189_v44  ;;  %v7159_v44 = vld [vmem:[#allocation51_spill] sm:$0xff] }
 0x20b   : > { %v1054_v39 = vpop.f32.mrf.mxu2  ;;  %v1167_v53 = vpop.f32.mrf.mxu3 }
 0x20c   : > { %v1055_v45 = vadd.f32 %v1054_v39, %v7155_v54  ;;  %v1283_v34 = vpop.f32.mrf.mxu0  ;;  %v5201_v39 = vpop.f32.mrf.mxu1  ;;  %v7162_v54 = vld [vmem:[#allocation26_spill] sm:$0xff] }
 0x20d   : > { %7160 = vst [vmem:[#allocation39_spill] sm:$0xff] %v5201_v39  ;;  %v7171_v39 = vld [vmem:[#allocation32_spill] sm:$0xff] }
 0x20e   : > { %v1168_v15 = vadd.f32 %v1167_v53, %v1055_v45  ;;  %v7161_v53 = vld [vmem:[#allocation57_spill] sm:$0xff] }
 0x20f   : > { %3671 = vmatmul.msk.f32.gmra.mxu0 %vm491_vm2, %v7156_v57 }
 0x210   : > { %1460 = vmatmul.f32.gmra.mxu2 %v7157_v16  ;;  %1573 = vmatmul.f32.gmra.mxu3 %v3950_v18  ;;  %v5198_v0 = vadd.f32 %v1280_v1, %v1168_v15  ;;  %v7164_v16 = vld [vmem:[#allocation54_spill] sm:$0xff] }
 0x212   : > { %7158 = vst [vmem:[#allocation17_spill] sm:$0xff] %v5198_v0  ;;  %v2091_v0 = vld [vmem:[#allocation7 + $0x8] sm:$0xff] }
 0x213   : > { %v1057_v60 = vpop.f32.mrf.mxu2  ;;  %v1170_v10 = vpop.f32.mrf.mxu3  ;;  %2248 = vmatpush.msra.mxu1 %v2091_v0  ;;  %v3953_v0 = vld [vmem:[%s4326_s13 + $0x60] sm:$0xff] }
 0x214   : > { %v1058_v42 = vadd.f32 %v1057_v60, %v7159_v44  ;;  %v1286_v22 = vpop.f32.mrf.mxu0 }
 0x216   : > { %v1171_v45 = vadd.f32 %v1170_v10, %v1058_v42  ;;  %v7165_v42 = vld [vmem:[#allocation56_spill] sm:$0xff]  ;;  %v5213_v10 = vpop.f32.mrf.mxu1 }
 0x217   : > { %1689 = vmatmul.f32.gmra.mxu0 %v7161_v53  ;;  %7166 = vst [vmem:[#allocation18_spill] sm:$0xff] %v5213_v10  ;;  %v7167_v53 = vld [vmem:[#allocation29_spill] sm:$0xff]  ;;  %v7176_v10 = vld [vmem:[#allocation35_spill] sm:$0xff] }
 0x218   : > { %3645 = vmatmul.msk.f32.gmra.mxu2 %vm4343_vm1, %v7162_v54  ;;  %1576 = vmatmul.f32.gmra.mxu3 %v3951_v31  ;;  %v5208_v57 = vadd.f32 %v1283_v34, %v1171_v45  ;;  %v3952_v54 = vld [vmem:[%s4326_s13 + $0x58] sm:$0xff] }
 0x21a   : > { %7163 = vst [vmem:[#allocation45_spill] sm:$0xff] %v5208_v57  ;;  %v7169_v57 = vld [vmem:[#allocation55_spill] sm:$0xff] }
 0x21b   : > { %v1060_v1 = vpop.f32.mrf.mxu2  ;;  %v1173_v15 = vpop.f32.mrf.mxu3 }
 0x21c   : > { %v1061_v18 = vadd.f32 %v1060_v1, %v7164_v16  ;;  %v1289_v44 = vpop.f32.mrf.mxu0 }
 0x21e   : > { %v1174_v60 = vadd.f32 %v1173_v15, %v1061_v18  ;;  %v7170_v18 = vld [vmem:[#allocation61_spill] sm:$0xff] }
 0x21f   : > { %3672 = vmatmul.msk.f32.gmra.mxu0 %vm491_vm2, %v7165_v42 }
 0x220   : > { %1466 = vmatmul.f32.gmra.mxu2 %v7167_v53  ;;  %1579 = vmatmul.f32.gmra.mxu3 %v3952_v54  ;;  %v5217_v34 = vadd.f32 %v1286_v22, %v1174_v60  ;;  %v5227_v53 = vpop.f32.mrf.mxu1  ;;  %v7174_v54 = vld [vmem:[#allocation58_spill] sm:$0xff] }
 0x221   : > { %7173 = vst [vmem:[#allocation19_spill] sm:$0xff] %v5227_v53 }
 0x222   : > { %7168 = vst [vmem:[#allocation42_spill] sm:$0xff] %v5217_v34 }
 0x223   : > { %v1063_v45 = vpop.f32.mrf.mxu2  ;;  %v1176_v31 = vpop.f32.mrf.mxu3 }
 0x224   : > { %v1064_v1 = vadd.f32 %v1063_v45, %v7169_v57  ;;  %v1292_v16 = vpop.f32.mrf.mxu0 }
 0x226   : > { %v1177_v15 = vadd.f32 %v1176_v31, %v1064_v1  ;;  %v2090_v31 = vld [vmem:[#allocation7] sm:$0xff]  ;;  %v2121_v1 = vld [vmem:[#allocation7 + $0xf8] sm:$0xff] }
 0x227   : > { %1695 = vmatmul.f32.gmra.mxu0 %v7170_v18  ;;  %v7175_v18 = vld [vmem:[#allocation60_spill] sm:$0xff]  ;;  %2249 = vmatpush.msra.mxu1 %v2090_v31 }
 0x228   : > { %3647 = vmatmul.msk.f32.gmra.mxu2 %vm4343_vm1, %v7171_v39  ;;  %1582 = vmatmul.f32.gmra.mxu3 %v3953_v0  ;;  %v5225_v42 = vadd.f32 %v1289_v44, %v1177_v15  ;;  %v3954_v39 = vld [vmem:[%s4326_s13 + $0x68] sm:$0xff]  ;;  %v7178_v15 = vld [vmem:[#allocation12_spill] sm:$0xff]  ;;  %v2137_v0 = vld [vmem:[#allocation7 + $0x178] sm:$0xff] }
 0x229   : > { %2347 = vmatpush.msrb.mxu2 %v2121_v1  ;;  %3685 = vmatmul.msk.f32.vlgmr.msra.gmra.mxu1 %vm4343_vm1, %v7178_v15  ;;  %v2153_v1 = vld [vmem:[#allocation7 + $0x1f8] sm:$0xff] }
 0x22a   : > { %7172 = vst [vmem:[#allocation44_spill] sm:$0xff] %v5225_v42  ;;  %2460 = vmatpush.msrb.mxu3 %v2137_v0  ;;  %v7181_v42 = vld [vmem:[#allocation65_spill] sm:$0xff]  ;;  %2573 = vmatpush.msrb.mxu0 %v2153_v1 }
 0x22b   : > { %v1066_v22 = vpop.f32.mrf.mxu2  ;;  %v1179_v60 = vpop.f32.mrf.mxu3 }
 0x22c   : > { %v1067_v34 = vadd.f32 %v1066_v22, %v7174_v54  ;;  %v1295_v57 = vpop.f32.mrf.mxu0  ;;  %v7180_v54 = vld [vmem:[#allocation59_spill] sm:$0xff] }
 0x22e   : > { %v1180_v45 = vadd.f32 %v1179_v60, %v1067_v34  ;;  %v5239_v60 = vpop.f32.mrf.mxu1 }
 0x22f   : > { %3673 = vmatmul.msk.f32.gmra.mxu0 %vm491_vm2, %v7175_v18  ;;  %7179 = vst [vmem:[#allocation49_spill] sm:$0xff] %v5239_v60  ;;  %v7187_v60 = vld [vmem:[#allocation63_spill] sm:$0xff] }
 0x230   : > { %1472 = vmatmul.f32.gmra.mxu2 %v7176_v10  ;;  %1585 = vmatmul.f32.gmra.mxu3 %v3954_v39  ;;  %v5234_v44 = vadd.f32 %v1292_v16, %v1180_v45  ;;  %v7182_v39 = vld [vmem:[#allocation13_spill] sm:$0xff]  ;;  %v3955_v16 = vld [vmem:[%s4326_s13 + $0x70] sm:$0xff] }
 0x231   : > { %2253 = vmatmul.f32.gmra.mxu1 %v7178_v15  ;;  %v2120_v15 = vld [vmem:[#allocation7 + $0xf0] sm:$0xff] }
 0x232   : > { %7177 = vst [vmem:[#allocation43_spill] sm:$0xff] %v5234_v44  ;;  %2348 = vmatpush.msrb.mxu2 %v2120_v15 }
 0x233   : > { %v1069_v34 = vpop.f32.mrf.mxu2  ;;  %v1182_v22 = vpop.f32.mrf.mxu3 }
 0x234   : > { %v1070_v31 = vadd.f32 %v1069_v34, %v7180_v54  ;;  %v1298_v18 = vpop.f32.mrf.mxu0  ;;  %v7184_v34 = vld [vmem:[#allocation62_spill] sm:$0xff] }
 0x236   : > { %v1183_v10 = vadd.f32 %v1182_v22, %v1070_v31  ;;  %v5251_v31 = vpop.f32.mrf.mxu1 }
 0x237   : > { %1701 = vmatmul.f32.gmra.mxu0 %v7181_v42  ;;  %7185 = vst [vmem:[#allocation46_spill] sm:$0xff] %v5251_v31  ;;  %v2136_v31 = vld [vmem:[#allocation7 + $0x170] sm:$0xff] }
 0x238   : > { %3649 = vmatmul.msk.f32.gmra.mxu2 %vm4343_vm1, %v7182_v39  ;;  %1588 = vmatmul.f32.gmra.mxu3 %v3955_v16  ;;  %v5247_v45 = vadd.f32 %v1295_v57, %v1183_v10  ;;  %v7186_v39 = vld [vmem:[#allocation14_spill] sm:$0xff]  ;;  %v3956_v57 = vld [vmem:[%s4326_s13 + $0x78] sm:$0xff] }
 0x239   : > { %2461 = vmatpush.msrb.mxu3 %v2136_v31 }
 0x23a   : > { %7183 = vst [vmem:[#allocation20_spill] sm:$0xff] %v5247_v45 }
 0x23b   : > { %v1072_v0 = vpop.f32.mrf.mxu2  ;;  %v1185_v44 = vpop.f32.mrf.mxu3 }
 0x23c   : > { %v1073_v54 = vadd.f32 %v1072_v0, %v7184_v34  ;;  %v1301_v22 = vpop.f32.mrf.mxu0  ;;  %v2169_v34 = vld [vmem:[#allocation7 + $0x278] sm:$0xff] }
 0x23d   : > { %2686 = vmatpush.msrb.mxu1 %v2169_v34 }
 0x23e   : > { %v1186_v42 = vadd.f32 %v1185_v44, %v1073_v54  ;;  %v7188_v44 = vld [vmem:[#allocation15_spill] sm:$0xff] }
 0x23f   : > { %3674 = vmatmul.msk.f32.gmra.mxu0 %vm491_vm2, %v4872_v25  ;;  %v5261_v25 = vpop.f32.mrf.mxu1 }
 0x240   : > { %1478 = vmatmul.f32.gmra.mxu2 %v7186_v39  ;;  %1591 = vmatmul.f32.gmra.mxu3 %v3956_v57  ;;  %v5257_v10 = vadd.f32 %v1298_v18, %v1186_v42  ;;  %v3957_v18 = vld [vmem:[%s4326_s13 + $0x80] sm:$0xff]  ;;  %v7189_v42 = vld [vmem:[#allocation66_spill] sm:$0xff] }
 0x243   : > { %v1075_v16 = vpop.f32.mrf.mxu2  ;;  %v1188_v45 = vpop.f32.mrf.mxu3 }
 0x244   : > { %v1076_v1 = vadd.f32 %v1075_v16, %v7187_v60  ;;  %v1304_v53 = vpop.f32.mrf.mxu0  ;;  %v2152_v16 = vld [vmem:[#allocation7 + $0x1f0] sm:$0xff] }
 0x245   : > { %2574 = vmatpush.msrb.mxu0 %v2152_v16 }
 0x246   : > { %v1189_v0 = vadd.f32 %v1188_v45, %v1076_v1  ;;  %v3958_v1 = vld [vmem:[%s4326_s13 + $0x88] sm:$0xff] }
 0x247   : > { %1707 = vmatmul.f32.gmra.mxu0 %v4911_v47  ;;  %v5276_v15 = vpop.f32.mrf.mxu1 }
 0x248   : > { %3651 = vmatmul.msk.f32.gmra.mxu2 %vm4343_vm1, %v7188_v44  ;;  %1594 = vmatmul.f32.gmra.mxu3 %v3957_v18  ;;  %v5267_v54 = vadd.f32 %v1301_v22, %v1189_v0  ;;  %v7191_v0 = vld [vmem:[#allocation67_spill] sm:$0xff] }
 0x24b   : > { %v1078_v60 = vpop.f32.mrf.mxu2  ;;  %v1191_v45 = vpop.f32.mrf.mxu3 }
 0x24c   : > { %v1079_v39 = vadd.f32 %v1078_v60, %v7189_v42  ;;  %v1307_v57 = vpop.f32.mrf.mxu0  ;;  %v2119_v42 = vld [vmem:[#allocation7 + $0xe8] sm:$0xff] }
 0x24d   : > { %2349 = vmatpush.msrb.mxu2 %v2119_v42 }
 0x24e   : > { %v1192_v47 = vadd.f32 %v1191_v45, %v1079_v39  ;;  %v2168_v45 = vld [vmem:[#allocation7 + $0x270] sm:$0xff]  ;;  %v2135_v39 = vld [vmem:[#allocation7 + $0x168] sm:$0xff] }
 0x24f   : > { %3675 = vmatmul.msk.f32.gmra.mxu0 %vm491_vm2, %v4902_v3  ;;  %2687 = vmatpush.msrb.mxu1 %v2168_v45  ;;  %v5286_v16 = vpop.f32.mrf.mxu1 }
 0x250   : > { %1484 = vmatmul.f32.gmra.mxu2 %v4404_v5  ;;  %1597 = vmatmul.f32.gmra.mxu3 %v3958_v1  ;;  %v5274_v34 = vadd.f32 %v1304_v53, %v1192_v47  ;;  %v3959_v5 = vld [vmem:[%s4326_s13 + $0x90] sm:$0xff] }
 0x251   : > { %2462 = vmatpush.msrb.mxu3 %v2135_v39 }
 0x252   : > { %7190 = vst [vmem:[#allocation48_spill] sm:$0xff] %v5274_v34  ;;  %v7225_v34 = vld [vmem:[#allocation46_spill] sm:$0xff] }
 0x253   : > { %v1081_v22 = vpop.f32.mrf.mxu2  ;;  %v1194_v31 = vpop.f32.mrf.mxu3 }
 0x254   : > { %v1082_v44 = vadd.f32 %v1081_v22, %v7191_v0  ;;  %v1666_v18 = vpop.f32.mrf.mxu0  ;;  %v5299_v0 = vld [vmem:[%s6894_s3] ss:$0 sm:$0xff] }
 0x256   : > { %v1195_v60 = vadd.f32 %v1194_v31, %v1082_v44  ;;  %v5292_v31 = vld [vmem:[%s6893_s2] ss:$0 sm:$0xff] }
 0x257   : > { %1713 = vmatmul.f32.gmra.mxu0 %v4937_v8  ;;  %v5306_v39 = vpop.f32.mrf.mxu1 }
 0x258   : > { %3653 = vmatmul.msk.f32.gmra.mxu2 %vm4343_vm1, %v4420_v12  ;;  %1600 = vmatmul.f32.gmra.mxu3 %v3959_v5  ;;  %v5284_v3 = vadd.f32 %v1307_v57, %v1195_v60  ;;  %v2151_v12 = vld [vmem:[#allocation7 + $0x1e8] sm:$0xff] }
 0x259   : > { %2575 = vmatpush.msrb.mxu0 %v2151_v12  ;;  %v3961_v12 = vld [vmem:[%s4326_s13 + $0xa0] sm:$0xff] }
 0x25a   : > { %7192 = vst [vmem:[#allocation21_spill] sm:$0xff] %v5284_v3 }
 0x25b   : > { %v1440_v53 = vpop.f32.mrf.mxu2  ;;  %v1553_v47 = vpop.f32.mrf.mxu3 }
 0x25c   : > { %v1441_v1 = vadd.f32 %v1440_v53, %v4922_v36  ;;  %v1669_v22 = vpop.f32.mrf.mxu0  ;;  %v3960_v36 = vld [vmem:[%s4326_s13 + $0x98] sm:$0xff] }
 0x25e   : > { %v1554_v8 = vadd.f32 %v1553_v47, %v1441_v1  ;;  %v2167_v47 = vld [vmem:[#allocation7 + $0x268] sm:$0xff]  ;;  %v2134_v1 = vld [vmem:[#allocation7 + $0x160] sm:$0xff] }
 0x25f   : > { %3676 = vmatmul.msk.f32.gmra.mxu0 %vm491_vm2, %v4928_v55  ;;  %2688 = vmatpush.msrb.mxu1 %v2167_v47  ;;  %v3962_v47 = vld [vmem:[%s4326_s13 + $0xa8] sm:$0xff] }
 0x260   : > { %v1667_v57 = vadd.f32 %v1666_v18, %v1554_v8  ;;  %1490 = vmatmul.f32.gmra.mxu2 %v4444_v21  ;;  %1603 = vmatmul.f32.gmra.mxu3 %v3960_v36  ;;  %v2118_v21 = vld [vmem:[#allocation7 + $0xe0] sm:$0xff] }
 0x261   : > { %2350 = vmatpush.msrb.mxu2 %v2118_v21  ;;  %2463 = vmatpush.msrb.mxu3 %v2134_v1 }
 0x262   : > { %v1766_v44 = vmul.f32 %v5292_v31, %v1667_v57 }
 0x263   : > { %v1443_v60 = vpop.f32.mrf.mxu2  ;;  %v1556_v45 = vpop.f32.mrf.mxu3 }
 0x264   : > { %v1802_v42 = vadd.f32 %v5299_v0, %v1766_v44  ;;  %v1444_v55 = vadd.f32 %v1443_v60, %v4941_v33  ;;  %v1672_v18 = vpop.f32.mrf.mxu0 }
 0x266   : > { %v5308_v5 = vmax.f32 %v1802_v42, 0.0  ;;  %v1557_v53 = vadd.f32 %v1556_v45, %v1444_v55  ;;  %v2150_v42 = vld [vmem:[#allocation7 + $0x1e0] sm:$0xff]  ;;  %v5328_v55 = vpop.f32.mrf.mxu1 }
 0x267   : > { %1719 = vmatmul.f32.gmra.mxu0 %v4965_v59 }
 0x268   : > { %v1670_v8 = vadd.f32 %v1669_v22, %v1557_v53  ;;  %3655 = vmatmul.msk.f32.gmra.mxu2 %vm4343_vm1, %v4460_v28  ;;  %1606 = vmatmul.f32.gmra.mxu3 %v3961_v12  ;;  %v5316_v33 = vrot.slane %v5308_v5, 7 }
 0x269   : > { %2576 = vmatpush.msrb.mxu0 %v2150_v42  ;;  %v3963_v42 = vld [vmem:[%s4326_s13 + $0xb0] sm:$0xff] }
 0x26a   : > { %v1767_v57 = vmul.f32 %v5292_v31, %v1670_v8  ;;  %3687 = vmatmul.msk.f32.gmra.mxu1 %vm4343_vm1, %v5316_v33 }
 0x26b   : > { %v1446_v59 = vpop.f32.mrf.mxu2  ;;  %v1559_v22 = vpop.f32.mrf.mxu3 }
 0x26c   : > { %v1803_v36 = vadd.f32 %v5299_v0, %v1767_v57  ;;  %v1447_v28 = vadd.f32 %v1446_v59, %v4950_v62  ;;  %v1675_v44 = vpop.f32.mrf.mxu0 }
 0x26e   : > { %v5324_v60 = vmax.f32 %v1803_v36, 0.0  ;;  %v1560_v45 = vadd.f32 %v1559_v22, %v1447_v28  ;;  %v2166_v22 = vld [vmem:[#allocation7 + $0x260] sm:$0xff]  ;;  %v2117_v36 = vld [vmem:[#allocation7 + $0xd8] sm:$0xff] }
 0x26f   : > { %3677 = vmatmul.msk.f32.gmra.mxu0 %vm491_vm2, %v4956_v29  ;;  %v2133_v28 = vld [vmem:[#allocation7 + $0x158] sm:$0xff]  ;;  %2689 = vmatpush.msrb.mxu1 %v2166_v22 }
 0x270   : > { %v1673_v53 = vadd.f32 %v1672_v18, %v1560_v45  ;;  %1496 = vmatmul.f32.gmra.mxu2 %v4484_v43  ;;  %1609 = vmatmul.f32.gmra.mxu3 %v3962_v47  ;;  %v1897_v21 = vrot.slane %v5324_v60, 7 }
 0x271   : > { %2351 = vmatpush.msrb.mxu2 %v2117_v36  ;;  %2464 = vmatpush.msrb.mxu3 %v2133_v28 }
 0x272   : > { %v1768_v62 = vmul.f32 %v5292_v31, %v1673_v53  ;;  %v5336_v1 = vsel %vm395_vm0, %v5316_v33, %v1897_v21 }
 0x273   : > { %v1449_v8 = vpop.f32.mrf.mxu2  ;;  %v1562_v12 = vpop.f32.mrf.mxu3  ;;  %2259 = vmatmul.f32.gmra.mxu1 %v5336_v1 }
 0x274   : > { %v1804_v29 = vadd.f32 %v5299_v0, %v1768_v62  ;;  %v1450_v43 = vadd.f32 %v1449_v8, %v4969_v58  ;;  %v1678_v18 = vpop.f32.mrf.mxu0  ;;  %v5351_v58 = vpop.f32.mrf.mxu1 }
 0x276   : > { %v5341_v57 = vmax.f32 %v1804_v29, 0.0  ;;  %v1563_v59 = vadd.f32 %v1562_v12, %v1450_v43  ;;  %v2149_v29 = vld [vmem:[#allocation7 + $0x1d8] sm:$0xff] }
 0x277   : > { %1725 = vmatmul.f32.gmra.mxu0 %v4993_v17 }
 0x278   : > { %v1676_v45 = vadd.f32 %v1675_v44, %v1563_v59  ;;  %3657 = vmatmul.msk.f32.gmra.mxu2 %vm4343_vm1, %v4500_v51  ;;  %1612 = vmatmul.f32.gmra.mxu3 %v3963_v42  ;;  %v5349_v53 = vrot.slane %v5341_v57, 7  ;;  %v3964_v59 = vld [vmem:[%s4326_s13 + $0xb8] sm:$0xff] }
 0x279   : > { %2577 = vmatpush.msrb.mxu0 %v2149_v29  ;;  %v3965_v29 = vld [vmem:[%s4326_s13 + $0xc0] sm:$0xff] }
 0x27a   : > { %7193 = vst [vmem:[#allocation47_spill] sm:$0xff] %v5349_v53  ;;  %v1769_v47 = vmul.f32 %v5292_v31, %v1676_v45 }
 0x27b   : > { %v1452_v21 = vpop.f32.mrf.mxu2  ;;  %v1565_v17 = vpop.f32.mrf.mxu3  ;;  %3689 = vmatmul.msk.f32.gmra.mxu1 %vm4343_vm1, %v5349_v53 }
 0x27c   : > { %v1805_v51 = vadd.f32 %v5299_v0, %v1769_v47  ;;  %v1453_v44 = vadd.f32 %v1452_v21, %v4978_v4  ;;  %v1681_v62 = vpop.f32.mrf.mxu0 }
 0x27e   : > { %v5359_v8 = vmax.f32 %v1805_v51, 0.0  ;;  %v1566_v12 = vadd.f32 %v1565_v17, %v1453_v44  ;;  %v2165_v17 = vld [vmem:[#allocation7 + $0x258] sm:$0xff]  ;;  %v2116_v51 = vld [vmem:[#allocation7 + $0xd0] sm:$0xff] }
 0x27f   : > { %3678 = vmatmul.msk.f32.gmra.mxu0 %vm491_vm2, %v4984_v26  ;;  %v5372_v26 = vpop.f32.mrf.mxu1  ;;  %v2132_v44 = vld [vmem:[#allocation7 + $0x150] sm:$0xff]  ;;  %2690 = vmatpush.msrb.mxu1 %v2165_v17 }
 0x280   : > { %v1679_v43 = vadd.f32 %v1678_v18, %v1566_v12  ;;  %1502 = vmatmul.f32.gmra.mxu2 %v4524_v2  ;;  %1615 = vmatmul.f32.gmra.mxu3 %v3964_v59  ;;  %v1900_v22 = vrot.slane %v5359_v8, 7 }
 0x281   : > { %2352 = vmatpush.msrb.mxu2 %v2116_v51  ;;  %2465 = vmatpush.msrb.mxu3 %v2132_v44 }
 0x282   : > { %v1770_v36 = vmul.f32 %v5292_v31, %v1679_v43  ;;  %v5369_v4 = vsel %vm395_vm0, %v5349_v53, %v1900_v22 }
 0x283   : > { %7194 = vst [vmem:[#allocation53_spill] sm:$0xff] %v5369_v4  ;;  %v1455_v28 = vpop.f32.mrf.mxu2  ;;  %v1568_v45 = vpop.f32.mrf.mxu3  ;;  %2265 = vmatmul.f32.gmra.mxu1 %v5369_v4 }
 0x284   : > { %v1806_v2 = vadd.f32 %v5299_v0, %v1770_v36  ;;  %v1456_v18 = vadd.f32 %v1455_v28, %v4997_v40  ;;  %v1684_v42 = vpop.f32.mrf.mxu0 }
 0x286   : > { %v5376_v47 = vmax.f32 %v1806_v2, 0.0  ;;  %v1569_v21 = vadd.f32 %v1568_v45, %v1456_v18  ;;  %v2148_v2 = vld [vmem:[#allocation7 + $0x1d0] sm:$0xff] }
 0x287   : > { %1731 = vmatmul.f32.gmra.mxu0 %v5021_v38  ;;  %v5392_v36 = vpop.f32.mrf.mxu1 }
 0x288   : > { %v1682_v12 = vadd.f32 %v1681_v62, %v1569_v21  ;;  %3659 = vmatmul.msk.f32.gmra.mxu2 %vm4343_vm1, %v4540_v19  ;;  %1618 = vmatmul.f32.gmra.mxu3 %v3965_v29  ;;  %v5384_v43 = vrot.slane %v5376_v47, 7  ;;  %v3966_v21 = vld [vmem:[%s4326_s13 + $0xc8] sm:$0xff] }
 0x289   : > { %2578 = vmatpush.msrb.mxu0 %v2148_v2  ;;  %v3967_v2 = vld [vmem:[%s4326_s13 + $0xd0] sm:$0xff] }
 0x28a   : > { %7195 = vst [vmem:[#allocation22_spill] sm:$0xff] %v5384_v43  ;;  %v1771_v40 = vmul.f32 %v5292_v31, %v1682_v12 }
 0x28b   : > { %v1458_v59 = vpop.f32.mrf.mxu2  ;;  %v1571_v22 = vpop.f32.mrf.mxu3  ;;  %3691 = vmatmul.msk.f32.gmra.mxu1 %vm4343_vm1, %v5384_v43 }
 0x28c   : > { %v1807_v38 = vadd.f32 %v5299_v0, %v1771_v40  ;;  %v1459_v19 = vadd.f32 %v1458_v59, %v5006_v14  ;;  %v1687_v62 = vpop.f32.mrf.mxu0  ;;  %v2164_v59 = vld [vmem:[#allocation7 + $0x250] sm:$0xff] }
 0x28d   : > { %2691 = vmatpush.msrb.mxu1 %v2164_v59 }
 0x28e   : > { %v5394_v28 = vmax.f32 %v1807_v38, 0.0  ;;  %v1572_v45 = vadd.f32 %v1571_v22, %v1459_v19  ;;  %v2115_v22 = vld [vmem:[#allocation7 + $0xc8] sm:$0xff] }
 0x28f   : > { %3679 = vmatmul.msk.f32.gmra.mxu0 %vm491_vm2, %v5012_v20  ;;  %v2131_v38 = vld [vmem:[#allocation7 + $0x148] sm:$0xff]  ;;  %v5412_v19 = vpop.f32.mrf.mxu1  ;;  %2353 = vmatpush.msrb.mxu2 %v2115_v22 }
 0x290   : > { %v1685_v18 = vadd.f32 %v1684_v42, %v1572_v45  ;;  %1508 = vmatmul.f32.gmra.mxu2 %v7111_v6  ;;  %1621 = vmatmul.f32.gmra.mxu3 %v3966_v21  ;;  %v1903_v17 = vrot.slane %v5394_v28, 7 }
 0x291   : > { %2466 = vmatpush.msrb.mxu3 %v2131_v38 }
 0x292   : > { %v1772_v14 = vmul.f32 %v5292_v31, %v1685_v18  ;;  %v5404_v51 = vsel %vm395_vm0, %v5384_v43, %v1903_v17  ;;  %v1352_v18 = vadd.f32 %v5145_v13, %v5032_v61  ;;  %v3968_v13 = vld [vmem:[%s4326_s13 + $0xd8] sm:$0xff] }
 0x293   : > { %7196 = vst [vmem:[#allocation50_spill] sm:$0xff] %v5404_v51  ;;  %v1461_v44 = vpop.f32.mrf.mxu2  ;;  %v1574_v12 = vpop.f32.mrf.mxu3  ;;  %2271 = vmatmul.f32.gmra.mxu1 %v5404_v51 }
 0x294   : > { %v1808_v20 = vadd.f32 %v5299_v0, %v1772_v14  ;;  %v1462_v6 = vadd.f32 %v1461_v44, %v5025_v48  ;;  %v1690_v42 = vpop.f32.mrf.mxu0 }
 0x296   : > { %v5409_v29 = vmax.f32 %v1808_v20, 0.0  ;;  %v1575_v40 = vadd.f32 %v1574_v12, %v1462_v6  ;;  %v2147_v20 = vld [vmem:[#allocation7 + $0x1c8] sm:$0xff] }
 0x297   : > { %1737 = vmatmul.f32.gmra.mxu0 %v5051_v49  ;;  %v5437_v59 = vpop.f32.mrf.mxu1 }
 0x298   : > { %v1688_v45 = vadd.f32 %v1687_v62, %v1575_v40  ;;  %3661 = vmatmul.msk.f32.gmra.mxu2 %vm4343_vm1, %v7114_v63  ;;  %1624 = vmatmul.f32.gmra.mxu3 %v3967_v2  ;;  %v5419_v48 = vrot.slane %v5409_v29, 7  ;;  %v1355_v40 = vadd.f32 %v5156_v41, %v5047_v52  ;;  %v2163_v41 = vld [vmem:[#allocation7 + $0x248] sm:$0xff] }
 0x299   : > { %2579 = vmatpush.msrb.mxu0 %v2147_v20  ;;  %2692 = vmatpush.msrb.mxu1 %v2163_v41  ;;  %v2113_v20 = vld [vmem:[#allocation7 + $0xb8] sm:$0xff] }
 0x29a   : > { %7197 = vst [vmem:[#allocation52_spill] sm:$0xff] %v5419_v48  ;;  %v1773_v49 = vmul.f32 %v5292_v31, %v1688_v45 }
 0x29b   : > { %v1464_v21 = vpop.f32.mrf.mxu2  ;;  %v1577_v17 = vpop.f32.mrf.mxu3  ;;  %3693 = vmatmul.msk.f32.gmra.mxu1 %vm4343_vm1, %v5419_v48 }
 0x29c   : > { %v1809_v63 = vadd.f32 %v5299_v0, %v1773_v49  ;;  %v1465_v62 = vadd.f32 %v1464_v21, %v1352_v18  ;;  %v1693_v14 = vpop.f32.mrf.mxu0  ;;  %v2114_v49 = vld [vmem:[#allocation7 + $0xc0] sm:$0xff] }
 0x29d   : > { %v2130_v21 = vld [vmem:[#allocation7 + $0x140] sm:$0xff]  ;;  %2354 = vmatpush.msrb.mxu2 %v2114_v49  ;;  %v2127_v49 = vld [vmem:[#allocation7 + $0x128] sm:$0xff] }
 0x29e   : > { %v5428_v44 = vmax.f32 %v1809_v63, 0.0  ;;  %v1578_v12 = vadd.f32 %v1577_v17, %v1465_v62  ;;  %v2146_v17 = vld [vmem:[#allocation7 + $0x1c0] sm:$0xff]  ;;  %2467 = vmatpush.msrb.mxu3 %v2130_v21  ;;  %v2143_v21 = vld [vmem:[#allocation7 + $0x1a8] sm:$0xff] }
 0x29f   : > { %3680 = vmatmul.msk.f32.gmra.mxu0 %vm491_vm2, %v5040_v9  ;;  %v3969_v62 = vld [vmem:[%s4326_s13 + $0xe0] sm:$0xff]  ;;  %2355 = vmatpush.msrb.mxu2 %v2113_v20 }
 0x2a0   : > { %v1691_v61 = vadd.f32 %v1690_v42, %v1578_v12  ;;  %1514 = vmatmul.f32.gmra.mxu2 %v7115_v50  ;;  %1627 = vmatmul.f32.gmra.mxu3 %v3968_v13  ;;  %v1906_v6 = vrot.slane %v5428_v44, 7  ;;  %v2145_v13 = vld [vmem:[#allocation7 + $0x1b8] sm:$0xff] }
 0x2a1   : > { %2580 = vmatpush.msrb.mxu0 %v2146_v17  ;;  %v2110_v17 = vld [vmem:[#allocation7 + $0xa0] sm:$0xff] }
 0x2a2   : > { %v1774_v22 = vmul.f32 %v5292_v31, %v1691_v61  ;;  %v5442_v38 = vsel %vm395_vm0, %v5419_v48, %v1906_v6  ;;  %v2129_v61 = vld [vmem:[#allocation7 + $0x138] sm:$0xff] }
 0x2a3   : > { %7198 = vst [vmem:[#allocation23_spill] sm:$0xff] %v5442_v38  ;;  %v1467_v9 = vpop.f32.mrf.mxu2  ;;  %v1580_v42 = vpop.f32.mrf.mxu3  ;;  %2277 = vmatmul.f32.gmra.mxu1 %v5442_v38  ;;  %2468 = vmatpush.msrb.mxu3 %v2129_v61  ;;  %v2126_v61 = vld [vmem:[#allocation7 + $0x120] sm:$0xff] }
 0x2a4   : > { %v1810_v50 = vadd.f32 %v5299_v0, %v1774_v22  ;;  %v1468_v45 = vadd.f32 %v1467_v9, %v1355_v40  ;;  %v1696_v2 = vpop.f32.mrf.mxu0  ;;  %v2144_v9 = vld [vmem:[#allocation7 + $0x1b0] sm:$0xff]  ;;  %2581 = vmatpush.msrb.mxu0 %v2145_v13  ;;  %v2142_v13 = vld [vmem:[#allocation7 + $0x1a0] sm:$0xff] }
 0x2a6   : > { %v5446_v18 = vmax.f32 %v1810_v50, 0.0  ;;  %v1581_v52 = vadd.f32 %v1580_v42, %v1468_v45  ;;  %v5462_v42 = vpop.f32.mrf.mxu1  ;;  %2582 = vmatpush.msrb.mxu0 %v2144_v9 }
 0x2a7   : > { %1743 = vmatmul.f32.gmra.mxu0 %v5079_v24  ;;  %v1358_v24 = vadd.f32 %v5166_v46, %v5060_v27  ;;  %v2111_v27 = vld [vmem:[#allocation7 + $0xa8] sm:$0xff] }
 0x2a8   : > { %v1694_v63 = vadd.f32 %v1693_v14, %v1581_v52  ;;  %3663 = vmatmul.msk.f32.gmra.mxu2 %vm4343_vm1, %v7118_v11  ;;  %1630 = vmatmul.f32.gmra.mxu3 %v3969_v62  ;;  %v5454_v12 = vrot.slane %v5446_v18, 7  ;;  %v2112_v14 = vld [vmem:[#allocation7 + $0xb0] sm:$0xff]  ;;  %v3970_v62 = vld [vmem:[%s4326_s13 + $0xe8] sm:$0xff] }
 0x2a9   : > { %v2128_v11 = vld [vmem:[#allocation7 + $0x130] sm:$0xff]  ;;  %2356 = vmatpush.msrb.mxu2 %v2112_v14  ;;  %2583 = vmatpush.msrb.mxu0 %v2143_v21 }
 0x2aa   : > { %7199 = vst [vmem:[#allocation51_spill] sm:$0xff] %v5454_v12  ;;  %v1775_v6 = vmul.f32 %v5292_v31, %v1694_v63  ;;  %2469 = vmatpush.msrb.mxu3 %v2128_v11  ;;  %v2108_v11 = vld [vmem:[#allocation7 + $0x90] sm:$0xff] }
 0x2ab   : > { %v1470_v40 = vpop.f32.mrf.mxu2  ;;  %v1583_v22 = vpop.f32.mrf.mxu3  ;;  %3695 = vmatmul.msk.f32.gmra.mxu1 %vm4343_vm1, %v5454_v12  ;;  %2357 = vmatpush.msrb.mxu2 %v2111_v27  ;;  %v2140_v21 = vld [vmem:[#allocation7 + $0x190] sm:$0xff] }
 0x2ac   : > { %v1811_v50 = vadd.f32 %v5299_v0, %v1775_v6  ;;  %v1471_v45 = vadd.f32 %v1470_v40, %v1358_v24  ;;  %v1699_v52 = vpop.f32.mrf.mxu0  ;;  %2470 = vmatpush.msrb.mxu3 %v2127_v49  ;;  %v2109_v24 = vld [vmem:[#allocation7 + $0x98] sm:$0xff]  ;;  %v1361_v6 = vadd.f32 %v5181_v7, %v5075_v23  ;;  %2584 = vmatpush.msrb.mxu0 %v2142_v13  ;;  %v2124_v49 = vld [vmem:[#allocation7 + $0x110] sm:$0xff]  ;;  %v2139_v13 = vld [vmem:[#allocation7 + $0x188] sm:$0xff] }
 0x2ad   : > { %2358 = vmatpush.msrb.mxu2 %v2110_v17  ;;  %v2107_v17 = vld [vmem:[#allocation7 + $0x88] sm:$0xff] }
 0x2ae   : > { %v5465_v46 = vmax.f32 %v1811_v50, 0.0  ;;  %v1584_v41 = vadd.f32 %v1583_v22, %v1471_v45  ;;  %2471 = vmatpush.msrb.mxu3 %v2126_v61  ;;  %v2141_v22 = vld [vmem:[#allocation7 + $0x198] sm:$0xff]  ;;  %v5481_v23 = vpop.f32.mrf.mxu1  ;;  %v2123_v61 = vld [vmem:[#allocation7 + $0x108] sm:$0xff] }
 0x2af   : > { %3681 = vmatmul.msk.f32.gmra.mxu0 %vm491_vm2, %v5068_v32  ;;  %2359 = vmatpush.msrb.mxu2 %v2109_v24  ;;  %v2106_v24 = vld [vmem:[#allocation7 + $0x80] sm:$0xff] }
 0x2b0   : > { %v1697_v63 = vadd.f32 %v1696_v2, %v1584_v41  ;;  %1520 = vmatmul.f32.gmra.mxu2 %v7119_v56  ;;  %1633 = vmatmul.f32.gmra.mxu3 %v3970_v62  ;;  %v1909_v20 = vrot.slane %v5465_v46, 7  ;;  %v2125_v56 = vld [vmem:[#allocation7 + $0x118] sm:$0xff]  ;;  %v2162_v41 = vld [vmem:[#allocation7 + $0x240] sm:$0xff]  ;;  %v7201_v62 = vld [vmem:[#allocation25_spill] sm:$0xff] }
 0x2b1   : > { %2472 = vmatpush.msrb.mxu3 %v2125_v56  ;;  %2585 = vmatpush.msrb.mxu0 %v2141_v22 }
 0x2b2   : > { %v1776_v14 = vmul.f32 %v5292_v31, %v1697_v63  ;;  %v5477_v32 = vsel %vm395_vm0, %v5454_v12, %v1909_v20  ;;  %2360 = vmatpush.msrb.mxu2 %v2108_v11  ;;  %2693 = vmatpush.msrb.mxu1 %v2162_v41  ;;  %v7205_v41 = vld [vmem:[#allocation28_spill] sm:$0xff] }
 0x2b3   : > { %7200 = vst [vmem:[#allocation57_spill] sm:$0xff] %v5477_v32  ;;  %v1473_v2 = vpop.f32.mrf.mxu2  ;;  %v1586_v40 = vpop.f32.mrf.mxu3  ;;  %2283 = vmatmul.f32.gmra.mxu1 %v5477_v32  ;;  %2473 = vmatpush.msrb.mxu3 %v2124_v49 }
 0x2b4   : > { %v1812_v9 = vadd.f32 %v5299_v0, %v1776_v14  ;;  %v1474_v50 = vadd.f32 %v1473_v2, %v1361_v6  ;;  %v1702_v45 = vpop.f32.mrf.mxu0  ;;  %2586 = vmatpush.msrb.mxu0 %v2140_v21  ;;  %v7203_v6 = vld [vmem:[#allocation24_spill] sm:$0xff]  ;;  %2361 = vmatpush.msrb.mxu2 %v2107_v17  ;;  %v7207_v17 = vld [vmem:[#allocation30_spill] sm:$0xff] }
 0x2b5   : > { %v7204_v14 = vld [vmem:[#allocation40_spill] sm:$0xff]  ;;  %2474 = vmatpush.msrb.mxu3 %v2123_v61  ;;  %v7208_v61 = vld [vmem:[#allocation27_spill] sm:$0xff] }
 0x2b6   : > { %v5483_v7 = vmax.f32 %v1812_v9, 0.0  ;;  %v1587_v27 = vadd.f32 %v1586_v40, %v1474_v50  ;;  %2587 = vmatpush.msrb.mxu0 %v2139_v13  ;;  %2362 = vmatpush.msrb.mxu2 %v2106_v24  ;;  %v5504_v49 = vpop.f32.mrf.mxu1  ;;  %v7209_v13 = vld [vmem:[#allocation39_spill] sm:$0xff] }
 0x2b7   : > { %1749 = vmatmul.f32.gmra.mxu0 %v5113_v37  ;;  %v1364_v37 = vadd.f32 %v7204_v14, %v7203_v6  ;;  %7206 = vst [vmem:[#allocation54_spill] sm:$0xff] %v5504_v49  ;;  %v1367_v24 = vadd.f32 %v7209_v13, %v7208_v61 }
 0x2b8   : > { %v1700_v63 = vadd.f32 %v1699_v52, %v1587_v27  ;;  %3665 = vmatmul.msk.f32.gmra.mxu2 %vm4343_vm1, %v5099_v30  ;;  %1636 = vmatmul.f32.gmra.mxu3 %v7201_v62  ;;  %v5491_v20 = vrot.slane %v5483_v7, 7  ;;  %v2122_v52 = vld [vmem:[#allocation7 + $0x100] sm:$0xff] }
 0x2b9   : > { %v2138_v30 = vld [vmem:[#allocation7 + $0x180] sm:$0xff]  ;;  %2475 = vmatpush.msrb.mxu3 %v2122_v52 }
 0x2ba   : > { %7202 = vst [vmem:[#allocation26_spill] sm:$0xff] %v5491_v20  ;;  %v1777_v56 = vmul.f32 %v5292_v31, %v1700_v63  ;;  %2588 = vmatpush.msrb.mxu0 %v2138_v30  ;;  %v3971_v63 = vld [vmem:[%s4326_s13 + $0xf8] sm:$0xff] }
 0x2bb   : > { %v1476_v2 = vpop.f32.mrf.mxu2  ;;  %v1589_v40 = vpop.f32.mrf.mxu3  ;;  %3697 = vmatmul.msk.f32.gmra.mxu1 %vm4343_vm1, %v5491_v20 }
 0x2bc   : > { %v1813_v22 = vadd.f32 %v5299_v0, %v1777_v56  ;;  %v1477_v11 = vadd.f32 %v1476_v2, %v1364_v37  ;;  %v1705_v9 = vpop.f32.mrf.mxu0 }
 0x2be   : > { %v5500_v50 = vmax.f32 %v1813_v22, 0.0  ;;  %v1590_v27 = vadd.f32 %v1589_v40, %v1477_v11  ;;  %v2161_v22 = vld [vmem:[#allocation7 + $0x238] sm:$0xff]  ;;  %v7211_v11 = vld [vmem:[#allocation37_spill] sm:$0xff]  ;;  %v5530_v13 = vpop.f32.mrf.mxu1 }
 0x2bf   : > { %3682 = vmatmul.msk.f32.gmra.mxu0 %vm491_vm2, %v7205_v41  ;;  %2694 = vmatpush.msrb.mxu1 %v2161_v22  ;;  %v7212_v41 = vld [vmem:[#allocation12_spill] sm:$0xff]  ;;  %7217 = vst [vmem:[#allocation55_spill] sm:$0xff] %v5530_v13 }
 0x2c0   : > { %v1703_v21 = vadd.f32 %v1702_v45, %v1590_v27  ;;  %1526 = vmatmul.f32.gmra.mxu2 %v7207_v17  ;;  %1639 = vmatmul.f32.gmra.mxu3 %v3971_v63  ;;  %v1912_v62 = vrot.slane %v5500_v50, 7  ;;  %v7215_v63 = vld [vmem:[#allocation31_spill] sm:$0xff] }
 0x2c2   : > { %v1778_v6 = vmul.f32 %v5292_v31, %v1703_v21  ;;  %v5514_v14 = vsel %vm395_vm0, %v5491_v20, %v1912_v62  ;;  %v7213_v21 = vmov 0.0   ;;  %v7216_v62 = vld [vmem:[#allocation18_spill] sm:$0xff] }
 0x2c3   : > { %7210 = vst [vmem:[#allocation56_spill] sm:$0xff] %v5514_v14  ;;  %v1479_v37 = vpop.f32.mrf.mxu2  ;;  %v1592_v56 = vpop.f32.mrf.mxu3  ;;  %2289 = vmatmul.f32.gmra.mxu1 %v5514_v14  ;;  %v1370_v61 = vadd.f32 %v7216_v62, %v7215_v63  ;;  %v7218_v63 = vld [vmem:[#allocation34_spill] sm:$0xff]  ;;  %v7219_v62 = vld [vmem:[#allocation19_spill] sm:$0xff] }
 0x2c4   : > { %v1814_v45 = vadd.f32 %v5299_v0, %v1778_v6  ;;  %v1480_v52 = vadd.f32 %v1479_v37, %v1367_v24  ;;  %v1708_v2 = vpop.f32.mrf.mxu0  ;;  %v1373_v13 = vadd.f32 %v7219_v62, %v7218_v63  ;;  %v2160_v63 = vld [vmem:[#allocation7 + $0x230] sm:$0xff]  ;;  %v7222_v62 = vld [vmem:[#allocation33_spill] sm:$0xff] }
 0x2c5   : > { %2695 = vmatpush.msrb.mxu1 %v2160_v63 }
 0x2c6   : > { %v5518_v40 = vmax.f32 %v1814_v45, 0.0  ;;  %v1593_v30 = vadd.f32 %v1592_v56, %v1480_v52 }
 0x2c7   : > { %1755 = vmatmul.f32.gmra.mxu0 %v7211_v11 }
 0x2c8   : > { %v1706_v27 = vadd.f32 %v1705_v9, %v1593_v30  ;;  %3667 = vmatmul.msk.f32.gmra.mxu2 %vm4343_vm1, %v7212_v41  ;;  %1642 = vmatmul.f32.gmra.mxu3 %v7213_v21  ;;  %v5526_v17 = vrot.slane %v5518_v40, 7 }
 0x2ca   : > { %7214 = vst [vmem:[#allocation29_spill] sm:$0xff] %v5526_v17  ;;  %v1779_v24 = vmul.f32 %v5292_v31, %v1706_v27 }
 0x2cb   : > { %v1482_v6 = vpop.f32.mrf.mxu2  ;;  %v1595_v37 = vpop.f32.mrf.mxu3  ;;  %3699 = vmatmul.msk.f32.gmra.mxu1 %vm4343_vm1, %v5526_v17 }
 0x2cc   : > { %v1815_v9 = vadd.f32 %v5299_v0, %v1779_v24  ;;  %v1483_v56 = vadd.f32 %v1482_v6, %v1370_v61  ;;  %v1711_v45 = vpop.f32.mrf.mxu0  ;;  %v5551_v6 = vpop.f32.mrf.mxu1 }
 0x2ce   : > { %v5537_v52 = vmax.f32 %v1815_v9, 0.0  ;;  %v1596_v30 = vadd.f32 %v1595_v37, %v1483_v56 }
 0x2cf   : > { %3683 = vmatmul.msk.f32.gmra.mxu0 %vm491_vm2, %v7211_v11 }
 0x2d0   : > { %v1709_v22 = vadd.f32 %v1708_v2, %v1596_v30  ;;  %1532 = vmatmul.f32.gmra.mxu2 %v7212_v41  ;;  %1645 = vmatmul.f32.gmra.mxu3 %v7213_v21  ;;  %v1915_v27 = vrot.slane %v5537_v52, 7 }
 0x2d2   : > { %v1780_v24 = vmul.f32 %v5292_v31, %v1709_v22  ;;  %v5549_v61 = vsel %vm395_vm0, %v5526_v17, %v1915_v27 }
 0x2d3   : > { %7220 = vst [vmem:[#allocation61_spill] sm:$0xff] %v5549_v61  ;;  %v1485_v37 = vpop.f32.mrf.mxu2  ;;  %v1598_v9 = vpop.f32.mrf.mxu3  ;;  %2295 = vmatmul.f32.gmra.mxu1 %v5549_v61 }
 0x2d4   : > { %v1816_v2 = vadd.f32 %v5299_v0, %v1780_v24  ;;  %v1486_v56 = vadd.f32 %v1485_v37, %v1373_v13  ;;  %v1714_v30 = vpop.f32.mrf.mxu0  ;;  %v7223_v13 = vld [vmem:[#allocation49_spill] sm:$0xff] }
 0x2d5   : > { %v1376_v24 = vadd.f32 %v7223_v13, %v7222_v62  ;;  %v7224_v13 = vld [vmem:[#allocation36_spill] sm:$0xff] }
 0x2d6   : > { %v5555_v41 = vmax.f32 %v1816_v2, 0.0  ;;  %v1599_v3 = vadd.f32 %v1598_v9, %v1486_v56  ;;  %v5572_v56 = vpop.f32.mrf.mxu1 }
 0x2d7   : > { %3733 = vmatmul.msk.f32.vlgmr.msrb.gmra.mxu0 %vm4343_vm1, %v5316_v33 }
 0x2d8   : > { %v1712_v22 = vadd.f32 %v1711_v45, %v1599_v3  ;;  %2363 = vmatmul.f32.vlgmr.msrb.gmra.mxu2 %v7213_v21  ;;  %2476 = vmatmul.f32.vlgmr.msrb.gmra.mxu3 %v7211_v11  ;;  %v5563_v27 = vrot.slane %v5555_v41, 7 }
 0x2da   : > { %7221 = vst [vmem:[#allocation32_spill] sm:$0xff] %v5563_v27  ;;  %v1781_v37 = vmul.f32 %v5292_v31, %v1712_v22 }
 0x2db   : > { %v1488_v9 = vpop.f32.mrf.mxu2  ;;  %v1601_v2 = vpop.f32.mrf.mxu3  ;;  %3701 = vmatmul.msk.f32.gmra.mxu1 %vm4343_vm1, %v5563_v27 }
 0x2dc   : > { %v1817_v3 = vadd.f32 %v5299_v0, %v1781_v37  ;;  %v1489_v33 = vadd.f32 %v1488_v9, %v1376_v24  ;;  %v1717_v45 = vpop.f32.mrf.mxu0  ;;  %v1379_v37 = vadd.f32 %v7225_v34, %v7224_v13  ;;  %v2159_v13 = vld [vmem:[#allocation7 + $0x228] sm:$0xff] }
 0x2dd   : > { %2696 = vmatpush.msrb.mxu1 %v2159_v13 }
 0x2de   : > { %v5574_v63 = vmax.f32 %v1817_v3, 0.0  ;;  %v1602_v49 = vadd.f32 %v1601_v2, %v1489_v33 }
 0x2df   : > { %2592 = vmatmul.f32.gmra.mxu0 %v5336_v1  ;;  %v5590_v1 = vrot.slane %v5324_v60, 1 }
 0x2e0   : > { %v1715_v62 = vadd.f32 %v1714_v30, %v1602_v49  ;;  %2366 = vmatmul.f32.gmra.mxu2 %v7213_v21  ;;  %3716 = vmatmul.msk.f32.gmra.mxu3 %vm491_vm2, %v7211_v11  ;;  %v1918_v22 = vrot.slane %v5574_v63, 7  ;;  %v1986_v11 = vrot.slane %v5308_v5, 1 }
 0x2e1   : > { %7227 = vst [vmem:[#allocation60_spill] sm:$0xff] %v5590_v1 }
 0x2e2   : > { %v1782_v24 = vmul.f32 %v5292_v31, %v1715_v62  ;;  %v5586_v9 = vsel %vm395_vm0, %v5563_v27, %v1918_v22  ;;  %v5600_v22 = vsel %vm491_vm2, %v1986_v11, %v5590_v1 }
 0x2e3   : > { %7226 = vst [vmem:[#allocation58_spill] sm:$0xff] %v5586_v9  ;;  %v1491_v2 = vpop.f32.mrf.mxu2  ;;  %v1604_v3 = vpop.f32.mrf.mxu3  ;;  %2301 = vmatmul.f32.gmra.mxu1 %v5586_v9 }
 0x2e4   : > { %v1818_v49 = vadd.f32 %v5299_v0, %v1782_v24  ;;  %v1492_v30 = vadd.f32 %v1491_v2, %v1379_v37  ;;  %v1720_v33 = vpop.f32.mrf.mxu0  ;;  %7230 = vst [vmem:[#allocation65_spill] sm:$0xff] %v5600_v22  ;;  %v7232_v2 = vld [vmem:[#allocation64_spill] sm:$0xff] }
 0x2e6   : > { %v5594_v34 = vmax.f32 %v1818_v49, 0.0  ;;  %v1605_v62 = vadd.f32 %v1604_v3, %v1492_v30  ;;  %v1382_v3 = vadd.f32 %v5261_v25, %v7232_v2 }
 0x2e7   : > { %v5596_v21 = vpop.f32.mrf.mxu1  ;;  %3735 = vmatmul.msk.f32.gmra.mxu0 %vm4343_vm1, %v5349_v53 }
 0x2e8   : > { %7228 = vst [vmem:[#allocation35_spill] sm:$0xff] %v5594_v34  ;;  %v1718_v24 = vadd.f32 %v1717_v45, %v1605_v62  ;;  %2369 = vmatmul.f32.gmra.mxu2 %v5308_v5  ;;  %2482 = vmatmul.f32.gmra.mxu3 %v5600_v22  ;;  %v5608_v37 = vrot.slane %v5594_v34, 7 }
 0x2e9   : > { %7229 = vst [vmem:[#allocation59_spill] sm:$0xff] %v5596_v21 }
 0x2ea   : > { %7231 = vst [vmem:[#allocation13_spill] sm:$0xff] %v5608_v37  ;;  %v1783_v49 = vmul.f32 %v5292_v31, %v1718_v24  ;;  %v7234_v24 = vld [vmem:[#allocation41_spill] sm:$0xff] }
 0x2eb   : > { %v1494_v11 = vpop.f32.mrf.mxu2  ;;  %v1607_v30 = vpop.f32.mrf.mxu3  ;;  %3703 = vmatmul.msk.f32.gmra.mxu1 %vm4343_vm1, %v5608_v37  ;;  %v1385_v2 = vadd.f32 %v5276_v15, %v7234_v24  ;;  %v2158_v24 = vld [vmem:[#allocation7 + $0x220] sm:$0xff] }
 0x2ec   : > { %v1819_v45 = vadd.f32 %v5299_v0, %v1783_v49  ;;  %v1495_v62 = vadd.f32 %v1494_v11, %v1382_v3  ;;  %v1723_v13 = vpop.f32.mrf.mxu0  ;;  %2697 = vmatpush.msrb.mxu1 %v2158_v24 }
 0x2ee   : > { %v5617_v53 = vmax.f32 %v1819_v45, 0.0  ;;  %v1608_v22 = vadd.f32 %v1607_v30, %v1495_v62 }
 0x2ef   : > { %2598 = vmatmul.f32.gmra.mxu0 %v5369_v4  ;;  %v1989_v4 = vrot.slane %v5341_v57, 1 }
 0x2f0   : > { %v1721_v21 = vadd.f32 %v1720_v33, %v1608_v22  ;;  %v5620_v34 = vpop.f32.mrf.mxu1  ;;  %2372 = vmatmul.f32.gmra.mxu2 %v5324_v60  ;;  %3717 = vmatmul.msk.f32.gmra.mxu3 %vm491_vm2, %v5590_v1  ;;  %v1921_v25 = vrot.slane %v5617_v53, 7  ;;  %v5635_v22 = vrot.slane %v5359_v8, 1 }
 0x2f1   : > { %7233 = vst [vmem:[#allocation62_spill] sm:$0xff] %v5620_v34 }
 0x2f2   : > { %v1784_v3 = vmul.f32 %v5292_v31, %v1721_v21  ;;  %v5631_v49 = vsel %vm395_vm0, %v5608_v37, %v1921_v25  ;;  %7236 = vst [vmem:[#allocation63_spill] sm:$0xff] %v5635_v22  ;;  %v5643_v25 = vsel %vm491_vm2, %v1989_v4, %v5635_v22 }
 0x2f3   : > { %7235 = vst [vmem:[#allocation14_spill] sm:$0xff] %v5631_v49  ;;  %v1497_v11 = vpop.f32.mrf.mxu2  ;;  %v1610_v33 = vpop.f32.mrf.mxu3  ;;  %2307 = vmatmul.f32.gmra.mxu1 %v5631_v49 }
 0x2f4   : > { %v1820_v30 = vadd.f32 %v5299_v0, %v1784_v3  ;;  %v1498_v45 = vadd.f32 %v1497_v11, %v1385_v2  ;;  %v1726_v62 = vpop.f32.mrf.mxu0  ;;  %7237 = vst [vmem:[#allocation15_spill] sm:$0xff] %v5643_v25  ;;  %v7240_v3 = vld [vmem:[#allocation16_spill] sm:$0xff] }
 0x2f5   : > { %v1388_v11 = vadd.f32 %v5286_v16, %v7240_v3 }
 0x2f6   : > { %v5639_v15 = vmax.f32 %v1820_v30, 0.0  ;;  %v1611_v21 = vadd.f32 %v1610_v33, %v1498_v45 }
 0x2f7   : > { %3737 = vmatmul.msk.f32.gmra.mxu0 %vm4343_vm1, %v5384_v43 }
 0x2f8   : > { %v1724_v1 = vadd.f32 %v1723_v13, %v1611_v21  ;;  %v5648_v34 = vpop.f32.mrf.mxu1  ;;  %2375 = vmatmul.f32.gmra.mxu2 %v5341_v57  ;;  %2488 = vmatmul.f32.gmra.mxu3 %v5643_v25  ;;  %v5653_v2 = vrot.slane %v5639_v15, 7 }
 0x2f9   : > { %7238 = vst [vmem:[#allocation66_spill] sm:$0xff] %v5648_v34 }
 0x2fa   : > { %7239 = vst [vmem:[#allocation67_spill] sm:$0xff] %v5653_v2  ;;  %v1785_v4 = vmul.f32 %v5292_v31, %v1724_v1  ;;  %v7242_v1 = vld [vmem:[#allocation38_spill] sm:$0xff] }
 0x2fb   : > { %v1500_v33 = vpop.f32.mrf.mxu2  ;;  %v1613_v30 = vpop.f32.mrf.mxu3  ;;  %3705 = vmatmul.msk.f32.gmra.mxu1 %vm4343_vm1, %v5653_v2  ;;  %v1391_v3 = vadd.f32 %v5306_v39, %v7242_v1  ;;  %v2157_v1 = vld [vmem:[#allocation7 + $0x218] sm:$0xff] }
 0x2fc   : > { %v1821_v13 = vadd.f32 %v5299_v0, %v1785_v4  ;;  %v1501_v45 = vadd.f32 %v1500_v33, %v1388_v11  ;;  %v1729_v21 = vpop.f32.mrf.mxu0  ;;  %2698 = vmatpush.msrb.mxu1 %v2157_v1 }
 0x2fe   : > { %v5662_v24 = vmax.f32 %v1821_v13, 0.0  ;;  %v1614_v43 = vadd.f32 %v1613_v30, %v1501_v45 }
 0x2ff   : > { %2604 = vmatmul.f32.gmra.mxu0 %v5404_v51  ;;  %v1992_v51 = vrot.slane %v5376_v47, 1 }
 0x300   : > { %v1727_v25 = vadd.f32 %v1726_v62, %v1614_v43  ;;  %v5665_v34 = vpop.f32.mrf.mxu1  ;;  %2378 = vmatmul.f32.gmra.mxu2 %v5359_v8  ;;  %3718 = vmatmul.msk.f32.gmra.mxu3 %vm491_vm2, %v5635_v22  ;;  %v1924_v16 = vrot.slane %v5662_v24, 7  ;;  %v5680_v62 = vrot.slane %v5394_v28, 1 }
 0x301   : > { %7241 = vst [vmem:[#allocation25_spill] sm:$0xff] %v5665_v34 }
 0x302   : > { %v1786_v11 = vmul.f32 %v5292_v31, %v1727_v25  ;;  %v5676_v4 = vsel %vm395_vm0, %v5653_v2, %v1924_v16  ;;  %7244 = vst [vmem:[#allocation40_spill] sm:$0xff] %v5680_v62  ;;  %v5688_v16 = vsel %vm491_vm2, %v1992_v51, %v5680_v62 }
 0x303   : > { %7243 = vst [vmem:[#allocation24_spill] sm:$0xff] %v5676_v4  ;;  %v1503_v33 = vpop.f32.mrf.mxu2  ;;  %v1616_v43 = vpop.f32.mrf.mxu3  ;;  %2313 = vmatmul.f32.gmra.mxu1 %v5676_v4 }
 0x304   : > { %v1822_v30 = vadd.f32 %v5299_v0, %v1786_v11  ;;  %v1504_v13 = vadd.f32 %v1503_v33, %v1391_v3  ;;  %v1732_v45 = vpop.f32.mrf.mxu0  ;;  %7245 = vst [vmem:[#allocation28_spill] sm:$0xff] %v5688_v16  ;;  %v7248_v11 = vld [vmem:[#allocation17_spill] sm:$0xff] }
 0x305   : > { %v1394_v33 = vadd.f32 %v5328_v55, %v7248_v11 }
 0x306   : > { %v5684_v39 = vmax.f32 %v1822_v30, 0.0  ;;  %v1617_v25 = vadd.f32 %v1616_v43, %v1504_v13 }
 0x307   : > { %3739 = vmatmul.msk.f32.gmra.mxu0 %vm4343_vm1, %v5419_v48 }
 0x308   : > { %v1730_v22 = vadd.f32 %v1729_v21, %v1617_v25  ;;  %v5693_v34 = vpop.f32.mrf.mxu1  ;;  %2381 = vmatmul.f32.gmra.mxu2 %v5376_v47  ;;  %2494 = vmatmul.f32.gmra.mxu3 %v5688_v16  ;;  %v5698_v3 = vrot.slane %v5684_v39, 7 }
 0x309   : > { %7246 = vst [vmem:[#allocation30_spill] sm:$0xff] %v5693_v34 }
 0x30a   : > { %7247 = vst [vmem:[#allocation27_spill] sm:$0xff] %v5698_v3  ;;  %v1787_v51 = vmul.f32 %v5292_v31, %v1730_v22  ;;  %v7250_v22 = vld [vmem:[#allocation45_spill] sm:$0xff] }
 0x30b   : > { %v1506_v43 = vpop.f32.mrf.mxu2  ;;  %v1619_v30 = vpop.f32.mrf.mxu3  ;;  %3707 = vmatmul.msk.f32.gmra.mxu1 %vm4343_vm1, %v5698_v3  ;;  %v1397_v11 = vadd.f32 %v5351_v58, %v7250_v22  ;;  %v2156_v22 = vld [vmem:[#allocation7 + $0x210] sm:$0xff] }
 0x30c   : > { %v1823_v21 = vadd.f32 %v5299_v0, %v1787_v51  ;;  %v1507_v13 = vadd.f32 %v1506_v43, %v1394_v33  ;;  %v1735_v25 = vpop.f32.mrf.mxu0  ;;  %2699 = vmatpush.msrb.mxu1 %v2156_v22 }
 0x30e   : > { %v5707_v1 = vmax.f32 %v1823_v21, 0.0  ;;  %v1620_v48 = vadd.f32 %v1619_v30, %v1507_v13 }
 0x30f   : > { %2610 = vmatmul.f32.gmra.mxu0 %v5442_v38  ;;  %v1995_v38 = vrot.slane %v5409_v29, 1 }
 0x310   : > { %v1733_v16 = vadd.f32 %v1732_v45, %v1620_v48  ;;  %v5710_v34 = vpop.f32.mrf.mxu1  ;;  %2384 = vmatmul.f32.gmra.mxu2 %v5394_v28  ;;  %3719 = vmatmul.msk.f32.gmra.mxu3 %vm491_vm2, %v5680_v62  ;;  %v1927_v55 = vrot.slane %v5707_v1, 7  ;;  %v5725_v45 = vrot.slane %v5428_v44, 1 }
 0x311   : > { %7249 = vst [vmem:[#allocation39_spill] sm:$0xff] %v5710_v34 }
 0x312   : > { %v1788_v33 = vmul.f32 %v5292_v31, %v1733_v16  ;;  %v5721_v51 = vsel %vm395_vm0, %v5698_v3, %v1927_v55  ;;  %7252 = vst [vmem:[#allocation18_spill] sm:$0xff] %v5725_v45  ;;  %v5733_v55 = vsel %vm491_vm2, %v1995_v38, %v5725_v45 }
 0x313   : > { %7251 = vst [vmem:[#allocation31_spill] sm:$0xff] %v5721_v51  ;;  %v1509_v43 = vpop.f32.mrf.mxu2  ;;  %v1622_v48 = vpop.f32.mrf.mxu3  ;;  %2319 = vmatmul.f32.gmra.mxu1 %v5721_v51 }
 0x314   : > { %v1824_v30 = vadd.f32 %v5299_v0, %v1788_v33  ;;  %v1510_v21 = vadd.f32 %v1509_v43, %v1397_v11  ;;  %v1738_v13 = vpop.f32.mrf.mxu0  ;;  %7253 = vst [vmem:[#allocation34_spill] sm:$0xff] %v5733_v55  ;;  %v7256_v33 = vld [vmem:[#allocation42_spill] sm:$0xff] }
 0x315   : > { %v1400_v43 = vadd.f32 %v5372_v26, %v7256_v33 }
 0x316   : > { %v5729_v58 = vmax.f32 %v1824_v30, 0.0  ;;  %v1623_v16 = vadd.f32 %v1622_v48, %v1510_v21 }
 0x317   : > { %3741 = vmatmul.msk.f32.gmra.mxu0 %vm4343_vm1, %v5454_v12 }
 0x318   : > { %v1736_v62 = vadd.f32 %v1735_v25, %v1623_v16  ;;  %v5738_v34 = vpop.f32.mrf.mxu1  ;;  %2387 = vmatmul.f32.gmra.mxu2 %v5409_v29  ;;  %2500 = vmatmul.f32.gmra.mxu3 %v5733_v55  ;;  %v5743_v11 = vrot.slane %v5729_v58, 7 }
 0x319   : > { %7254 = vst [vmem:[#allocation19_spill] sm:$0xff] %v5738_v34 }
 0x31a   : > { %7255 = vst [vmem:[#allocation33_spill] sm:$0xff] %v5743_v11  ;;  %v1789_v38 = vmul.f32 %v5292_v31, %v1736_v62  ;;  %v7257_v62 = vld [vmem:[#allocation44_spill] sm:$0xff] }
 0x31b   : > { %v1512_v48 = vpop.f32.mrf.mxu2  ;;  %v1625_v30 = vpop.f32.mrf.mxu3  ;;  %3709 = vmatmul.msk.f32.gmra.mxu1 %vm4343_vm1, %v5743_v11  ;;  %v1403_v33 = vadd.f32 %v5392_v36, %v7257_v62 }
 0x31c   : > { %v1825_v25 = vadd.f32 %v5299_v0, %v1789_v38  ;;  %v1513_v21 = vadd.f32 %v1512_v48, %v1400_v43  ;;  %v1741_v16 = vpop.f32.mrf.mxu0 }
 0x31e   : > { %v5752_v22 = vmax.f32 %v1825_v25, 0.0  ;;  %v1626_v12 = vadd.f32 %v1625_v30, %v1513_v21 }
 0x31f   : > { %2616 = vmatmul.f32.gmra.mxu0 %v5477_v32  ;;  %v1998_v32 = vrot.slane %v5446_v18, 1 }
 0x320   : > { %v1739_v55 = vadd.f32 %v1738_v13, %v1626_v12  ;;  %v5755_v34 = vpop.f32.mrf.mxu1  ;;  %2390 = vmatmul.f32.gmra.mxu2 %v5428_v44  ;;  %3720 = vmatmul.msk.f32.gmra.mxu3 %vm491_vm2, %v5725_v45  ;;  %v1930_v26 = vrot.slane %v5752_v22, 7  ;;  %v5770_v13 = vrot.slane %v5465_v46, 1 }
 0x322   : > { %v1790_v43 = vmul.f32 %v5292_v31, %v1739_v55  ;;  %v5766_v38 = vsel %vm395_vm0, %v5743_v11, %v1930_v26  ;;  %7259 = vst [vmem:[#allocation36_spill] sm:$0xff] %v5770_v13  ;;  %v2155_v55 = vld [vmem:[#allocation7 + $0x208] sm:$0xff]  ;;  %v5778_v26 = vsel %vm491_vm2, %v1998_v32, %v5770_v13  ;;  %v5795_v32 = vld [vmem:[%s6893_s2] ss:$0 sm:$0xff] }
 0x323   : > { %7258 = vst [vmem:[#allocation49_spill] sm:$0xff] %v5766_v38  ;;  %v1515_v48 = vpop.f32.mrf.mxu2  ;;  %v1628_v12 = vpop.f32.mrf.mxu3  ;;  %2325 = vmatmul.f32.gmra.mxu1 %v5766_v38 }
 0x324   : > { %v1826_v30 = vadd.f32 %v5299_v0, %v1790_v43  ;;  %v1516_v25 = vadd.f32 %v1515_v48, %v1403_v33  ;;  %v1744_v21 = vpop.f32.mrf.mxu0  ;;  %7261 = vst [vmem:[#allocation64_spill] sm:$0xff] %v5778_v26  ;;  %2700 = vmatpush.msrb.mxu1 %v2155_v55  ;;  %v7264_v33 = vld [vmem:[#allocation43_spill] sm:$0xff] }
 0x325   : > { %v1406_v43 = vadd.f32 %v5412_v19, %v7264_v33 }
 0x326   : > { %v5774_v36 = vmax.f32 %v1826_v30, 0.0  ;;  %v1629_v31 = vadd.f32 %v1628_v12, %v1516_v25  ;;  %v5804_v30 = vld [vmem:[%s6894_s3] ss:$0 sm:$0xff] }
 0x327   : > { %3743 = vmatmul.msk.f32.gmra.mxu0 %vm4343_vm1, %v5491_v20 }
 0x328   : > { %7260 = vst [vmem:[#allocation46_spill] sm:$0xff] %v5774_v36  ;;  %v1742_v62 = vadd.f32 %v1741_v16, %v1629_v31  ;;  %v5783_v45 = vpop.f32.mrf.mxu1  ;;  %2393 = vmatmul.f32.gmra.mxu2 %v5446_v18  ;;  %2506 = vmatmul.f32.gmra.mxu3 %v5778_v26  ;;  %v5788_v0 = vrot.slane %v5774_v36, 7 }
 0x329   : > { %7262 = vst [vmem:[#allocation41_spill] sm:$0xff] %v5783_v45  ;;  %v7266_v45 = vld [vmem:[#allocation20_spill] sm:$0xff] }
 0x32a   : > { %7263 = vst [vmem:[#allocation16_spill] sm:$0xff] %v5788_v0  ;;  %v1791_v48 = vmul.f32 %v5795_v32, %v1742_v62 }
 0x32b   : > { %v1518_v16 = vpop.f32.mrf.mxu2  ;;  %v1631_v12 = vpop.f32.mrf.mxu3  ;;  %3711 = vmatmul.msk.f32.gmra.mxu1 %vm4343_vm1, %v5788_v0 }
 0x32c   : > { %v1827_v19 = vadd.f32 %v5804_v30, %v1791_v48  ;;  %v1519_v25 = vadd.f32 %v1518_v16, %v1406_v43  ;;  %v1747_v31 = vpop.f32.mrf.mxu0  ;;  %v1409_v48 = vadd.f32 %v5437_v59, %v7266_v45 }
 0x32e   : > { %v5807_v55 = vmax.f32 %v1827_v19, 0.0  ;;  %v1632_v33 = vadd.f32 %v1631_v12, %v1519_v25  ;;  %v5825_v19 = vrot.slane %v5500_v50, 1 }
 0x32f   : > { %2622 = vmatmul.f32.gmra.mxu0 %v5514_v14 }
 0x330   : > { %v1745_v62 = vadd.f32 %v1744_v21, %v1632_v33  ;;  %v5810_v20 = vpop.f32.mrf.mxu1  ;;  %2396 = vmatmul.f32.gmra.mxu2 %v5465_v46  ;;  %3721 = vmatmul.msk.f32.gmra.mxu3 %vm491_vm2, %v5770_v13  ;;  %v1933_v26 = vrot.slane %v5807_v55, 7  ;;  %7268 = vst [vmem:[#allocation45_spill] sm:$0xff] %v5825_v19  ;;  %v2001_v13 = vrot.slane %v5483_v7, 1 }
 0x331   : > { %7265 = vst [vmem:[#allocation38_spill] sm:$0xff] %v5810_v20  ;;  %v2185_v20 = vld [vmem:[#allocation7 + $0x2f8] sm:$0xff] }
 0x332   : > { %v1792_v43 = vmul.f32 %v5795_v32, %v1745_v62  ;;  %v5821_v16 = vsel %vm395_vm0, %v5788_v0, %v1933_v26  ;;  %v2154_v62 = vld [vmem:[#allocation7 + $0x200] sm:$0xff]  ;;  %v2201_v26 = vld [vmem:[#allocation7 + $0x378] sm:$0xff]  ;;  %v5833_v36 = vsel %vm491_vm2, %v2001_v13, %v5825_v19  ;;  %2799 = vmatpush.msra.mxu2 %v2185_v20  ;;  %v1412_v13 = vadd.f32 %v5462_v42, %v5257_v10 }
 0x333   : > { %7267 = vst [vmem:[#allocation17_spill] sm:$0xff] %v5821_v16  ;;  %v1521_v12 = vpop.f32.mrf.mxu2  ;;  %v1634_v21 = vpop.f32.mrf.mxu3  ;;  %2331 = vmatmul.f32.gmra.mxu1 %v5821_v16  ;;  %2912 = vmatpush.msra.mxu3 %v2201_v26  ;;  %v2217_v20 = vld [vmem:[#allocation7 + $0x3f8] sm:$0xff] }
 0x334   : > { %v1828_v25 = vadd.f32 %v5804_v30, %v1792_v43  ;;  %v1522_v33 = vadd.f32 %v1521_v12, %v1409_v48  ;;  %v1750_v14 = vpop.f32.mrf.mxu0  ;;  %7269 = vst [vmem:[#allocation42_spill] sm:$0xff] %v5833_v36  ;;  %2701 = vmatpush.msrb.mxu1 %v2154_v62  ;;  %v2233_v26 = vld [vmem:[#allocation7 + $0x478] sm:$0xff]  ;;  %3025 = vmatpush.msra.mxu0 %v2217_v20 }
 0x336   : > { %v5829_v59 = vmax.f32 %v1828_v25, 0.0  ;;  %v1635_v45 = vadd.f32 %v1634_v21, %v1522_v33  ;;  %3138 = vmatpush.msra.mxu1 %v2233_v26 }
 0x337   : > { %3745 = vmatmul.msk.f32.gmra.mxu0 %vm4343_vm1, %v5526_v17 }
 0x338   : > { %v1748_v43 = vadd.f32 %v1747_v31, %v1635_v45  ;;  %v5838_v48 = vpop.f32.mrf.mxu1  ;;  %2399 = vmatmul.f32.gmra.mxu2 %v5483_v7  ;;  %2512 = vmatmul.f32.gmra.mxu3 %v5833_v36  ;;  %v5843_v12 = vrot.slane %v5829_v59, 7 }
 0x339   : > { %7270 = vst [vmem:[#allocation44_spill] sm:$0xff] %v5838_v48  ;;  %v2184_v48 = vld [vmem:[#allocation7 + $0x2f0] sm:$0xff] }
 0x33a   : > { %7271 = vst [vmem:[#allocation43_spill] sm:$0xff] %v5843_v12  ;;  %v1793_v21 = vmul.f32 %v5795_v32, %v1748_v43  ;;  %2800 = vmatpush.msra.mxu2 %v2184_v48 }
 0x33b   : > { %v1524_v25 = vpop.f32.mrf.mxu2  ;;  %v1637_v33 = vpop.f32.mrf.mxu3  ;;  %3713 = vmatmul.msk.f32.gmra.mxu1 %vm4343_vm1, %v5843_v12 }
 0x33c   : > { %v1829_v31 = vadd.f32 %v5804_v30, %v1793_v21  ;;  %v1525_v45 = vadd.f32 %v1524_v25, %v1412_v13  ;;  %v1753_v62 = vpop.f32.mrf.mxu0  ;;  %v2200_v13 = vld [vmem:[#allocation7 + $0x370] sm:$0xff]  ;;  %v1415_v21 = vadd.f32 %v5481_v23, %v5267_v54  ;;  %v2004_v54 = vrot.slane %v5518_v40, 1 }
 0x33d   : > { %2913 = vmatpush.msra.mxu3 %v2200_v13 }
 0x33e   : > { %v5852_v17 = vmax.f32 %v1829_v31, 0.0  ;;  %v1638_v36 = vadd.f32 %v1637_v33, %v1525_v45  ;;  %v5870_v31 = vrot.slane %v5537_v52, 1 }
 0x33f   : > { %2628 = vmatmul.f32.gmra.mxu0 %v5549_v61 }
 0x340   : > { %v1751_v10 = vadd.f32 %v1750_v14, %v1638_v36  ;;  %v5855_v42 = vpop.f32.mrf.mxu1  ;;  %2402 = vmatmul.f32.gmra.mxu2 %v5500_v50  ;;  %3722 = vmatmul.msk.f32.gmra.mxu3 %vm491_vm2, %v5825_v19  ;;  %v1936_v43 = vrot.slane %v5852_v17, 7  ;;  %7273 = vst [vmem:[#allocation68_spill] sm:$0xff] %v5870_v31 }
 0x341   : > { %7272 = vst [vmem:[#allocation20_spill] sm:$0xff] %v5855_v42  ;;  %v2231_v42 = vld [vmem:[#allocation7 + $0x468] sm:$0xff] }
 0x342   : > { %v1794_v25 = vmul.f32 %v5795_v32, %v1751_v10  ;;  %v5866_v14 = vsel %vm395_vm0, %v5843_v12, %v1936_v43  ;;  %v5880_v10 = vsel %vm491_vm2, %v2004_v54, %v5870_v31 }
 0x343   : > { %v1527_v36 = vpop.f32.mrf.mxu2  ;;  %v1640_v33 = vpop.f32.mrf.mxu3  ;;  %2337 = vmatmul.f32.gmra.mxu1 %v5866_v14  ;;  %7275 = vst [vmem:[#allocation70_spill] sm:$0xff] %v5880_v10 }
 0x344   : > { %v1830_v45 = vadd.f32 %v5804_v30, %v1794_v25  ;;  %v1528_v48 = vadd.f32 %v1527_v36, %v1415_v21  ;;  %v5873_v20 = vpop.f32.mrf.mxu0  ;;  %v2216_v25 = vld [vmem:[#allocation7 + $0x3f0] sm:$0xff] }
 0x345   : > { %3026 = vmatpush.msra.mxu0 %v2216_v25 }
 0x346   : > { %v5876_v23 = vmax.f32 %v1830_v45, 0.0  ;;  %v1641_v26 = vadd.f32 %v1640_v33, %v1528_v48 }
 0x347   : > { %3747 = vmatmul.msk.f32.gmra.mxu0 %vm4343_vm1, %v5563_v27  ;;  %v2183_v27 = vld [vmem:[#allocation7 + $0x2e8] sm:$0xff] }
 0x348   : > { %7274 = vst [vmem:[#allocation69_spill] sm:$0xff] %v5876_v23  ;;  %v1754_v43 = vadd.f32 %v1753_v62, %v1641_v26  ;;  %v5885_v13 = vpop.f32.mrf.mxu1  ;;  %2405 = vmatmul.f32.gmra.mxu2 %v5518_v40  ;;  %2518 = vmatmul.f32.gmra.mxu3 %v5880_v10  ;;  %v5890_v21 = vrot.slane %v5876_v23, 7  ;;  %v2232_v26 = vld [vmem:[#allocation7 + $0x470] sm:$0xff]  ;;  %v2199_v10 = vld [vmem:[#allocation7 + $0x368] sm:$0xff] }
 0x349   : > { %7276 = vst [vmem:[#allocation71_spill] sm:$0xff] %v5885_v13  ;;  %3139 = vmatpush.msra.mxu1 %v2232_v26  ;;  %2801 = vmatpush.msra.mxu2 %v2183_v27  ;;  %v5922_v26 = vrot.slane %v5574_v63, 1 }
 0x34a   : > { %v1795_v36 = vmul.f32 %v5795_v32, %v1754_v43  ;;  %2914 = vmatpush.msra.mxu3 %v2199_v10 }
 0x34b   : > { %v5893_v33 = vpop.f32.mrf.mxu2  ;;  %v5895_v45 = vpop.f32.mrf.mxu3  ;;  %3715 = vmatmul.msk.f32.gmra.mxu1 %vm4343_vm1, %v5890_v21  ;;  %7279 = vst [vmem:[#allocation74_spill] sm:$0xff] %v5922_v26 }
 0x34c   : > { %v1831_v62 = vadd.f32 %v5804_v30, %v1795_v36  ;;  %v5901_v48 = vpop.f32.mrf.mxu0  ;;  %3140 = vmatpush.msra.mxu1 %v2231_v42 }
 0x34e   : > { %v5903_v54 = vmax.f32 %v1831_v62, 0.0 }
 0x34f   : > { %2634 = vmatmul.f32.gmra.mxu0 %v5586_v9 }
 0x350   : > { %7277 = vst [vmem:[#allocation72_spill] sm:$0xff] %v5903_v54  ;;  %v5906_v43 = vpop.f32.mrf.mxu1  ;;  %2408 = vmatmul.f32.gmra.mxu2 %v5537_v52  ;;  %3723 = vmatmul.msk.f32.gmra.mxu3 %vm491_vm2, %v5870_v31  ;;  %v1939_v25 = vrot.slane %v5903_v54, 7  ;;  %v2007_v31 = vrot.slane %v5555_v41, 1  ;;  %v2182_v54 = vld [vmem:[#allocation7 + $0x2e0] sm:$0xff] }
 0x351   : > { %7278 = vst [vmem:[#allocation73_spill] sm:$0xff] %v5906_v43  ;;  %2802 = vmatpush.msra.mxu2 %v2182_v54 }
 0x352   : > { %v5914_v36 = vsel %vm395_vm0, %v5890_v21, %v1939_v25  ;;  %v5927_v27 = vsel %vm491_vm2, %v2007_v31, %v5922_v26  ;;  %v2215_v25 = vld [vmem:[#allocation7 + $0x3e8] sm:$0xff] }
 0x353   : > { %v5916_v62 = vpop.f32.mrf.mxu2  ;;  %v5918_v9 = vpop.f32.mrf.mxu3  ;;  %2343 = vmatmul.f32.gmra.mxu1 %v5914_v36  ;;  %7280 = vst [vmem:[#allocation75_spill] sm:$0xff] %v5927_v27  ;;  %3027 = vmatpush.msra.mxu0 %v2215_v25  ;;  %v2198_v25 = vld [vmem:[#allocation7 + $0x360] sm:$0xff] }
 0x354   : > { %v2590_v61 = vpop.f32.mrf.mxu0  ;;  %2915 = vmatpush.msra.mxu3 %v2198_v25 }
 0x357   : > { %3749 = vmatmul.msk.f32.gmra.mxu0 %vm4343_vm1, %v5608_v37 }
 0x358   : > { %v5932_v10 = vpop.f32.mrf.mxu1  ;;  %2411 = vmatmul.f32.gmra.mxu2 %v5555_v41  ;;  %2524 = vmatmul.f32.gmra.mxu3 %v5927_v27 }
 0x35b   : > { %v2364_v19 = vpop.f32.mrf.mxu2  ;;  %v2477_v43 = vpop.f32.mrf.mxu3  ;;  %2702 = vmatmul.f32.vlgmr.msrb.gmra.mxu1 %v5308_v5 }
 0x35c   : > { %v2365_v13 = vadd.f32 %v2364_v19, %v5551_v6  ;;  %v2593_v31 = vpop.f32.mrf.mxu0  ;;  %v5948_v19 = vrot.slane %v5617_v53, 1 }
 0x35e   : > { %v2478_v23 = vadd.f32 %v2477_v43, %v2365_v13  ;;  %7283 = vst [vmem:[#allocation78_spill] sm:$0xff] %v5948_v19  ;;  %v7284_v43 = vld [vmem:[#allocation35_spill] sm:$0xff] }
 0x35f   : > { %2640 = vmatmul.f32.gmra.mxu0 %v5631_v49  ;;  %v2010_v49 = vrot.slane %v7284_v43, 1 }
 0x360   : > { %v5939_v37 = vpop.f32.mrf.mxu1  ;;  %2414 = vmatmul.f32.gmra.mxu2 %v5574_v63  ;;  %3724 = vmatmul.msk.f32.gmra.mxu3 %vm491_vm2, %v5922_v26  ;;  %v5944_v27 = vadd.f32 %v2590_v61, %v2478_v23 }
 0x361   : > { %7281 = vst [vmem:[#allocation76_spill] sm:$0xff] %v5939_v37  ;;  %v5954_v26 = vsel %vm491_vm2, %v2010_v49, %v5948_v19  ;;  %v7287_v49 = vld [vmem:[#allocation59_spill] sm:$0xff] }
 0x362   : > { %7282 = vst [vmem:[#allocation77_spill] sm:$0xff] %v5944_v27  ;;  %v2181_v27 = vld [vmem:[#allocation7 + $0x2d8] sm:$0xff] }
 0x363   : > { %v2367_v5 = vpop.f32.mrf.mxu2  ;;  %v2480_v6 = vpop.f32.mrf.mxu3  ;;  %2705 = vmatmul.f32.gmra.mxu1 %v5324_v60  ;;  %7285 = vst [vmem:[#allocation35_spill] sm:$0xff] %v5954_v26  ;;  %v2214_v60 = vld [vmem:[#allocation7 + $0x3e0] sm:$0xff]  ;;  %2803 = vmatpush.msra.mxu2 %v2181_v27 }
 0x364   : > { %v2368_v42 = vadd.f32 %v2367_v5, %v5572_v56  ;;  %v2596_v13 = vpop.f32.mrf.mxu0  ;;  %3028 = vmatpush.msra.mxu0 %v2214_v60 }
 0x366   : > { %v2481_v37 = vadd.f32 %v2480_v6, %v2368_v42  ;;  %v2230_v42 = vld [vmem:[#allocation7 + $0x460] sm:$0xff] }
 0x367   : > { %3751 = vmatmul.msk.f32.gmra.mxu0 %vm4343_vm1, %v5653_v2  ;;  %3141 = vmatpush.msra.mxu1 %v2230_v42 }
 0x368   : > { %v5959_v61 = vpop.f32.mrf.mxu1  ;;  %2417 = vmatmul.f32.gmra.mxu2 %v7284_v43  ;;  %2530 = vmatmul.f32.gmra.mxu3 %v5954_v26  ;;  %v5963_v56 = vadd.f32 %v2593_v31, %v2481_v37  ;;  %v2197_v37 = vld [vmem:[#allocation7 + $0x358] sm:$0xff] }
 0x369   : > { %2916 = vmatpush.msra.mxu3 %v2197_v37 }
 0x36a   : > { %7286 = vst [vmem:[#allocation79_spill] sm:$0xff] %v5963_v56  ;;  %v2013_v56 = vrot.slane %v5639_v15, 1 }
 0x36b   : > { %v2370_v23 = vpop.f32.mrf.mxu2  ;;  %v2483_v54 = vpop.f32.mrf.mxu3  ;;  %2708 = vmatmul.f32.gmra.mxu1 %v5341_v57 }
 0x36c   : > { %v2371_v25 = vadd.f32 %v2370_v23, %v7287_v49  ;;  %v2599_v5 = vpop.f32.mrf.mxu0  ;;  %v7290_v49 = vld [vmem:[#allocation62_spill] sm:$0xff] }
 0x36e   : > { %v2484_v6 = vadd.f32 %v2483_v54, %v2371_v25  ;;  %v5977_v54 = vrot.slane %v5662_v24, 1 }
 0x36f   : > { %2646 = vmatmul.f32.gmra.mxu0 %v5676_v4 }
 0x370   : > { %v5968_v2 = vpop.f32.mrf.mxu1  ;;  %2420 = vmatmul.f32.gmra.mxu2 %v5617_v53  ;;  %3725 = vmatmul.msk.f32.gmra.mxu3 %vm491_vm2, %v5948_v19  ;;  %v5973_v31 = vadd.f32 %v2596_v13, %v2484_v6  ;;  %7289 = vst [vmem:[#allocation80_spill] sm:$0xff] %v5977_v54  ;;  %v5983_v19 = vsel %vm491_vm2, %v2013_v56, %v5977_v54  ;;  %v2213_v13 = vld [vmem:[#allocation7 + $0x3d8] sm:$0xff]  ;;  %v7293_v56 = vld [vmem:[#allocation66_spill] sm:$0xff] }
 0x371   : > { %7291 = vst [vmem:[#allocation62_spill] sm:$0xff] %v5983_v19  ;;  %3029 = vmatpush.msra.mxu0 %v2213_v13 }
 0x372   : > { %7288 = vst [vmem:[#allocation59_spill] sm:$0xff] %v5973_v31  ;;  %v2229_v31 = vld [vmem:[#allocation7 + $0x458] sm:$0xff] }
 0x373   : > { %v2373_v60 = vpop.f32.mrf.mxu2  ;;  %v2486_v23 = vpop.f32.mrf.mxu3  ;;  %2711 = vmatmul.f32.gmra.mxu1 %v5359_v8 }
 0x374   : > { %v2374_v25 = vadd.f32 %v2373_v60, %v7290_v49  ;;  %v2602_v42 = vpop.f32.mrf.mxu0  ;;  %3142 = vmatpush.msra.mxu1 %v2229_v31  ;;  %v7296_v31 = vld [vmem:[#allocation25_spill] sm:$0xff] }
 0x376   : > { %v2487_v4 = vadd.f32 %v2486_v23, %v2374_v25 }
 0x377   : > { %3753 = vmatmul.msk.f32.gmra.mxu0 %vm4343_vm1, %v5698_v3  ;;  %v2180_v3 = vld [vmem:[#allocation7 + $0x2d0] sm:$0xff] }
 0x378   : > { %v5988_v27 = vpop.f32.mrf.mxu1  ;;  %2423 = vmatmul.f32.gmra.mxu2 %v5639_v15  ;;  %2536 = vmatmul.f32.gmra.mxu3 %v5983_v19  ;;  %v5992_v6 = vadd.f32 %v2599_v5, %v2487_v4  ;;  %v2196_v4 = vld [vmem:[#allocation7 + $0x350] sm:$0xff] }
 0x379   : > { %2804 = vmatpush.msra.mxu2 %v2180_v3  ;;  %2917 = vmatpush.msra.mxu3 %v2196_v4 }
 0x37a   : > { %7292 = vst [vmem:[#allocation81_spill] sm:$0xff] %v5992_v6  ;;  %v2016_v6 = vrot.slane %v5684_v39, 1 }
 0x37b   : > { %v2376_v37 = vpop.f32.mrf.mxu2  ;;  %v2489_v60 = vpop.f32.mrf.mxu3  ;;  %2714 = vmatmul.f32.gmra.mxu1 %v5376_v47 }
 0x37c   : > { %v2377_v23 = vadd.f32 %v2376_v37, %v7293_v56  ;;  %v2605_v49 = vpop.f32.mrf.mxu0 }
 0x37e   : > { %v2490_v25 = vadd.f32 %v2489_v60, %v2377_v23  ;;  %v6006_v60 = vrot.slane %v5707_v1, 1 }
 0x37f   : > { %2652 = vmatmul.f32.gmra.mxu0 %v5721_v51 }
 0x380   : > { %v5997_v26 = vpop.f32.mrf.mxu1  ;;  %2426 = vmatmul.f32.gmra.mxu2 %v5662_v24  ;;  %3726 = vmatmul.msk.f32.gmra.mxu3 %vm491_vm2, %v5977_v54  ;;  %v6002_v5 = vadd.f32 %v2602_v42, %v2490_v25  ;;  %7295 = vst [vmem:[#allocation82_spill] sm:$0xff] %v6006_v60  ;;  %v6012_v54 = vsel %vm491_vm2, %v2016_v6, %v6006_v60  ;;  %v2212_v42 = vld [vmem:[#allocation7 + $0x3d0] sm:$0xff] }
 0x381   : > { %7297 = vst [vmem:[#allocation25_spill] sm:$0xff] %v6012_v54  ;;  %3030 = vmatpush.msra.mxu0 %v2212_v42  ;;  %v7299_v6 = vld [vmem:[#allocation30_spill] sm:$0xff] }
 0x382   : > { %7294 = vst [vmem:[#allocation66_spill] sm:$0xff] %v6002_v5  ;;  %v2228_v5 = vld [vmem:[#allocation7 + $0x450] sm:$0xff] }
 0x383   : > { %v2379_v13 = vpop.f32.mrf.mxu2  ;;  %v2492_v37 = vpop.f32.mrf.mxu3  ;;  %2717 = vmatmul.f32.gmra.mxu1 %v5394_v28 }
 0x384   : > { %v2380_v56 = vadd.f32 %v2379_v13, %v7296_v31  ;;  %v2608_v23 = vpop.f32.mrf.mxu0  ;;  %3143 = vmatpush.msra.mxu1 %v2228_v5  ;;  %v7302_v5 = vld [vmem:[#allocation39_spill] sm:$0xff] }
 0x386   : > { %v2493_v51 = vadd.f32 %v2492_v37, %v2380_v56 }
 0x387   : > { %3755 = vmatmul.msk.f32.gmra.mxu0 %vm4343_vm1, %v5743_v11  ;;  %v2179_v11 = vld [vmem:[#allocation7 + $0x2c8] sm:$0xff] }
 0x388   : > { %v6017_v3 = vpop.f32.mrf.mxu1  ;;  %2429 = vmatmul.f32.gmra.mxu2 %v5684_v39  ;;  %2542 = vmatmul.f32.gmra.mxu3 %v6012_v54  ;;  %v6021_v25 = vadd.f32 %v2605_v49, %v2493_v51  ;;  %v2195_v51 = vld [vmem:[#allocation7 + $0x348] sm:$0xff] }
 0x389   : > { %2805 = vmatpush.msra.mxu2 %v2179_v11  ;;  %2918 = vmatpush.msra.mxu3 %v2195_v51 }
 0x38a   : > { %7298 = vst [vmem:[#allocation83_spill] sm:$0xff] %v6021_v25  ;;  %v2019_v25 = vrot.slane %v5729_v58, 1 }
 0x38b   : > { %v2382_v4 = vpop.f32.mrf.mxu2  ;;  %v2495_v13 = vpop.f32.mrf.mxu3  ;;  %2720 = vmatmul.f32.gmra.mxu1 %v5409_v29 }
 0x38c   : > { %v2383_v37 = vadd.f32 %v2382_v4, %v7299_v6  ;;  %v2611_v31 = vpop.f32.mrf.mxu0 }
 0x38e   : > { %v2496_v56 = vadd.f32 %v2495_v13, %v2383_v37  ;;  %v6035_v13 = vrot.slane %v5752_v22, 1 }
 0x38f   : > { %2658 = vmatmul.f32.gmra.mxu0 %v5766_v38 }
 0x390   : > { %v6026_v19 = vpop.f32.mrf.mxu1  ;;  %2432 = vmatmul.f32.gmra.mxu2 %v5707_v1  ;;  %3727 = vmatmul.msk.f32.gmra.mxu3 %vm491_vm2, %v6006_v60  ;;  %v6031_v49 = vadd.f32 %v2608_v23, %v2496_v56  ;;  %7301 = vst [vmem:[#allocation84_spill] sm:$0xff] %v6035_v13  ;;  %v6041_v60 = vsel %vm491_vm2, %v2019_v25, %v6035_v13  ;;  %v2211_v23 = vld [vmem:[#allocation7 + $0x3c8] sm:$0xff]  ;;  %v7306_v25 = vld [vmem:[#allocation19_spill] sm:$0xff] }
 0x391   : > { %7303 = vst [vmem:[#allocation39_spill] sm:$0xff] %v6041_v60  ;;  %3031 = vmatpush.msra.mxu0 %v2211_v23 }
 0x392   : > { %7300 = vst [vmem:[#allocation30_spill] sm:$0xff] %v6031_v49  ;;  %v2227_v49 = vld [vmem:[#allocation7 + $0x448] sm:$0xff] }
 0x393   : > { %v2385_v42 = vpop.f32.mrf.mxu2  ;;  %v2498_v4 = vpop.f32.mrf.mxu3  ;;  %2723 = vmatmul.f32.gmra.mxu1 %v5428_v44 }
 0x394   : > { %v2386_v6 = vadd.f32 %v2385_v42, %v7302_v5  ;;  %v2614_v37 = vpop.f32.mrf.mxu0  ;;  %3144 = vmatpush.msra.mxu1 %v2227_v49 }
 0x396   : > { %v2499_v38 = vadd.f32 %v2498_v4, %v2386_v6 }
 0x397   : > { %3757 = vmatmul.msk.f32.gmra.mxu0 %vm4343_vm1, %v5788_v0  ;;  %v2178_v0 = vld [vmem:[#allocation7 + $0x2c0] sm:$0xff] }
 0x398   : > { %v6046_v11 = vpop.f32.mrf.mxu1  ;;  %2435 = vmatmul.f32.gmra.mxu2 %v5729_v58  ;;  %2548 = vmatmul.f32.gmra.mxu3 %v6041_v60  ;;  %v6050_v56 = vadd.f32 %v2611_v31, %v2499_v38  ;;  %v2194_v38 = vld [vmem:[#allocation7 + $0x340] sm:$0xff] }
 0x399   : > { %7304 = vst [vmem:[#allocation85_spill] sm:$0xff] %v6046_v11  ;;  %2806 = vmatpush.msra.mxu2 %v2178_v0  ;;  %2919 = vmatpush.msra.mxu3 %v2194_v38  ;;  %v2210_v60 = vld [vmem:[#allocation7 + $0x3c0] sm:$0xff]  ;;  %v2209_v38 = vld [vmem:[#allocation7 + $0x3b8] sm:$0xff] }
 0x39a   : > { %7305 = vst [vmem:[#allocation86_spill] sm:$0xff] %v6050_v56  ;;  %3032 = vmatpush.msra.mxu0 %v2210_v60  ;;  %v2191_v60 = vld [vmem:[#allocation7 + $0x328] sm:$0xff] }
 0x39b   : > { %v2388_v51 = vpop.f32.mrf.mxu2  ;;  %v2501_v42 = vpop.f32.mrf.mxu3  ;;  %2726 = vmatmul.f32.gmra.mxu1 %v5446_v18 }
 0x39c   : > { %v2389_v4 = vadd.f32 %v2388_v51, %v7306_v25  ;;  %v2617_v5 = vpop.f32.mrf.mxu0  ;;  %3033 = vmatpush.msra.mxu0 %v2209_v38  ;;  %v2190_v38 = vld [vmem:[#allocation7 + $0x320] sm:$0xff] }
 0x39e   : > { %v2502_v6 = vadd.f32 %v2501_v42, %v2389_v4  ;;  %v6064_v42 = vrot.slane %v5807_v55, 1  ;;  %v7309_v4 = vld [vmem:[#allocation46_spill] sm:$0xff] }
 0x39f   : > { %2664 = vmatmul.f32.gmra.mxu0 %v5821_v16  ;;  %v2022_v56 = vrot.slane %v7309_v4, 1 }
 0x3a0   : > { %v6055_v54 = vpop.f32.mrf.mxu1  ;;  %2438 = vmatmul.f32.gmra.mxu2 %v5752_v22  ;;  %3728 = vmatmul.msk.f32.gmra.mxu3 %vm491_vm2, %v6035_v13  ;;  %v6060_v31 = vadd.f32 %v2614_v37, %v2502_v6  ;;  %v2193_v6 = vld [vmem:[#allocation7 + $0x338] sm:$0xff]  ;;  %v7314_v13 = vld [vmem:[#allocation54_spill] sm:$0xff] }
 0x3a1   : > { %7307 = vst [vmem:[#allocation19_spill] sm:$0xff] %v6055_v54  ;;  %v6070_v37 = vsel %vm491_vm2, %v2022_v56, %v6064_v42  ;;  %2920 = vmatpush.msra.mxu3 %v2193_v6  ;;  %v2176_v56 = vld [vmem:[#allocation7 + $0x2b0] sm:$0xff]  ;;  %v2226_v6 = vld [vmem:[#allocation7 + $0x440] sm:$0xff] }
 0x3a2   : > { %7308 = vst [vmem:[#allocation87_spill] sm:$0xff] %v6060_v31  ;;  %v7313_v31 = vld [vmem:[#allocation48_spill] sm:$0xff]  ;;  %3145 = vmatpush.msra.mxu1 %v2226_v6  ;;  %v6100_v6 = vrot.slane %v5852_v17, 1 }
 0x3a3   : > { %v2391_v23 = vpop.f32.mrf.mxu2  ;;  %v2504_v51 = vpop.f32.mrf.mxu3  ;;  %2729 = vmatmul.f32.gmra.mxu1 %v5465_v46  ;;  %7310 = vst [vmem:[#allocation88_spill] sm:$0xff] %v6070_v37 }
 0x3a4   : > { %v2392_v49 = vadd.f32 %v2391_v23, %v5755_v34  ;;  %v2620_v25 = vpop.f32.mrf.mxu0  ;;  %v2177_v34 = vld [vmem:[#allocation7 + $0x2b8] sm:$0xff] }
 0x3a5   : > { %2807 = vmatpush.msra.mxu2 %v2177_v34 }
 0x3a6   : > { %v2505_v16 = vadd.f32 %v2504_v51, %v2392_v49  ;;  %v2192_v51 = vld [vmem:[#allocation7 + $0x330] sm:$0xff] }
 0x3a7   : > { %3759 = vmatmul.msk.f32.gmra.mxu0 %vm4343_vm1, %v5843_v12  ;;  %v2208_v49 = vld [vmem:[#allocation7 + $0x3b0] sm:$0xff]  ;;  %v1418_v12 = vadd.f32 %v7314_v13, %v7313_v31  ;;  %2808 = vmatpush.msra.mxu2 %v2176_v56  ;;  %v2207_v13 = vld [vmem:[#allocation7 + $0x3a8] sm:$0xff]  ;;  %v2174_v31 = vld [vmem:[#allocation7 + $0x2a0] sm:$0xff] }
 0x3a8   : > { %v6075_v0 = vpop.f32.mrf.mxu1  ;;  %2441 = vmatmul.f32.gmra.mxu2 %v7309_v4  ;;  %2554 = vmatmul.f32.gmra.mxu3 %v6070_v37  ;;  %v6079_v23 = vadd.f32 %v2617_v5, %v2505_v16  ;;  %v7315_v37 = vld [vmem:[#allocation41_spill] sm:$0xff] }
 0x3a9   : > { %7311 = vst [vmem:[#allocation89_spill] sm:$0xff] %v6075_v0  ;;  %2921 = vmatpush.msra.mxu3 %v2192_v51  ;;  %v2175_v16 = vld [vmem:[#allocation7 + $0x2a8] sm:$0xff]  ;;  %v1531_v5 = vadd.f32 %v5893_v33, %v1418_v12  ;;  %3034 = vmatpush.msra.mxu0 %v2208_v49  ;;  %v2206_v12 = vld [vmem:[#allocation7 + $0x3a0] sm:$0xff]  ;;  %v2189_v51 = vld [vmem:[#allocation7 + $0x318] sm:$0xff] }
 0x3aa   : > { %7312 = vst [vmem:[#allocation90_spill] sm:$0xff] %v6079_v23  ;;  %2809 = vmatpush.msra.mxu2 %v2175_v16  ;;  %v7316_v23 = vld [vmem:[#allocation21_spill] sm:$0xff] }
 0x3ab   : > { %v2394_v54 = vpop.f32.mrf.mxu2  ;;  %v2507_v0 = vpop.f32.mrf.mxu3  ;;  %2732 = vmatmul.f32.gmra.mxu1 %v5483_v7  ;;  %2922 = vmatpush.msra.mxu3 %v2191_v60 }
 0x3ac   : > { %v2395_v11 = vadd.f32 %v2394_v54, %v7315_v37  ;;  %v2623_v4 = vpop.f32.mrf.mxu0  ;;  %v7317_v54 = vld [vmem:[#allocation55_spill] sm:$0xff]  ;;  %3035 = vmatpush.msra.mxu0 %v2207_v13  ;;  %2810 = vmatpush.msra.mxu2 %v2174_v31 }
 0x3ad   : > { %v1421_v37 = vadd.f32 %v7317_v54, %v7316_v23  ;;  %2923 = vmatpush.msra.mxu3 %v2190_v38  ;;  %v2205_v23 = vld [vmem:[#allocation7 + $0x398] sm:$0xff]  ;;  %v7319_v54 = vld [vmem:[#allocation38_spill] sm:$0xff] }
 0x3ae   : > { %v2508_v34 = vadd.f32 %v2507_v0, %v2395_v11  ;;  %v1644_v11 = vadd.f32 %v5895_v45, %v1531_v5  ;;  %v2173_v0 = vld [vmem:[#allocation7 + $0x298] sm:$0xff]  ;;  %3036 = vmatpush.msra.mxu0 %v2206_v12 }
 0x3af   : > { %2670 = vmatmul.f32.gmra.mxu0 %v5866_v14  ;;  %v1534_v49 = vadd.f32 %v5916_v62, %v1421_v37  ;;  %2811 = vmatpush.msra.mxu2 %v2173_v0  ;;  %v2025_v62 = vrot.slane %v5829_v59, 1  ;;  %v2204_v37 = vld [vmem:[#allocation7 + $0x390] sm:$0xff]  ;;  %v2187_v0 = vld [vmem:[#allocation7 + $0x308] sm:$0xff] }
 0x3b0   : > { %v6089_v56 = vpop.f32.mrf.mxu1  ;;  %2444 = vmatmul.f32.gmra.mxu2 %v5807_v55  ;;  %3729 = vmatmul.msk.f32.gmra.mxu3 %vm491_vm2, %v6064_v42  ;;  %v6094_v33 = vadd.f32 %v2620_v25, %v2508_v34  ;;  %v2172_v25 = vld [vmem:[#allocation7 + $0x290] sm:$0xff]  ;;  %v1757_v13 = vadd.f32 %v5873_v20, %v1644_v11 }
 0x3b1   : > { %v2188_v34 = vld [vmem:[#allocation7 + $0x310] sm:$0xff]  ;;  %2924 = vmatpush.msra.mxu3 %v2189_v51  ;;  %3037 = vmatpush.msra.mxu0 %v2205_v23  ;;  %v1647_v31 = vadd.f32 %v5918_v9, %v1534_v49  ;;  %v6108_v12 = vsel %vm491_vm2, %v2025_v62, %v6100_v6  ;;  %v2203_v9 = vld [vmem:[#allocation7 + $0x388] sm:$0xff]  ;;  %v2170_v49 = vld [vmem:[#allocation7 + $0x280] sm:$0xff] }
 0x3b2   : > { %7318 = vst [vmem:[#allocation48_spill] sm:$0xff] %v6094_v33  ;;  %2812 = vmatpush.msra.mxu2 %v2172_v25  ;;  %v2171_v33 = vld [vmem:[#allocation7 + $0x288] sm:$0xff]  ;;  %v1796_v51 = vmul.f32 %v5795_v32, %v1757_v13  ;;  %v2186_v23 = vld [vmem:[#allocation7 + $0x300] sm:$0xff] }
 0x3b3   : > { %v2397_v16 = vpop.f32.mrf.mxu2  ;;  %v2510_v60 = vpop.f32.mrf.mxu3  ;;  %2735 = vmatmul.f32.gmra.mxu1 %v5500_v50  ;;  %2925 = vmatpush.msra.mxu3 %v2188_v34 }
 0x3b4   : > { %v2398_v45 = vadd.f32 %v2397_v16, %v7319_v54  ;;  %v2626_v5 = vpop.f32.mrf.mxu0  ;;  %3038 = vmatpush.msra.mxu0 %v2204_v37  ;;  %2813 = vmatpush.msra.mxu2 %v2171_v33  ;;  %v1760_v16 = vadd.f32 %v5901_v48, %v1647_v31  ;;  %v7321_v54 = vld [vmem:[#allocation44_spill] sm:$0xff] }
 0x3b5   : > { %2926 = vmatpush.msra.mxu3 %v2187_v0 }
 0x3b6   : > { %v2511_v38 = vadd.f32 %v2510_v60, %v2398_v45  ;;  %v2202_v60 = vld [vmem:[#allocation7 + $0x380] sm:$0xff]  ;;  %3039 = vmatpush.msra.mxu0 %v2203_v9  ;;  %2814 = vmatpush.msra.mxu2 %v2170_v49  ;;  %v1797_v33 = vmul.f32 %v5795_v32, %v1760_v16 }
 0x3b7   : > { %3761 = vmatmul.msk.f32.gmra.mxu0 %vm4343_vm1, %v5890_v21  ;;  %2927 = vmatpush.msra.mxu3 %v2186_v23  ;;  %v7324_v23 = vld [vmem:[#allocation20_spill] sm:$0xff] }
 0x3b8   : > { %v6113_v20 = vpop.f32.mrf.mxu1  ;;  %2447 = vmatmul.f32.gmra.mxu2 %v5829_v59  ;;  %2560 = vmatmul.f32.gmra.mxu3 %v6108_v12  ;;  %v6117_v11 = vadd.f32 %v2623_v4, %v2511_v38  ;;  %v1832_v4 = vadd.f32 %v5804_v30, %v1796_v51  ;;  %v2225_v38 = vld [vmem:[#allocation7 + $0x438] sm:$0xff]  ;;  %v1833_v0 = vadd.f32 %v5804_v30, %v1797_v33  ;;  %v7323_v51 = vld [vmem:[#allocation72_spill] sm:$0xff] }
 0x3b9   : > { %3040 = vmatpush.msra.mxu0 %v2202_v60  ;;  %3146 = vmatpush.msra.mxu1 %v2225_v38  ;;  %v6138_v49 = vrot.slane %v7323_v51, 1 }
 0x3ba   : > { %7320 = vst [vmem:[#allocation54_spill] sm:$0xff] %v6117_v11  ;;  %v6133_v37 = vmax.f32 %v1832_v4, 0.0  ;;  %v7331_v11 = vld [vmem:[#allocation65_spill] sm:$0xff] }
 0x3bb   : > { %v2400_v25 = vpop.f32.mrf.mxu2  ;;  %v2513_v34 = vpop.f32.mrf.mxu3  ;;  %2738 = vmatmul.f32.gmra.mxu1 %v5518_v40 }
 0x3bc   : > { %v2401_v45 = vadd.f32 %v2400_v25, %v7321_v54  ;;  %v2629_v62 = vpop.f32.mrf.mxu0  ;;  %v7325_v25 = vld [vmem:[#allocation69_spill] sm:$0xff]  ;;  %v6143_v54 = vrot.slane %v6133_v37, 7 }
 0x3be   : > { %v2514_v13 = vadd.f32 %v2513_v34, %v2401_v45  ;;  %v2028_v34 = vrot.slane %v7325_v25, 1 }
 0x3bf   : > { %2676 = vmatmul.f32.gmra.mxu0 %v5914_v36 }
 0x3c0   : > { %v6126_v48 = vpop.f32.mrf.mxu1  ;;  %2450 = vmatmul.f32.gmra.mxu2 %v5852_v17  ;;  %3730 = vmatmul.msk.f32.gmra.mxu3 %vm491_vm2, %v6100_v6  ;;  %v6131_v31 = vadd.f32 %v2626_v5, %v2514_v13  ;;  %v6145_v5 = vmax.f32 %v1833_v0, 0.0  ;;  %v6149_v30 = vsel %vm491_vm2, %v2028_v34, %v6138_v49 }
 0x3c2   : > { %7322 = vst [vmem:[#allocation41_spill] sm:$0xff] %v6131_v31  ;;  %v2079_v13 = vrot.slane %v6145_v5, 7  ;;  %v2224_v31 = vld [vmem:[#allocation7 + $0x430] sm:$0xff] }
 0x3c3   : > { %v2403_v9 = vpop.f32.mrf.mxu2  ;;  %v2516_v32 = vpop.f32.mrf.mxu3  ;;  %2741 = vmatmul.f32.gmra.mxu1 %v5537_v52 }
 0x3c4   : > { %v2404_v16 = vadd.f32 %v2403_v9, %v7324_v23  ;;  %v2632_v60 = vpop.f32.mrf.mxu0  ;;  %v7327_v9 = vld [vmem:[#allocation71_spill] sm:$0xff]  ;;  %v6165_v34 = vsel %vm395_vm0, %v6143_v54, %v2079_v13  ;;  %3147 = vmatpush.msra.mxu1 %v2224_v31 }
 0x3c5   : > { %7328 = vst [vmem:[#allocation55_spill] sm:$0xff] %v6165_v34 }
 0x3c6   : > { %v2517_v45 = vadd.f32 %v2516_v32, %v2404_v16 }
 0x3c7   : > { %3763 = vmatmul.msk.f32.gmra.mxu0 %vm4343_vm1, %v6143_v54 }
 0x3c8   : > { %v6154_v4 = vpop.f32.mrf.mxu1  ;;  %2453 = vmatmul.f32.gmra.mxu2 %v7325_v25  ;;  %2566 = vmatmul.f32.gmra.mxu3 %v6149_v30  ;;  %v6158_v33 = vadd.f32 %v2629_v62, %v2517_v45 }
 0x3ca   : > { %7326 = vst [vmem:[#allocation21_spill] sm:$0xff] %v6158_v33 }
 0x3cb   : > { %v2406_v38 = vpop.f32.mrf.mxu2  ;;  %v2519_v0 = vpop.f32.mrf.mxu3  ;;  %2744 = vmatmul.f32.gmra.mxu1 %v5555_v41 }
 0x3cc   : > { %v2407_v32 = vadd.f32 %v2406_v38, %v7327_v9  ;;  %v2635_v23 = vpop.f32.mrf.mxu0 }
 0x3ce   : > { %v2520_v16 = vadd.f32 %v2519_v0, %v2407_v32  ;;  %v7330_v0 = vld [vmem:[#allocation73_spill] sm:$0xff] }
 0x3cf   : > { %2682 = vmatmul.f32.gmra.mxu0 %v6165_v34  ;;  %v7332_v34 = vld [vmem:[#allocation47_spill] sm:$0xff] }
 0x3d0   : > { %v6168_v62 = vpop.f32.mrf.mxu1  ;;  %2456 = vmatmul.f32.gmra.mxu2 %v7323_v51  ;;  %3731 = vmatmul.msk.f32.gmra.mxu3 %vm491_vm2, %v6138_v49  ;;  %v6173_v45 = vadd.f32 %v2632_v60, %v2520_v16 }
 0x3d2   : > { %7329 = vst [vmem:[#allocation38_spill] sm:$0xff] %v6173_v45 }
 0x3d3   : > { %v2409_v38 = vpop.f32.mrf.mxu2  ;;  %v2522_v9 = vpop.f32.mrf.mxu3  ;;  %2747 = vmatmul.f32.gmra.mxu1 %v5574_v63 }
 0x3d4   : > { %v2410_v13 = vadd.f32 %v2409_v38, %v7330_v0  ;;  %v2638_v32 = vpop.f32.mrf.mxu0 }
 0x3d6   : > { %v2523_v33 = vadd.f32 %v2522_v9, %v2410_v13  ;;  %v2223_v13 = vld [vmem:[#allocation7 + $0x428] sm:$0xff] }
 0x3d7   : > { %3041 = vmatmul.f32.vlgmr.msra.gmra.mxu0 %v5341_v57  ;;  %3148 = vmatpush.msra.mxu1 %v2223_v13  ;;  %v7339_v13 = vld [vmem:[#allocation15_spill] sm:$0xff] }
 0x3d8   : > { %v6178_v31 = vpop.f32.mrf.mxu1  ;;  %2815 = vmatmul.f32.vlgmr.msra.gmra.mxu2 %v7331_v11  ;;  %3781 = vmatmul.msk.f32.vlgmr.msra.gmra.mxu3 %vm4343_vm1, %v7332_v34  ;;  %v6184_v60 = vadd.f32 %v2635_v23, %v2523_v33  ;;  %v7335_v11 = vld [vmem:[#allocation60_spill] sm:$0xff]  ;;  %v7336_v34 = vld [vmem:[#allocation53_spill] sm:$0xff] }
 0x3da   : > { %7333 = vst [vmem:[#allocation44_spill] sm:$0xff] %v6184_v60 }
 0x3db   : > { %v2412_v16 = vpop.f32.mrf.mxu2  ;;  %v2525_v45 = vpop.f32.mrf.mxu3  ;;  %2750 = vmatmul.f32.gmra.mxu1 %v7284_v43 }
 0x3dc   : > { %v2413_v38 = vadd.f32 %v2412_v16, %v5932_v10  ;;  %v2641_v0 = vpop.f32.mrf.mxu0  ;;  %v7338_v10 = vld [vmem:[#allocation76_spill] sm:$0xff] }
 0x3de   : > { %v2526_v9 = vadd.f32 %v2525_v45, %v2413_v38 }
 0x3df   : > { %3044 = vmatmul.f32.gmra.mxu0 %v5359_v8 }
 0x3e0   : > { %v6189_v57 = vpop.f32.mrf.mxu1  ;;  %3764 = vmatmul.msk.f32.gmra.mxu2 %vm491_vm2, %v7335_v11  ;;  %2931 = vmatmul.f32.gmra.mxu3 %v7336_v34  ;;  %v6194_v33 = vadd.f32 %v2638_v32, %v2526_v9 }
 0x3e1   : > { %7334 = vst [vmem:[#allocation72_spill] sm:$0xff] %v6189_v57  ;;  %v7340_v57 = vld [vmem:[#allocation22_spill] sm:$0xff] }
 0x3e2   : > { %7337 = vst [vmem:[#allocation20_spill] sm:$0xff] %v6194_v33  ;;  %v7362_v33 = vld [vmem:[#allocation85_spill] sm:$0xff] }
 0x3e3   : > { %v2415_v23 = vpop.f32.mrf.mxu2  ;;  %v2528_v60 = vpop.f32.mrf.mxu3  ;;  %2753 = vmatmul.f32.gmra.mxu1 %v5617_v53 }
 0x3e4   : > { %v2416_v16 = vadd.f32 %v2415_v23, %v7338_v10  ;;  %v2644_v45 = vpop.f32.mrf.mxu0  ;;  %v2222_v10 = vld [vmem:[#allocation7 + $0x420] sm:$0xff] }
 0x3e5   : > { %3149 = vmatpush.msra.mxu1 %v2222_v10  ;;  %v7346_v10 = vld [vmem:[#allocation52_spill] sm:$0xff] }
 0x3e6   : > { %v2529_v38 = vadd.f32 %v2528_v60, %v2416_v16  ;;  %v7342_v16 = vld [vmem:[#allocation63_spill] sm:$0xff] }
 0x3e7   : > { %3047 = vmatmul.f32.gmra.mxu0 %v5376_v47 }
 0x3e8   : > { %v6199_v8 = vpop.f32.mrf.mxu1  ;;  %2821 = vmatmul.f32.gmra.mxu2 %v7339_v13  ;;  %3783 = vmatmul.msk.f32.gmra.mxu3 %vm4343_vm1, %v7340_v57  ;;  %v6205_v32 = vadd.f32 %v2641_v0, %v2529_v38  ;;  %v7343_v57 = vld [vmem:[#allocation50_spill] sm:$0xff] }
 0x3ea   : > { %7341 = vst [vmem:[#allocation69_spill] sm:$0xff] %v6205_v32 }
 0x3eb   : > { %v2418_v9 = vpop.f32.mrf.mxu2  ;;  %v2531_v11 = vpop.f32.mrf.mxu3  ;;  %2756 = vmatmul.f32.gmra.mxu1 %v5639_v15 }
 0x3ec   : > { %v2419_v34 = vadd.f32 %v2418_v9, %v5959_v61  ;;  %v2647_v23 = vpop.f32.mrf.mxu0 }
 0x3ee   : > { %v2532_v60 = vadd.f32 %v2531_v11, %v2419_v34  ;;  %v7345_v34 = vld [vmem:[#allocation28_spill] sm:$0xff] }
 0x3ef   : > { %3050 = vmatmul.f32.gmra.mxu0 %v5394_v28 }
 0x3f0   : > { %v6210_v47 = vpop.f32.mrf.mxu1  ;;  %3765 = vmatmul.msk.f32.gmra.mxu2 %vm491_vm2, %v7342_v16  ;;  %2937 = vmatmul.f32.gmra.mxu3 %v7343_v57  ;;  %v6215_v0 = vadd.f32 %v2644_v45, %v2532_v60 }
 0x3f2   : > { %7344 = vst [vmem:[#allocation71_spill] sm:$0xff] %v6215_v0  ;;  %v7348_v0 = vld [vmem:[#allocation40_spill] sm:$0xff] }
 0x3f3   : > { %v2421_v38 = vpop.f32.mrf.mxu2  ;;  %v2534_v32 = vpop.f32.mrf.mxu3  ;;  %2759 = vmatmul.f32.gmra.mxu1 %v5662_v24 }
 0x3f4   : > { %v2422_v61 = vadd.f32 %v2421_v38, %v5968_v2  ;;  %v2650_v9 = vpop.f32.mrf.mxu0 }
 0x3f6   : > { %v2535_v11 = vadd.f32 %v2534_v32, %v2422_v61  ;;  %v2221_v61 = vld [vmem:[#allocation7 + $0x418] sm:$0xff] }
 0x3f7   : > { %3053 = vmatmul.f32.gmra.mxu0 %v5409_v29  ;;  %3150 = vmatpush.msra.mxu1 %v2221_v61  ;;  %v7352_v61 = vld [vmem:[#allocation51_spill] sm:$0xff] }
 0x3f8   : > { %v6220_v28 = vpop.f32.mrf.mxu1  ;;  %2827 = vmatmul.f32.gmra.mxu2 %v7345_v34  ;;  %3785 = vmatmul.msk.f32.gmra.mxu3 %vm4343_vm1, %v7346_v10  ;;  %v6226_v45 = vadd.f32 %v2647_v23, %v2535_v11  ;;  %v7349_v10 = vld [vmem:[#allocation23_spill] sm:$0xff] }
 0x3fa   : > { %7347 = vst [vmem:[#allocation73_spill] sm:$0xff] %v6226_v45 }
 0x3fb   : > { %v2424_v60 = vpop.f32.mrf.mxu2  ;;  %v2537_v57 = vpop.f32.mrf.mxu3  ;;  %2762 = vmatmul.f32.gmra.mxu1 %v5684_v39 }
 0x3fc   : > { %v2425_v2 = vadd.f32 %v2424_v60, %v5988_v27  ;;  %v2653_v38 = vpop.f32.mrf.mxu0 }
 0x3fe   : > { %v2538_v32 = vadd.f32 %v2537_v57, %v2425_v2  ;;  %v7351_v2 = vld [vmem:[#allocation34_spill] sm:$0xff] }
 0x3ff   : > { %3056 = vmatmul.f32.gmra.mxu0 %v5428_v44 }
 0x400   : > { %v6231_v29 = vpop.f32.mrf.mxu1  ;;  %3766 = vmatmul.msk.f32.gmra.mxu2 %vm491_vm2, %v7348_v0  ;;  %2943 = vmatmul.f32.gmra.mxu3 %v7349_v10  ;;  %v6236_v23 = vadd.f32 %v2650_v9, %v2538_v32 }
 0x402   : > { %7350 = vst [vmem:[#allocation65_spill] sm:$0xff] %v6236_v23  ;;  %v7354_v23 = vld [vmem:[#allocation18_spill] sm:$0xff] }
 0x403   : > { %v2427_v11 = vpop.f32.mrf.mxu2  ;;  %v2540_v45 = vpop.f32.mrf.mxu3  ;;  %2765 = vmatmul.f32.gmra.mxu1 %v5707_v1 }
 0x404   : > { %v2428_v27 = vadd.f32 %v2427_v11, %v5997_v26  ;;  %v2656_v60 = vpop.f32.mrf.mxu0 }
 0x406   : > { %v2541_v57 = vadd.f32 %v2540_v45, %v2428_v27  ;;  %v2220_v27 = vld [vmem:[#allocation7 + $0x410] sm:$0xff] }
 0x407   : > { %3059 = vmatmul.f32.gmra.mxu0 %v5446_v18  ;;  %3151 = vmatpush.msra.mxu1 %v2220_v27  ;;  %v7359_v27 = vld [vmem:[#allocation26_spill] sm:$0xff] }
 0x408   : > { %v6241_v44 = vpop.f32.mrf.mxu1  ;;  %2833 = vmatmul.f32.gmra.mxu2 %v7351_v2  ;;  %3787 = vmatmul.msk.f32.gmra.mxu3 %vm4343_vm1, %v7352_v61  ;;  %v6247_v9 = vadd.f32 %v2653_v38, %v2541_v57  ;;  %v7355_v61 = vld [vmem:[#allocation57_spill] sm:$0xff] }
 0x40a   : > { %7353 = vst [vmem:[#allocation47_spill] sm:$0xff] %v6247_v9 }
 0x40b   : > { %v2430_v32 = vpop.f32.mrf.mxu2  ;;  %v2543_v10 = vpop.f32.mrf.mxu3  ;;  %2768 = vmatmul.f32.gmra.mxu1 %v5729_v58 }
 0x40c   : > { %v2431_v26 = vadd.f32 %v2430_v32, %v6017_v3  ;;  %v2659_v11 = vpop.f32.mrf.mxu0 }
 0x40e   : > { %v2544_v45 = vadd.f32 %v2543_v10, %v2431_v26  ;;  %v7358_v26 = vld [vmem:[#allocation64_spill] sm:$0xff] }
 0x40f   : > { %3062 = vmatmul.f32.gmra.mxu0 %v5465_v46 }
 0x410   : > { %v6252_v18 = vpop.f32.mrf.mxu1  ;;  %3767 = vmatmul.msk.f32.gmra.mxu2 %vm491_vm2, %v7354_v23  ;;  %2949 = vmatmul.f32.gmra.mxu3 %v7355_v61  ;;  %v6257_v38 = vadd.f32 %v2656_v60, %v2544_v45 }
 0x412   : > { %7356 = vst [vmem:[#allocation60_spill] sm:$0xff] %v6257_v38  ;;  %v7361_v38 = vld [vmem:[#allocation46_spill] sm:$0xff] }
 0x413   : > { %v2433_v57 = vpop.f32.mrf.mxu2  ;;  %v2546_v9 = vpop.f32.mrf.mxu3  ;;  %2771 = vmatmul.f32.gmra.mxu1 %v5752_v22 }
 0x414   : > { %v2434_v3 = vadd.f32 %v2433_v57, %v6026_v19  ;;  %v2662_v32 = vpop.f32.mrf.mxu0 }
 0x416   : > { %v2547_v10 = vadd.f32 %v2546_v9, %v2434_v3  ;;  %v2219_v3 = vld [vmem:[#allocation7 + $0x408] sm:$0xff] }
 0x417   : > { %3065 = vmatmul.f32.gmra.mxu0 %v5483_v7  ;;  %3152 = vmatpush.msra.mxu1 %v2219_v3  ;;  %v7369_v3 = vld [vmem:[#allocation42_spill] sm:$0xff] }
 0x418   : > { %v6262_v46 = vpop.f32.mrf.mxu1  ;;  %2839 = vmatmul.f32.gmra.mxu2 %v7358_v26  ;;  %3789 = vmatmul.msk.f32.gmra.mxu3 %vm4343_vm1, %v7359_v27  ;;  %v6268_v60 = vadd.f32 %v2659_v11, %v2547_v10  ;;  %v7365_v27 = vld [vmem:[#allocation56_spill] sm:$0xff] }
 0x419   : > { %7357 = vst [vmem:[#allocation53_spill] sm:$0xff] %v6262_v46  ;;  %v7364_v46 = vld [vmem:[#allocation36_spill] sm:$0xff] }
 0x41a   : > { %7360 = vst [vmem:[#allocation76_spill] sm:$0xff] %v6268_v60 }
 0x41b   : > { %v2436_v45 = vpop.f32.mrf.mxu2  ;;  %v2549_v61 = vpop.f32.mrf.mxu3  ;;  %2774 = vmatmul.f32.gmra.mxu1 %v7361_v38 }
 0x41c   : > { %v2437_v19 = vadd.f32 %v2436_v45, %v7362_v33  ;;  %v2665_v57 = vpop.f32.mrf.mxu0  ;;  %v7367_v33 = vld [vmem:[#allocation19_spill] sm:$0xff] }
 0x41e   : > { %v2550_v9 = vadd.f32 %v2549_v61, %v2437_v19 }
 0x41f   : > { %3068 = vmatmul.f32.gmra.mxu0 %v5500_v50 }
 0x420   : > { %v6273_v7 = vpop.f32.mrf.mxu1  ;;  %3768 = vmatmul.msk.f32.gmra.mxu2 %vm491_vm2, %v7364_v46  ;;  %2955 = vmatmul.f32.gmra.mxu3 %v7365_v27  ;;  %v6278_v11 = vadd.f32 %v2662_v32, %v2550_v9 }
 0x421   : > { %7363 = vst [vmem:[#allocation15_spill] sm:$0xff] %v6273_v7  ;;  %v7370_v7 = vld [vmem:[#allocation29_spill] sm:$0xff] }
 0x422   : > { %7366 = vst [vmem:[#allocation22_spill] sm:$0xff] %v6278_v11  ;;  %v7372_v11 = vld [vmem:[#allocation89_spill] sm:$0xff] }
 0x423   : > { %v2439_v10 = vpop.f32.mrf.mxu2  ;;  %v2552_v60 = vpop.f32.mrf.mxu3  ;;  %2777 = vmatmul.f32.gmra.mxu1 %v5807_v55 }
 0x424   : > { %v2440_v45 = vadd.f32 %v2439_v10, %v7367_v33  ;;  %v2668_v61 = vpop.f32.mrf.mxu0 }
 0x426   : > { %v2553_v19 = vadd.f32 %v2552_v60, %v2440_v45  ;;  %v2218_v45 = vld [vmem:[#allocation7 + $0x400] sm:$0xff] }
 0x427   : > { %3071 = vmatmul.f32.gmra.mxu0 %v5518_v40  ;;  %3153 = vmatpush.msra.mxu1 %v2218_v45  ;;  %v7377_v45 = vld [vmem:[#allocation32_spill] sm:$0xff] }
 0x428   : > { %v6283_v50 = vpop.f32.mrf.mxu1  ;;  %2845 = vmatmul.f32.gmra.mxu2 %v7369_v3  ;;  %3791 = vmatmul.msk.f32.gmra.mxu3 %vm4343_vm1, %v7370_v7  ;;  %v6289_v32 = vadd.f32 %v2665_v57, %v2553_v19  ;;  %v7374_v7 = vld [vmem:[#allocation61_spill] sm:$0xff] }
 0x429   : > { %7368 = vst [vmem:[#allocation63_spill] sm:$0xff] %v6283_v50  ;;  %v7373_v50 = vld [vmem:[#allocation45_spill] sm:$0xff] }
 0x42a   : > { %7371 = vst [vmem:[#allocation50_spill] sm:$0xff] %v6289_v32 }
 0x42b   : > { %v2442_v9 = vpop.f32.mrf.mxu2  ;;  %v2555_v27 = vpop.f32.mrf.mxu3  ;;  %2780 = vmatmul.f32.gmra.mxu1 %v5829_v59 }
 0x42c   : > { %v2443_v10 = vadd.f32 %v2442_v9, %v7372_v11  ;;  %v2671_v60 = vpop.f32.mrf.mxu0 }
 0x42e   : > { %v2556_v33 = vadd.f32 %v2555_v27, %v2443_v10  ;;  %v7376_v10 = vld [vmem:[#allocation70_spill] sm:$0xff] }
 0x42f   : > { %3074 = vmatmul.f32.gmra.mxu0 %v5537_v52 }
 0x430   : > { %v6294_v40 = vpop.f32.mrf.mxu1  ;;  %3769 = vmatmul.msk.f32.gmra.mxu2 %vm491_vm2, %v7373_v50  ;;  %2961 = vmatmul.f32.gmra.mxu3 %v7374_v7  ;;  %v6299_v57 = vadd.f32 %v2668_v61, %v2556_v33 }
 0x432   : > { %7375 = vst [vmem:[#allocation28_spill] sm:$0xff] %v6299_v57 }
 0x433   : > { %v2445_v19 = vpop.f32.mrf.mxu2  ;;  %v2558_v32 = vpop.f32.mrf.mxu3  ;;  %2783 = vmatmul.f32.gmra.mxu1 %v5852_v17 }
 0x434   : > { %v2446_v11 = vadd.f32 %v2445_v19, %v6089_v56  ;;  %v2674_v52 = vpop.f32.mrf.mxu0  ;;  %v7379_v19 = vld [vmem:[#allocation68_spill] sm:$0xff] }
 0x436   : > { %v2559_v9 = vadd.f32 %v2558_v32, %v2446_v11  ;;  %v7380_v11 = vld [vmem:[#allocation58_spill] sm:$0xff] }
 0x437   : > { %3077 = vmatmul.f32.gmra.mxu0 %v5555_v41 }
 0x438   : > { %v6304_v27 = vpop.f32.mrf.mxu1  ;;  %2851 = vmatmul.f32.gmra.mxu2 %v7376_v10  ;;  %3793 = vmatmul.msk.f32.gmra.mxu3 %vm4343_vm1, %v7377_v45  ;;  %v6310_v61 = vadd.f32 %v2671_v60, %v2559_v9 }
 0x43a   : > { %7378 = vst [vmem:[#allocation52_spill] sm:$0xff] %v6310_v61 }
 0x43b   : > { %v2448_v33 = vpop.f32.mrf.mxu2  ;;  %v2561_v7 = vpop.f32.mrf.mxu3  ;;  %2786 = vmatmul.f32.gmra.mxu1 %v7325_v25 }
 0x43c   : > { %v2449_v56 = vadd.f32 %v2448_v33, %v6113_v20  ;;  %v2677_v60 = vpop.f32.mrf.mxu0  ;;  %v7382_v33 = vld [vmem:[#allocation75_spill] sm:$0xff] }
 0x43e   : > { %v2562_v32 = vadd.f32 %v2561_v7, %v2449_v56  ;;  %v7383_v7 = vld [vmem:[#allocation13_spill] sm:$0xff] }
 0x43f   : > { %3080 = vmatmul.f32.gmra.mxu0 %v5574_v63 }
 0x440   : > { %v6315_v41 = vpop.f32.mrf.mxu1  ;;  %3770 = vmatmul.msk.f32.gmra.mxu2 %vm491_vm2, %v7379_v19  ;;  %2967 = vmatmul.f32.gmra.mxu3 %v7380_v11  ;;  %v6320_v57 = vadd.f32 %v2674_v52, %v2562_v32 }
 0x442   : > { %7381 = vst [vmem:[#allocation40_spill] sm:$0xff] %v6320_v57 }
 0x443   : > { %v2451_v9 = vpop.f32.mrf.mxu2  ;;  %v2564_v45 = vpop.f32.mrf.mxu3  ;;  %2789 = vmatmul.f32.gmra.mxu1 %v7323_v51 }
 0x444   : > { %v2452_v61 = vadd.f32 %v2451_v9, %v6126_v48  ;;  %v2680_v48 = vpop.f32.mrf.mxu0  ;;  %v7385_v9 = vld [vmem:[#allocation74_spill] sm:$0xff] }
 0x446   : > { %v2565_v20 = vadd.f32 %v2564_v45, %v2452_v61  ;;  %v7386_v45 = vld [vmem:[#allocation14_spill] sm:$0xff] }
 0x447   : > { %3083 = vmatmul.f32.gmra.mxu0 %v7284_v43 }
 0x448   : > { %v6325_v63 = vpop.f32.mrf.mxu1  ;;  %2857 = vmatmul.f32.gmra.mxu2 %v7382_v33  ;;  %3795 = vmatmul.msk.f32.gmra.mxu3 %vm4343_vm1, %v7383_v7  ;;  %v6331_v52 = vadd.f32 %v2677_v60, %v2565_v20 }
 0x44a   : > { %7384 = vst [vmem:[#allocation23_spill] sm:$0xff] %v6331_v52 }
 0x44b   : > { %v2454_v56 = vpop.f32.mrf.mxu2  ;;  %v2567_v32 = vpop.f32.mrf.mxu3  ;;  %2792 = vmatmul.f32.gmra.mxu1 %v6133_v37 }
 0x44c   : > { %v2455_v11 = vadd.f32 %v2454_v56, %v6154_v4  ;;  %v2683_v56 = vpop.f32.mrf.mxu0 }
 0x44e   : > { %v2568_v61 = vadd.f32 %v2567_v32, %v2455_v11  ;;  %v7388_v32 = vld [vmem:[#allocation35_spill] sm:$0xff] }
 0x44f   : > { %3086 = vmatmul.f32.gmra.mxu0 %v5617_v53  ;;  %v7389_v11 = vld [vmem:[#allocation67_spill] sm:$0xff] }
 0x450   : > { %v6336_v43 = vpop.f32.mrf.mxu1  ;;  %3771 = vmatmul.msk.f32.gmra.mxu2 %vm491_vm2, %v7385_v9  ;;  %2973 = vmatmul.f32.gmra.mxu3 %v7386_v45  ;;  %v6341_v7 = vadd.f32 %v2680_v48, %v2568_v61  ;;  %v7393_v45 = vld [vmem:[#allocation62_spill] sm:$0xff] }
 0x452   : > { %7387 = vst [vmem:[#allocation34_spill] sm:$0xff] %v6341_v7 }
 0x453   : > { %v2457_v60 = vpop.f32.mrf.mxu2  ;;  %2795 = vmatmul.f32.gmra.mxu1 %v6145_v5  ;;  %v2570_v52 = vpop.f32.mrf.mxu3 }
 0x454   : > { %v2458_v20 = vadd.f32 %v2457_v60, %v6168_v62  ;;  %v7394_v60 = vld [vmem:[#allocation27_spill] sm:$0xff] }
 0x456   : > { %v2571_v4 = vadd.f32 %v2570_v52, %v2458_v20  ;;  %v7391_v52 = vld [vmem:[#allocation78_spill] sm:$0xff]  ;;  %v7398_v20 = vld [vmem:[#allocation25_spill] sm:$0xff] }
 0x457   : > { %3089 = vmatmul.f32.gmra.mxu0 %v5639_v15  ;;  %v7392_v15 = vld [vmem:[#allocation24_spill] sm:$0xff] }
 0x458   : > { %v6346_v53 = vpop.f32.mrf.mxu1  ;;  %2863 = vmatmul.f32.gmra.mxu2 %v7388_v32  ;;  %3797 = vmatmul.msk.f32.gmra.mxu3 %vm4343_vm1, %v7389_v11  ;;  %v6352_v48 = vadd.f32 %v2683_v56, %v2571_v4  ;;  %v7399_v4 = vld [vmem:[#allocation33_spill] sm:$0xff]  ;;  %v7404_v56 = vld [vmem:[#allocation39_spill] sm:$0xff]  ;;  %v7405_v11 = vld [vmem:[#allocation16_spill] sm:$0xff] }
 0x45a   : > { %7390 = vst [vmem:[#allocation51_spill] sm:$0xff] %v6352_v48 }
 0x45b   : > { %3154 = vmatmul.f32.vlgmr.msra.gmra.mxu1 %v7339_v13  ;;  %v7395_v13 = vld [vmem:[#allocation80_spill] sm:$0xff] }
 0x45f   : > { %3092 = vmatmul.f32.gmra.mxu0 %v5662_v24 }
 0x460   : > { %v6356_v62 = vpop.f32.mrf.mxu1  ;;  %3772 = vmatmul.msk.f32.gmra.mxu2 %vm491_vm2, %v7391_v52  ;;  %2979 = vmatmul.f32.gmra.mxu3 %v7392_v15  ;;  %v6406_v15 = vpop.f32.mrf.mxu3 }
 0x463   : > { %3812 = vmatmul.msk.f32.gmra.mxu1 %vm491_vm2, %v7342_v16  ;;  %v7396_v16 = vld [vmem:[#allocation31_spill] sm:$0xff] }
 0x467   : > { %3095 = vmatmul.f32.gmra.mxu0 %v5684_v39 }
 0x468   : > { %v6364_v61 = vpop.f32.mrf.mxu1  ;;  %2869 = vmatmul.f32.gmra.mxu2 %v7393_v45  ;;  %3799 = vmatmul.msk.f32.gmra.mxu3 %vm4343_vm1, %v7394_v60  ;;  %v7408_v60 = vld [vmem:[#allocation17_spill] sm:$0xff] }
 0x46b   : > { %3160 = vmatmul.f32.gmra.mxu1 %v7345_v34  ;;  %v7401_v34 = vld [vmem:[#allocation82_spill] sm:$0xff] }
 0x46f   : > { %3098 = vmatmul.f32.gmra.mxu0 %v5707_v1 }
 0x470   : > { %v6372_v24 = vpop.f32.mrf.mxu1  ;;  %3773 = vmatmul.msk.f32.gmra.mxu2 %vm491_vm2, %v7395_v13  ;;  %2985 = vmatmul.f32.gmra.mxu3 %v7396_v16 }
 0x473   : > { %3813 = vmatmul.msk.f32.gmra.mxu1 %vm491_vm2, %v7348_v0  ;;  %v7402_v0 = vld [vmem:[#allocation49_spill] sm:$0xff] }
 0x477   : > { %3101 = vmatmul.f32.gmra.mxu0 %v5729_v58 }
 0x478   : > { %v6380_v39 = vpop.f32.mrf.mxu1  ;;  %2875 = vmatmul.f32.gmra.mxu2 %v7398_v20  ;;  %3801 = vmatmul.msk.f32.gmra.mxu3 %vm4343_vm1, %v7399_v4 }
 0x479   : > { %7397 = vst [vmem:[#allocation18_spill] sm:$0xff] %v6380_v39 }
 0x47b   : > { %3166 = vmatmul.f32.gmra.mxu1 %v7351_v2  ;;  %v6404_v2 = vpop.f32.mrf.mxu2 }
 0x47f   : > { %3104 = vmatmul.f32.gmra.mxu0 %v5752_v22  ;;  %v6402_v22 = vpop.f32.mrf.mxu0 }
 0x480   : > { %v6388_v1 = vpop.f32.mrf.mxu1  ;;  %3774 = vmatmul.msk.f32.gmra.mxu2 %vm491_vm2, %v7401_v34  ;;  %2991 = vmatmul.f32.gmra.mxu3 %v7402_v0  ;;  %v6421_v0 = vpop.f32.mrf.mxu3 }
 0x481   : > { %7400 = vst [vmem:[#allocation57_spill] sm:$0xff] %v6388_v1 }
 0x483   : > { %3814 = vmatmul.msk.f32.gmra.mxu1 %vm491_vm2, %v7354_v23  ;;  %v6417_v4 = vpop.f32.mrf.mxu2 }
 0x487   : > { %3107 = vmatmul.f32.gmra.mxu0 %v7361_v38  ;;  %v7407_v38 = vld [vmem:[#allocation84_spill] sm:$0xff]  ;;  %v6415_v16 = vpop.f32.mrf.mxu0 }
 0x488   : > { %v6396_v58 = vpop.f32.mrf.mxu1  ;;  %2881 = vmatmul.f32.gmra.mxu2 %v7404_v56  ;;  %3803 = vmatmul.msk.f32.gmra.mxu3 %vm4343_vm1, %v7405_v11  ;;  %v7411_v11 = vld [vmem:[#allocation43_spill] sm:$0xff]  ;;  %v6435_v7 = vpop.f32.mrf.mxu3 }
 0x489   : > { %7403 = vst [vmem:[#allocation64_spill] sm:$0xff] %v6396_v58 }
 0x48b   : > { %3172 = vmatmul.f32.gmra.mxu1 %v7358_v26  ;;  %v6433_v48 = vpop.f32.mrf.mxu2 }
 0x48f   : > { %3110 = vmatmul.f32.gmra.mxu0 %v5807_v55  ;;  %v7410_v55 = vld [vmem:[#allocation88_spill] sm:$0xff] }
 0x490   : > { %v6410_v23 = vpop.f32.mrf.mxu1  ;;  %3775 = vmatmul.msk.f32.gmra.mxu2 %vm491_vm2, %v7407_v38  ;;  %2997 = vmatmul.f32.gmra.mxu3 %v7408_v60  ;;  %v6431_v60 = vpop.f32.mrf.mxu0 }
 0x491   : > { %7406 = vst [vmem:[#allocation26_spill] sm:$0xff] %v6410_v23 }
 0x493   : > { %3815 = vmatmul.msk.f32.gmra.mxu1 %vm491_vm2, %v7364_v46 }
 0x497   : > { %3113 = vmatmul.f32.gmra.mxu0 %v5829_v59 }
 0x498   : > { %v6424_v26 = vpop.f32.mrf.mxu1  ;;  %2887 = vmatmul.f32.gmra.mxu2 %v7410_v55  ;;  %3805 = vmatmul.msk.f32.gmra.mxu3 %vm4343_vm1, %v7411_v11  ;;  %v6445_v59 = vpop.f32.mrf.mxu0 }
 0x499   : > { %7409 = vst [vmem:[#allocation46_spill] sm:$0xff] %v6424_v26  ;;  %v6450_v11 = vpop.f32.mrf.mxu3  ;;  %v7418_v26 = vmov 0.0  }
 0x49b   : > { %3178 = vmatmul.f32.gmra.mxu1 %v7369_v3  ;;  %v6447_v3 = vpop.f32.mrf.mxu2 }
 0x49f   : > { %3116 = vmatmul.f32.gmra.mxu0 %v5852_v17 }
 0x4a0   : > { %v6438_v46 = vpop.f32.mrf.mxu1  ;;  %3776 = vmatmul.msk.f32.gmra.mxu2 %vm491_vm2, %v6064_v42  ;;  %3003 = vmatmul.f32.gmra.mxu3 %v5866_v14  ;;  %v6465_v14 = vpop.f32.mrf.mxu0 }
 0x4a1   : > { %7412 = vst [vmem:[#allocation85_spill] sm:$0xff] %v6438_v46 }
 0x4a3   : > { %3816 = vmatmul.msk.f32.gmra.mxu1 %vm491_vm2, %v7373_v50  ;;  %v6469_v50 = vpop.f32.mrf.mxu3 }
 0x4a7   : > { %3119 = vmatmul.f32.gmra.mxu0 %v7325_v25  ;;  %v6467_v25 = vpop.f32.mrf.mxu2 }
 0x4a8   : > { %v6452_v57 = vpop.f32.mrf.mxu1  ;;  %2893 = vmatmul.f32.gmra.mxu2 %v6108_v12  ;;  %3807 = vmatmul.msk.f32.gmra.mxu3 %vm4343_vm1, %v5890_v21 }
 0x4a9   : > { %7413 = vst [vmem:[#allocation36_spill] sm:$0xff] %v6452_v57  ;;  %v2084_v57 = vrot.slane %v6133_v37, 1 }
 0x4ab   : > { %3184 = vmatmul.f32.gmra.mxu1 %v7376_v10  ;;  %v6485_v10 = vpop.f32.mrf.mxu3 }
 0x4af   : > { %3122 = vmatmul.f32.gmra.mxu0 %v7323_v51  ;;  %v6482_v51 = vpop.f32.mrf.mxu2 }
 0x4b0   : > { %v6460_v17 = vpop.f32.mrf.mxu1  ;;  %3777 = vmatmul.msk.f32.gmra.mxu2 %vm491_vm2, %v6100_v6  ;;  %3009 = vmatmul.f32.gmra.mxu3 %v5914_v36  ;;  %v6480_v36 = vpop.f32.mrf.mxu0 }
 0x4b1   : > { %7414 = vst [vmem:[#allocation56_spill] sm:$0xff] %v6460_v17 }
 0x4b3   : > { %3817 = vmatmul.msk.f32.gmra.mxu1 %vm491_vm2, %v7379_v19  ;;  %v6503_v46 = vpop.f32.mrf.mxu3 }
 0x4b7   : > { %3125 = vmatmul.f32.gmra.mxu0 %v6133_v37 }
 0x4b8   : > { %v6474_v21 = vpop.f32.mrf.mxu1  ;;  %2899 = vmatmul.f32.gmra.mxu2 %v6149_v30  ;;  %3809 = vmatmul.msk.f32.gmra.mxu3 %vm4343_vm1, %v6143_v54  ;;  %v6496_v54 = vrot.slane %v6145_v5, 1  ;;  %v6498_v17 = vpop.f32.mrf.mxu0 }
 0x4b9   : > { %7415 = vst [vmem:[#allocation19_spill] sm:$0xff] %v6474_v21  ;;  %v7417_v21 = vld [vmem:[#allocation55_spill] sm:$0xff] }
 0x4bb   : > { %3190 = vmatmul.f32.gmra.mxu1 %v7382_v33  ;;  %v6500_v33 = vpop.f32.mrf.mxu2 }
 0x4bf   : > { %3128 = vmatmul.f32.gmra.mxu0 %v6145_v5  ;;  %v7420_v5 = vld [vmem:[#allocation12_spill] sm:$0xff] }
 0x4c0   : > { %v6488_v19 = vpop.f32.mrf.mxu1  ;;  %3778 = vmatmul.msk.f32.gmra.mxu2 %vm491_vm2, %v6138_v49  ;;  %3015 = vmatmul.f32.gmra.mxu3 %v7417_v21  ;;  %v6520_v58 = vpop.f32.mrf.mxu0 }
 0x4c1   : > { %7416 = vst [vmem:[#allocation42_spill] sm:$0xff] %v6488_v19  ;;  %v6507_v19 = vsel %vm491_vm2, %v2084_v57, %v6496_v54 }
 0x4c3   : > { %3818 = vmatmul.msk.f32.gmra.mxu1 %vm491_vm2, %v7385_v9  ;;  %v7421_v9 = vld [vmem:[#allocation77_spill] sm:$0xff]  ;;  %v6522_v57 = vpop.f32.mrf.mxu2 }
 0x4c4   : > { %v2704_v37 = vadd.f32 %v6178_v31, %v7421_v9  ;;  %v7423_v31 = vld [vmem:[#allocation79_spill] sm:$0xff] }
 0x4c6   : > { %v2817_v23 = vadd.f32 %v6404_v2, %v2704_v37  ;;  %v6542_v37 = vld [vmem:[%s6896_s5] ss:$0 sm:$0xff] }
 0x4c7   : > { %3131 = vmatmul.f32.gmra.mxu0 %v7418_v26 }
 0x4c8   : > { %v6510_v21 = vpop.f32.mrf.mxu1  ;;  %2905 = vmatmul.f32.gmra.mxu2 %v6507_v19  ;;  %3811 = vmatmul.msk.f32.gmra.mxu3 %vm4343_vm1, %v7420_v5  ;;  %v2930_v35 = vadd.f32 %v6406_v15, %v2817_v23  ;;  %v6547_v15 = vld [vmem:[%s6897_s6] ss:$0 sm:$0xff] }
 0x4c9   : > { %7419 = vst [vmem:[#allocation29_spill] sm:$0xff] %v6510_v21  ;;  %v6525_v21 = vpop.f32.mrf.mxu3 }
 0x4ca   : > { %v3043_v9 = vadd.f32 %v6402_v22, %v2930_v35  ;;  %v7425_v22 = vld [vmem:[#allocation59_spill] sm:$0xff] }
 0x4cb   : > { %3196 = vmatmul.f32.gmra.mxu1 %v7388_v32  ;;  %v7424_v32 = vld [vmem:[#allocation72_spill] sm:$0xff] }
 0x4cc   : > { %v2707_v2 = vadd.f32 %v7424_v32, %v7423_v31  ;;  %v6555_v31 = vpop.f32.mrf.mxu2  ;;  %v3974_v32 = vld [vmem:[%s4326_s13] sm:$0xff] }
 0x4cf   : > { %3134 = vmatmul.f32.gmra.mxu0 %v7418_v26  ;;  %v2820_v26 = vadd.f32 %v6417_v4, %v2707_v2  ;;  %v2710_v4 = vadd.f32 %v6199_v8, %v7425_v22 }
 0x4d0   : > { %v6527_v1 = vpop.f32.mrf.mxu1  ;;  %3779 = vmatmul.msk.f32.gmra.mxu2 %vm491_vm2, %v6496_v54  ;;  %3021 = vmatmul.f32.gmra.mxu3 %v7420_v5 }
 0x4d1   : > { %7422 = vst [vmem:[#allocation89_spill] sm:$0xff] %v6527_v1 }
 0x4d3   : > { %3819 = vmatmul.msk.f32.gmra.mxu1 %vm491_vm2, %v7391_v52  ;;  %v2933_v52 = vadd.f32 %v6421_v0, %v2820_v26 }
 0x4d8   : > { %v3155_v1 = vpop.f32.mrf.mxu1 }
 0x4d9   : > { %v3156_v5 = vadd.f32 %v3155_v1, %v3043_v9  ;;  %v2823_v1 = vadd.f32 %v6433_v48, %v2710_v4  ;;  %v3046_v9 = vadd.f32 %v6415_v16, %v2933_v52  ;;  %v6569_v48 = vpop.f32.mrf.mxu3  ;;  %v6575_v52 = vpop.f32.mrf.mxu0 }
 0x4db   : > { %v3255_v23 = vmul.f32 %v6542_v37, %v3156_v5  ;;  %3202 = vmatmul.f32.gmra.mxu1 %v7393_v45  ;;  %v2936_v5 = vadd.f32 %v6435_v7, %v2823_v1  ;;  %v7426_v45 = vld [vmem:[#allocation81_spill] sm:$0xff] }
 0x4dc   : > { %v2713_v16 = vadd.f32 %v6210_v47, %v7426_v45 }
 0x4dd   : > { %v3291_v35 = vadd.f32 %v6547_v15, %v3255_v23  ;;  %v3975_v23 = vld [vmem:[%s4326_s13 + $0x8] sm:$0xff]  ;;  %v3049_v4 = vadd.f32 %v6431_v60, %v2936_v5  ;;  %v3976_v5 = vld [vmem:[%s4326_s13 + $0x10] sm:$0xff] }
 0x4de   : > { %v2826_v7 = vadd.f32 %v6447_v3, %v2713_v16  ;;  %v7427_v3 = vld [vmem:[#allocation66_spill] sm:$0xff] }
 0x4df   : > { %v3323_v2 = vadd.f32 %v3974_v32, %v3291_v35  ;;  %v6579_v35 = vpop.f32.mrf.mxu2 }
 0x4e0   : > { %v3158_v39 = vpop.f32.mrf.mxu1 }
 0x4e1   : > { %v3355_v0 = vmax.f32 %v3323_v2, 0.0  ;;  %v3159_v26 = vadd.f32 %v3158_v39, %v3046_v9  ;;  %v2939_v2 = vadd.f32 %v6450_v11, %v2826_v7  ;;  %v2716_v9 = vadd.f32 %v6220_v28, %v7427_v3  ;;  %v6593_v16 = vpop.f32.mrf.mxu0 }
 0x4e3   : > { %3387 = vst [vmem:[%s6563_s30] sm:$0xff] %v3355_v0  ;;  %v3256_v8 = vmul.f32 %v6542_v37, %v3159_v26  ;;  %3820 = vmatmul.msk.f32.gmra.mxu1 %vm491_vm2, %v7395_v13  ;;  %v6588_v26 = vpop.f32.mrf.mxu3  ;;  %v2829_v60 = vadd.f32 %v6467_v25, %v2716_v9  ;;  %v3052_v11 = vadd.f32 %v6445_v59, %v2939_v2  ;;  %v7428_v25 = vld [vmem:[#allocation83_spill] sm:$0xff] }
 0x4e5   : > { %v3292_v39 = vadd.f32 %v6547_v15, %v3256_v8  ;;  %v2942_v28 = vadd.f32 %v6469_v50, %v2829_v60 }
 0x4e7   : > { %v3324_v22 = vadd.f32 %v3975_v23, %v3292_v39 }
 0x4e8   : > { %v3161_v1 = vpop.f32.mrf.mxu1 }
 0x4e9   : > { %v3356_v13 = vmax.f32 %v3324_v22, 0.0  ;;  %v3162_v32 = vadd.f32 %v3161_v1, %v3049_v4  ;;  %v2719_v22 = vadd.f32 %v6231_v29, %v7428_v25  ;;  %v3977_v1 = vld [vmem:[%s4326_s13 + $0x18] sm:$0xff] }
 0x4eb   : > { %3388 = vst [vmem:[%s6563_s30 + $0x8] sm:$0xff] %v3356_v13  ;;  %v3257_v47 = vmul.f32 %v6542_v37, %v3162_v32  ;;  %3208 = vmatmul.f32.gmra.mxu1 %v7398_v20  ;;  %v6595_v20 = vpop.f32.mrf.mxu2  ;;  %v2832_v4 = vadd.f32 %v6482_v51, %v2719_v22  ;;  %v3055_v32 = vadd.f32 %v6465_v14, %v2942_v28  ;;  %v6608_v50 = vpop.f32.mrf.mxu3 }
 0x4ed   : > { %v3293_v0 = vadd.f32 %v6547_v15, %v3257_v47  ;;  %v2945_v9 = vadd.f32 %v6485_v10, %v2832_v4 }
 0x4ef   : > { %v3325_v8 = vadd.f32 %v3976_v5, %v3293_v0  ;;  %v7429_v0 = vld [vmem:[#allocation30_spill] sm:$0xff] }
 0x4f0   : > { %v3164_v45 = vpop.f32.mrf.mxu1  ;;  %v2722_v14 = vadd.f32 %v6241_v44, %v7429_v0 }
 0x4f1   : > { %v3357_v39 = vmax.f32 %v3325_v8, 0.0  ;;  %v3165_v7 = vadd.f32 %v3164_v45, %v3052_v11  ;;  %v3978_v8 = vld [vmem:[%s4326_s13 + $0x20] sm:$0xff]  ;;  %v3058_v11 = vadd.f32 %v6480_v36, %v2945_v9 }
 0x4f2   : > { %v2835_v5 = vadd.f32 %v6500_v33, %v2722_v14  ;;  %v7430_v33 = vld [vmem:[#allocation86_spill] sm:$0xff] }
 0x4f3   : > { %3389 = vst [vmem:[%s6563_s30 + $0x10] sm:$0xff] %v3357_v39  ;;  %v3258_v23 = vmul.f32 %v6542_v37, %v3165_v7  ;;  %3821 = vmatmul.msk.f32.gmra.mxu1 %vm491_vm2, %v7401_v34  ;;  %v6611_v34 = vpop.f32.mrf.mxu0  ;;  %v6616_v51 = vpop.f32.mrf.mxu2  ;;  %v3980_v14 = vld [vmem:[%s4326_s13 + $0x30] sm:$0xff] }
 0x4f4   : > { %v6624_v28 = vpop.f32.mrf.mxu3 }
 0x4f5   : > { %v3294_v59 = vadd.f32 %v6547_v15, %v3258_v23  ;;  %v2725_v23 = vadd.f32 %v6252_v18, %v7430_v33  ;;  %v3981_v33 = vld [vmem:[%s4326_s13 + $0x38] sm:$0xff] }
 0x4f7   : > { %v3326_v13 = vadd.f32 %v3977_v1, %v3294_v59  ;;  %v2838_v59 = vadd.f32 %v6522_v57, %v2725_v23  ;;  %v7432_v57 = vld [vmem:[#allocation53_spill] sm:$0xff] }
 0x4f8   : > { %v3167_v2 = vpop.f32.mrf.mxu1 }
 0x4f9   : > { %v3358_v47 = vmax.f32 %v3326_v13, 0.0  ;;  %v3168_v3 = vadd.f32 %v3167_v2, %v3055_v32 }
 0x4fb   : > { %3390 = vst [vmem:[%s6563_s30 + $0x18] sm:$0xff] %v3358_v47  ;;  %v3259_v29 = vmul.f32 %v6542_v37, %v3168_v3  ;;  %3214 = vmatmul.f32.gmra.mxu1 %v7404_v56  ;;  %v2948_v56 = vadd.f32 %v6503_v46, %v2835_v5  ;;  %v6633_v25 = vpop.f32.mrf.mxu0  ;;  %v6636_v22 = vpop.f32.mrf.mxu2  ;;  %v3979_v46 = vld [vmem:[%s4326_s13 + $0x28] sm:$0xff]  ;;  %v7431_v3 = vld [vmem:[#allocation87_spill] sm:$0xff] }
 0x4fc   : > { %v6645_v47 = vpop.f32.mrf.mxu3  ;;  %v2728_v9 = vadd.f32 %v7432_v57, %v7431_v3 }
 0x4fd   : > { %v3295_v60 = vadd.f32 %v6547_v15, %v3259_v29  ;;  %v3061_v1 = vadd.f32 %v6498_v17, %v2948_v56 }
 0x4fe   : > { %v2841_v17 = vadd.f32 %v6555_v31, %v2728_v9  ;;  %v7433_v31 = vld [vmem:[#allocation90_spill] sm:$0xff] }
 0x4ff   : > { %v3327_v10 = vadd.f32 %v3978_v8, %v3295_v60 }
 0x500   : > { %v3170_v45 = vpop.f32.mrf.mxu1 }
 0x501   : > { %v3359_v39 = vmax.f32 %v3327_v10, 0.0  ;;  %v3171_v7 = vadd.f32 %v3170_v45, %v3058_v11  ;;  %v2954_v11 = vadd.f32 %v6569_v48, %v2841_v17 }
 0x503   : > { %3391 = vst [vmem:[%s6563_s30 + $0x20] sm:$0xff] %v3359_v39  ;;  %v3260_v44 = vmul.f32 %v6542_v37, %v3171_v7  ;;  %3822 = vmatmul.msk.f32.gmra.mxu1 %vm491_vm2, %v7407_v38  ;;  %v2951_v38 = vadd.f32 %v6525_v21, %v2838_v59  ;;  %v6651_v0 = vpop.f32.mrf.mxu0  ;;  %v6655_v5 = vpop.f32.mrf.mxu2  ;;  %v7434_v39 = vld [vmem:[#allocation15_spill] sm:$0xff]  ;;  %v3067_v48 = vadd.f32 %v6575_v52, %v2954_v11 }
 0x504   : > { %v2731_v7 = vadd.f32 %v7434_v39, %v7433_v31 }
 0x505   : > { %v3296_v36 = vadd.f32 %v6547_v15, %v3260_v44  ;;  %v3064_v60 = vadd.f32 %v6520_v58, %v2951_v38  ;;  %v6665_v58 = vpop.f32.mrf.mxu3 }
 0x506   : > { %v2844_v44 = vadd.f32 %v6579_v35, %v2731_v7  ;;  %v7435_v35 = vld [vmem:[#allocation48_spill] sm:$0xff] }
 0x507   : > { %v3328_v4 = vadd.f32 %v3979_v46, %v3296_v36 }
 0x508   : > { %v3173_v13 = vpop.f32.mrf.mxu1 }
 0x509   : > { %v3360_v32 = vmax.f32 %v3328_v4, 0.0  ;;  %v3174_v2 = vadd.f32 %v3173_v13, %v3061_v1  ;;  %v2957_v1 = vadd.f32 %v6588_v26, %v2844_v44 }
 0x50b   : > { %3392 = vst [vmem:[%s6563_s30 + $0x28] sm:$0xff] %v3360_v32  ;;  %v3261_v18 = vmul.f32 %v6542_v37, %v3174_v2  ;;  %3220 = vmatmul.f32.gmra.mxu1 %v7410_v55  ;;  %v6670_v59 = vpop.f32.mrf.mxu0  ;;  %v7436_v32 = vld [vmem:[#allocation63_spill] sm:$0xff]  ;;  %v3070_v57 = vadd.f32 %v6593_v16, %v2957_v1 }
 0x50c   : > { %v2734_v2 = vadd.f32 %v7436_v32, %v7435_v35  ;;  %v7439_v35 = vld [vmem:[#allocation21_spill] sm:$0xff] }
 0x50d   : > { %v3297_v29 = vadd.f32 %v6547_v15, %v3261_v18  ;;  %v3982_v18 = vld [vmem:[%s4326_s13 + $0x40] sm:$0xff]  ;;  %v6684_v9 = vpop.f32.mrf.mxu3 }
 0x50e   : > { %v2847_v38 = vadd.f32 %v6595_v20, %v2734_v2 }
 0x50f   : > { %v3329_v21 = vadd.f32 %v3980_v14, %v3297_v29 }
 0x510   : > { %v3176_v8 = vpop.f32.mrf.mxu1  ;;  %v2960_v14 = vadd.f32 %v6608_v50, %v2847_v38 }
 0x511   : > { %v3361_v55 = vmax.f32 %v3329_v21, 0.0  ;;  %v3177_v10 = vadd.f32 %v3176_v8, %v3064_v60  ;;  %v7437_v60 = vld [vmem:[#allocation54_spill] sm:$0xff] }
 0x512   : > { %v2737_v16 = vadd.f32 %v6294_v40, %v7437_v60  ;;  %v3073_v11 = vadd.f32 %v6611_v34, %v2960_v14  ;;  %v7438_v40 = vld [vmem:[#allocation41_spill] sm:$0xff] }
 0x513   : > { %3393 = vst [vmem:[%s6563_s30 + $0x30] sm:$0xff] %v3361_v55  ;;  %v3262_v45 = vmul.f32 %v6542_v37, %v3177_v10  ;;  %3823 = vmatmul.msk.f32.gmra.mxu1 %vm491_vm2, %v6064_v42  ;;  %v6672_v42 = vpop.f32.mrf.mxu2  ;;  %v3983_v10 = vld [vmem:[%s4326_s13 + $0x48] sm:$0xff] }
 0x514   : > { %v2850_v55 = vadd.f32 %v6616_v51, %v2737_v16  ;;  %v2740_v51 = vadd.f32 %v6304_v27, %v7438_v40 }
 0x515   : > { %v3298_v56 = vadd.f32 %v6547_v15, %v3262_v45  ;;  %v2974_v7 = vpop.f32.mrf.mxu3 }
 0x517   : > { %v3330_v23 = vadd.f32 %v3981_v33, %v3298_v56 }
 0x518   : > { %v3179_v36 = vpop.f32.mrf.mxu1 }
 0x519   : > { %v3362_v46 = vmax.f32 %v3330_v23, 0.0  ;;  %v3180_v4 = vadd.f32 %v3179_v36, %v3067_v48  ;;  %v2853_v23 = vadd.f32 %v6636_v22, %v2740_v51  ;;  %v3984_v48 = vld [vmem:[%s4326_s13 + $0x50] sm:$0xff]  ;;  %v2743_v22 = vadd.f32 %v6315_v41, %v7439_v35 }
 0x51b   : > { %3394 = vst [vmem:[%s6563_s30 + $0x38] sm:$0xff] %v3362_v46  ;;  %v3263_v13 = vmul.f32 %v6542_v37, %v3180_v4  ;;  %3226 = vmatmul.f32.gmra.mxu1 %v6108_v12  ;;  %v6687_v12 = vpop.f32.mrf.mxu0  ;;  %v6693_v20 = vpop.f32.mrf.mxu2 }
 0x51d   : > { %v3299_v52 = vadd.f32 %v6547_v15, %v3263_v13  ;;  %v2977_v13 = vpop.f32.mrf.mxu3 }
 0x51f   : > { %v3331_v3 = vadd.f32 %v3982_v18, %v3299_v52  ;;  %v3985_v52 = vld [vmem:[%s4326_s13 + $0x58] sm:$0xff] }
 0x520   : > { %v3182_v26 = vpop.f32.mrf.mxu1 }
 0x521   : > { %v3363_v29 = vmax.f32 %v3331_v3, 0.0  ;;  %v3183_v17 = vadd.f32 %v3182_v26, %v3070_v57 }
 0x523   : > { %3395 = vst [vmem:[%s6563_s30 + $0x40] sm:$0xff] %v3363_v29  ;;  %v3264_v21 = vmul.f32 %v6542_v37, %v3183_v17  ;;  %3824 = vmatmul.msk.f32.gmra.mxu1 %vm491_vm2, %v6100_v6  ;;  %v2963_v6 = vadd.f32 %v6624_v28, %v2850_v55  ;;  %v6707_v44 = vpop.f32.mrf.mxu0  ;;  %v2864_v34 = vpop.f32.mrf.mxu2 }
 0x525   : > { %v3300_v8 = vadd.f32 %v6547_v15, %v3264_v21  ;;  %v3076_v28 = vadd.f32 %v6633_v25, %v2963_v6  ;;  %v2856_v25 = vadd.f32 %v6655_v5, %v2743_v22  ;;  %v7440_v5 = vld [vmem:[#allocation38_spill] sm:$0xff]  ;;  %v2980_v14 = vpop.f32.mrf.mxu3  ;;  %v3986_v21 = vld [vmem:[%s4326_s13 + $0x60] sm:$0xff] }
 0x526   : > { %v2746_v29 = vadd.f32 %v6325_v63, %v7440_v5 }
 0x527   : > { %v3332_v50 = vadd.f32 %v3983_v10, %v3300_v8 }
 0x528   : > { %v3185_v45 = vpop.f32.mrf.mxu1 }
 0x529   : > { %v3364_v31 = vmax.f32 %v3332_v50, 0.0  ;;  %v3186_v39 = vadd.f32 %v3185_v45, %v3073_v11 }
 0x52b   : > { %3396 = vst [vmem:[%s6563_s30 + $0x48] sm:$0xff] %v3364_v31  ;;  %v3265_v56 = vmul.f32 %v6542_v37, %v3186_v39  ;;  %3232 = vmatmul.f32.gmra.mxu1 %v6149_v30  ;;  %v2966_v30 = vadd.f32 %v6645_v47, %v2853_v23  ;;  %v6722_v2 = vpop.f32.mrf.mxu0  ;;  %v2867_v18 = vpop.f32.mrf.mxu2  ;;  %v3987_v31 = vld [vmem:[%s4326_s13 + $0x68] sm:$0xff] }
 0x52d   : > { %v3301_v33 = vadd.f32 %v6547_v15, %v3265_v56  ;;  %v3079_v38 = vadd.f32 %v6651_v0, %v2966_v30  ;;  %v2859_v0 = vadd.f32 %v6672_v42, %v2746_v29  ;;  %v7441_v42 = vld [vmem:[#allocation44_spill] sm:$0xff] }
 0x52e   : > { %v2749_v11 = vadd.f32 %v6336_v43, %v7441_v42  ;;  %v7442_v43 = vld [vmem:[#allocation37_spill] sm:$0xff] }
 0x52f   : > { %v3333_v36 = vadd.f32 %v3984_v48, %v3301_v33  ;;  %v7446_v42 = vld [vmem:[#allocation73_spill] sm:$0xff] }
 0x530   : > { %v3188_v46 = vpop.f32.mrf.mxu1 }
 0x531   : > { %v3365_v4 = vmax.f32 %v3333_v36, 0.0  ;;  %v3189_v1 = vadd.f32 %v3188_v46, %v3076_v28  ;;  %v7443_v36 = vld [vmem:[#allocation20_spill] sm:$0xff] }
 0x533   : > { %3397 = vst [vmem:[%s6563_s30 + $0x50] sm:$0xff] %v3365_v4  ;;  %v3266_v27 = vmul.f32 %v6542_v37, %v3189_v1  ;;  %3825 = vmatmul.msk.f32.gmra.mxu1 %vm491_vm2, %v6138_v49  ;;  %v2969_v49 = vadd.f32 %v6665_v58, %v2856_v25  ;;  %v3093_v8 = vpop.f32.mrf.mxu0  ;;  %v2870_v50 = vpop.f32.mrf.mxu2 }
 0x535   : > { %v3302_v32 = vadd.f32 %v6547_v15, %v3266_v27  ;;  %v3082_v16 = vadd.f32 %v6670_v59, %v2969_v49  ;;  %v2862_v59 = vadd.f32 %v6693_v20, %v2749_v11  ;;  %v2752_v20 = vadd.f32 %v6346_v53, %v7443_v36  ;;  %v7444_v53 = vld [vmem:[#allocation69_spill] sm:$0xff] }
 0x537   : > { %v3334_v47 = vadd.f32 %v3985_v52, %v3302_v32  ;;  %v2975_v33 = vadd.f32 %v2974_v7, %v2862_v59  ;;  %v2865_v46 = vadd.f32 %v2864_v34, %v2752_v20  ;;  %v2755_v34 = vadd.f32 %v6356_v62, %v7444_v53  ;;  %v7445_v62 = vld [vmem:[#allocation71_spill] sm:$0xff]  ;;  %v3991_v59 = vld [vmem:[%s4326_s13 + $0x88] sm:$0xff] }
 0x538   : > { %v3191_v3 = vpop.f32.mrf.mxu1 }
 0x539   : > { %v3366_v57 = vmax.f32 %v3334_v47, 0.0  ;;  %v3192_v26 = vadd.f32 %v3191_v3, %v3079_v38  ;;  %v3088_v1 = vadd.f32 %v6707_v44, %v2975_v33  ;;  %v2978_v22 = vadd.f32 %v2977_v13, %v2865_v46  ;;  %v3989_v38 = vld [vmem:[%s4326_s13 + $0x78] sm:$0xff] }
 0x53a   : > { %v2868_v44 = vadd.f32 %v2867_v18, %v2755_v34 }
 0x53b   : > { %3398 = vst [vmem:[%s6563_s30 + $0x58] sm:$0xff] %v3366_v57  ;;  %v3267_v41 = vmul.f32 %v6542_v37, %v3192_v26  ;;  %3238 = vmatmul.f32.gmra.mxu1 %v6507_v19  ;;  %v2972_v19 = vadd.f32 %v6684_v9, %v2859_v0  ;;  %v2983_v9 = vpop.f32.mrf.mxu3  ;;  %v3096_v23 = vpop.f32.mrf.mxu0  ;;  %v3091_v13 = vadd.f32 %v6722_v2, %v2978_v22  ;;  %v7449_v22 = vld [vmem:[#allocation47_spill] sm:$0xff] }
 0x53c   : > { %v2873_v48 = vpop.f32.mrf.mxu2 }
 0x53d   : > { %v3303_v17 = vadd.f32 %v6547_v15, %v3267_v41  ;;  %v3085_v6 = vadd.f32 %v6687_v12, %v2972_v19  ;;  %v3988_v12 = vld [vmem:[%s4326_s13 + $0x70] sm:$0xff]  ;;  %v2981_v41 = vadd.f32 %v2980_v14, %v2868_v44 }
 0x53f   : > { %v3335_v60 = vadd.f32 %v3986_v21, %v3303_v17  ;;  %v2758_v17 = vadd.f32 %v6364_v61, %v7445_v62  ;;  %v3094_v2 = vadd.f32 %v3093_v8, %v2981_v41  ;;  %v2761_v61 = vadd.f32 %v6372_v24, %v7446_v42  ;;  %v7448_v24 = vld [vmem:[#allocation18_spill] sm:$0xff]  ;;  %v7451_v41 = vld [vmem:[#allocation60_spill] sm:$0xff] }
 0x540   : > { %v3194_v58 = vpop.f32.mrf.mxu1  ;;  %v7454_v42 = vld [vmem:[#allocation26_spill] sm:$0xff] }
 0x541   : > { %v3367_v55 = vmax.f32 %v3335_v60, 0.0  ;;  %v3195_v10 = vadd.f32 %v3194_v58, %v3082_v16  ;;  %v2871_v21 = vadd.f32 %v2870_v50, %v2758_v17  ;;  %v3990_v60 = vld [vmem:[%s4326_s13 + $0x80] sm:$0xff] }
 0x543   : > { %3399 = vst [vmem:[%s6563_s30 + $0x60] sm:$0xff] %v3367_v55  ;;  %v3268_v63 = vmul.f32 %v6542_v37, %v3195_v10  ;;  %3826 = vmatmul.msk.f32.gmra.mxu1 %vm491_vm2, %v6496_v54  ;;  %v2986_v35 = vpop.f32.mrf.mxu3  ;;  %v3099_v25 = vpop.f32.mrf.mxu0  ;;  %v2984_v19 = vadd.f32 %v2983_v9, %v2871_v21 }
 0x544   : > { %v2876_v47 = vpop.f32.mrf.mxu2 }
 0x545   : > { %v3304_v45 = vadd.f32 %v6547_v15, %v3268_v63  ;;  %v3097_v8 = vadd.f32 %v3096_v23, %v2984_v19 }
 0x547   : > { %v3336_v39 = vadd.f32 %v3987_v31, %v3304_v45  ;;  %v2874_v45 = vadd.f32 %v2873_v48, %v2761_v61  ;;  %v3992_v48 = vld [vmem:[%s4326_s13 + $0x90] sm:$0xff] }
 0x548   : > { %v3197_v56 = vpop.f32.mrf.mxu1 }
 0x549   : > { %v3368_v40 = vmax.f32 %v3336_v39, 0.0  ;;  %v3198_v51 = vadd.f32 %v3197_v56, %v3085_v6 }
 0x54b   : > { %3400 = vst [vmem:[%s6563_s30 + $0x68] sm:$0xff] %v3368_v40  ;;  %v3269_v54 = vmul.f32 %v6542_v37, %v3198_v51  ;;  %3244 = vmatmul.f32.gmra.mxu1 %v7442_v43  ;;  %v2989_v29 = vpop.f32.mrf.mxu3  ;;  %v3102_v18 = vpop.f32.mrf.mxu0  ;;  %v2987_v51 = vadd.f32 %v2986_v35, %v2874_v45 }
 0x54c   : > { %v2879_v58 = vpop.f32.mrf.mxu2 }
 0x54d   : > { %v3305_v28 = vadd.f32 %v6547_v15, %v3269_v54  ;;  %v7447_v54 = vld [vmem:[#allocation65_spill] sm:$0xff]  ;;  %v3100_v23 = vadd.f32 %v3099_v25, %v2987_v51 }
 0x54f   : > { %v3337_v4 = vadd.f32 %v3988_v12, %v3305_v28 }
 0x550   : > { %v3200_v7 = vpop.f32.mrf.mxu1 }
 0x551   : > { %v3369_v30 = vmax.f32 %v3337_v4, 0.0  ;;  %v3201_v27 = vadd.f32 %v3200_v7, %v3088_v1 }
 0x553   : > { %3401 = vst [vmem:[%s6563_s30 + $0x70] sm:$0xff] %v3369_v30  ;;  %v3270_v32 = vmul.f32 %v6542_v37, %v3201_v27  ;;  %3827 = vmatmul.msk.f32.gmra.mxu1 %vm491_vm2, %v7442_v43  ;;  %v2992_v50 = vpop.f32.mrf.mxu3  ;;  %v3105_v6 = vpop.f32.mrf.mxu0  ;;  %v2764_v43 = vadd.f32 %v7448_v24, %v7447_v54  ;;  %v7456_v54 = vld [vmem:[#allocation46_spill] sm:$0xff] }
 0x554   : > { %v2882_v9 = vpop.f32.mrf.mxu2 }
 0x555   : > { %v3306_v52 = vadd.f32 %v6547_v15, %v3270_v32  ;;  %v2877_v20 = vadd.f32 %v2876_v47, %v2764_v43  ;;  %v7450_v32 = vld [vmem:[#allocation57_spill] sm:$0xff]  ;;  %v3993_v47 = vld [vmem:[%s4326_s13 + $0x98] sm:$0xff] }
 0x556   : > { %v2767_v53 = vadd.f32 %v7450_v32, %v7449_v22  ;;  %v7458_v22 = vld [vmem:[#allocation85_spill] sm:$0xff] }
 0x557   : > { %v3338_v3 = vadd.f32 %v3989_v38, %v3306_v52  ;;  %v2990_v7 = vadd.f32 %v2989_v29, %v2877_v20 }
 0x558   : > { %v3203_v57 = vpop.f32.mrf.mxu1  ;;  %v2880_v52 = vadd.f32 %v2879_v58, %v2767_v53 }
 0x559   : > { %v3370_v26 = vmax.f32 %v3338_v3, 0.0  ;;  %v3204_v49 = vadd.f32 %v3203_v57, %v3091_v13  ;;  %v3103_v44 = vadd.f32 %v3102_v18, %v2990_v7 }
 0x55b   : > { %3402 = vst [vmem:[%s6563_s30 + $0x78] sm:$0xff] %v3370_v26  ;;  %v3271_v5 = vmul.f32 %v6542_v37, %v3204_v49  ;;  %v2995_v46 = vpop.f32.mrf.mxu3  ;;  %v3108_v30 = vpop.f32.mrf.mxu0  ;;  %v2993_v26 = vadd.f32 %v2992_v50, %v2880_v52  ;;  %v3997_v52 = vld [vmem:[%s4326_s13 + $0xb8] sm:$0xff] }
 0x55c   : > { %v2885_v35 = vpop.f32.mrf.mxu2 }
 0x55d   : > { %v3307_v0 = vadd.f32 %v6547_v15, %v3271_v5  ;;  %v7452_v5 = vld [vmem:[#allocation64_spill] sm:$0xff] }
 0x55e   : > { %v2770_v29 = vadd.f32 %v7452_v5, %v7451_v41  ;;  %v7459_v5 = vld [vmem:[#allocation28_spill] sm:$0xff] }
 0x55f   : > { %v3339_v16 = vadd.f32 %v3990_v60, %v3307_v0  ;;  %v3994_v60 = vld [vmem:[%s4326_s13 + $0xa0] sm:$0xff] }
 0x560   : > { %v3206_v55 = vpop.f32.mrf.mxu1  ;;  %v2883_v21 = vadd.f32 %v2882_v9, %v2770_v29  ;;  %v7460_v29 = vld [vmem:[#allocation36_spill] sm:$0xff] }
 0x561   : > { %v3371_v10 = vmax.f32 %v3339_v16, 0.0  ;;  %v3207_v14 = vadd.f32 %v3206_v55, %v3094_v2  ;;  %v3106_v16 = vadd.f32 %v3105_v6, %v2993_v26 }
 0x563   : > { %3403 = vst [vmem:[%s6563_s30 + $0x80] sm:$0xff] %v3371_v10  ;;  %v3272_v63 = vmul.f32 %v6542_v37, %v3207_v14  ;;  %v2998_v57 = vpop.f32.mrf.mxu3  ;;  %v3111_v62 = vpop.f32.mrf.mxu0  ;;  %v2996_v10 = vadd.f32 %v2995_v46, %v2883_v21  ;;  %v3998_v21 = vld [vmem:[%s4326_s13 + $0xc0] sm:$0xff] }
 0x564   : > { %v2888_v0 = vpop.f32.mrf.mxu2 }
 0x565   : > { %v3308_v11 = vadd.f32 %v6547_v15, %v3272_v63  ;;  %v7453_v63 = vld [vmem:[#allocation76_spill] sm:$0xff] }
 0x566   : > { %v2773_v61 = vadd.f32 %v7454_v42, %v7453_v63  ;;  %v7462_v63 = vld [vmem:[#allocation56_spill] sm:$0xff] }
 0x567   : > { %v3340_v31 = vadd.f32 %v3991_v59, %v3308_v11  ;;  %v3995_v59 = vld [vmem:[%s4326_s13 + $0xa8] sm:$0xff] }
 0x568   : > { %v3209_v39 = vpop.f32.mrf.mxu1  ;;  %v2886_v50 = vadd.f32 %v2885_v35, %v2773_v61  ;;  %v7457_v35 = vld [vmem:[#allocation50_spill] sm:$0xff] }
 0x569   : > { %v3372_v56 = vmax.f32 %v3340_v31, 0.0  ;;  %v3210_v40 = vadd.f32 %v3209_v39, %v3097_v8  ;;  %v3109_v8 = vadd.f32 %v3108_v30, %v2996_v10  ;;  %v2779_v32 = vadd.f32 %v7458_v22, %v7457_v35  ;;  %v7466_v35 = vld [vmem:[#allocation42_spill] sm:$0xff] }
 0x56a   : > { %v2999_v9 = vadd.f32 %v2998_v57, %v2886_v50 }
 0x56b   : > { %3404 = vst [vmem:[%s6563_s30 + $0x88] sm:$0xff] %v3372_v56  ;;  %v3273_v33 = vmul.f32 %v6542_v37, %v3210_v40  ;;  %v3001_v19 = vpop.f32.mrf.mxu3  ;;  %v3114_v45 = vpop.f32.mrf.mxu0 }
 0x56c   : > { %v2891_v39 = vpop.f32.mrf.mxu2 }
 0x56d   : > { %v3309_v36 = vadd.f32 %v6547_v15, %v3273_v33  ;;  %v7455_v33 = vld [vmem:[#allocation22_spill] sm:$0xff] }
 0x56e   : > { %v2776_v24 = vadd.f32 %v7456_v54, %v7455_v33  ;;  %v7463_v33 = vld [vmem:[#allocation40_spill] sm:$0xff]  ;;  %v7464_v54 = vld [vmem:[#allocation19_spill] sm:$0xff] }
 0x56f   : > { %v3341_v28 = vadd.f32 %v3992_v48, %v3309_v36  ;;  %v3996_v48 = vld [vmem:[%s4326_s13 + $0xb0] sm:$0xff] }
 0x570   : > { %v3212_v12 = vpop.f32.mrf.mxu1  ;;  %v2889_v20 = vadd.f32 %v2888_v0, %v2776_v24  ;;  %v2788_v24 = vadd.f32 %v7464_v54, %v7463_v33 }
 0x571   : > { %v3373_v4 = vmax.f32 %v3341_v28, 0.0  ;;  %v3213_v1 = vadd.f32 %v3212_v12, %v3100_v23  ;;  %v3112_v23 = vadd.f32 %v3111_v62, %v2999_v9  ;;  %v2782_v62 = vadd.f32 %v7460_v29, %v7459_v5  ;;  %v7468_v5 = vld [vmem:[#allocation29_spill] sm:$0xff] }
 0x572   : > { %v3002_v30 = vadd.f32 %v3001_v19, %v2889_v20  ;;  %v7461_v19 = vld [vmem:[#allocation52_spill] sm:$0xff] }
 0x573   : > { %3405 = vst [vmem:[%s6563_s30 + $0x90] sm:$0xff] %v3373_v4  ;;  %v3274_v27 = vmul.f32 %v6542_v37, %v3213_v1  ;;  %v3004_v36 = vpop.f32.mrf.mxu3  ;;  %v3117_v12 = vpop.f32.mrf.mxu0  ;;  %v2785_v42 = vadd.f32 %v7462_v63, %v7461_v19  ;;  %v7469_v63 = vld [vmem:[#allocation51_spill] sm:$0xff] }
 0x574   : > { %v2894_v7 = vpop.f32.mrf.mxu2 }
 0x575   : > { %v3310_v34 = vadd.f32 %v6547_v15, %v3274_v27  ;;  %v2895_v0 = vadd.f32 %v2894_v7, %v2782_v62 }
 0x577   : > { %v3342_v25 = vadd.f32 %v3993_v47, %v3310_v34  ;;  %v2892_v34 = vadd.f32 %v2891_v39, %v2779_v32 }
 0x578   : > { %v3215_v38 = vpop.f32.mrf.mxu1 }
 0x579   : > { %v3374_v3 = vmax.f32 %v3342_v25, 0.0  ;;  %v3216_v13 = vadd.f32 %v3215_v38, %v3103_v44  ;;  %v3115_v25 = vadd.f32 %v3114_v45, %v3002_v30  ;;  %v3005_v57 = vadd.f32 %v3004_v36, %v2892_v34 }
 0x57b   : > { %3406 = vst [vmem:[%s6563_s30 + $0x98] sm:$0xff] %v3374_v3  ;;  %v3275_v49 = vmul.f32 %v6542_v37, %v3216_v13  ;;  %v3007_v44 = vpop.f32.mrf.mxu3  ;;  %v3120_v26 = vpop.f32.mrf.mxu0 }
 0x57c   : > { %v2897_v41 = vpop.f32.mrf.mxu2  ;;  %v3008_v10 = vadd.f32 %v3007_v44, %v2895_v0 }
 0x57d   : > { %v3311_v17 = vadd.f32 %v6547_v15, %v3275_v49  ;;  %v2898_v45 = vadd.f32 %v2897_v41, %v2785_v42  ;;  %v7467_v41 = vld [vmem:[#allocation34_spill] sm:$0xff]  ;;  %v7470_v42 = vld [vmem:[#allocation89_spill] sm:$0xff] }
 0x57e   : > { %v2794_v29 = vadd.f32 %v7468_v5, %v7467_v41 }
 0x57f   : > { %v3343_v18 = vadd.f32 %v3994_v60, %v3311_v17 }
 0x580   : > { %v3218_v2 = vpop.f32.mrf.mxu1 }
 0x581   : > { %v3375_v58 = vmax.f32 %v3343_v18, 0.0  ;;  %v3219_v55 = vadd.f32 %v3218_v2, %v3106_v16  ;;  %v3118_v18 = vadd.f32 %v3117_v12, %v3005_v57 }
 0x583   : > { %3407 = vst [vmem:[%s6563_s30 + $0xa0] sm:$0xff] %v3375_v58  ;;  %v3276_v14 = vmul.f32 %v6542_v37, %v3219_v55  ;;  %v3010_v55 = vpop.f32.mrf.mxu3  ;;  %v3123_v61 = vpop.f32.mrf.mxu0 }
 0x584   : > { %v2900_v50 = vpop.f32.mrf.mxu2 }
 0x585   : > { %v3312_v11 = vadd.f32 %v6547_v15, %v3276_v14  ;;  %v2901_v20 = vadd.f32 %v2900_v50, %v2788_v24  ;;  %v4004_v24 = vld [vmem:[%s4326_s13 + $0xf0] sm:$0xff] }
 0x587   : > { %v3344_v31 = vadd.f32 %v3995_v59, %v3312_v11  ;;  %v3999_v59 = vld [vmem:[%s4326_s13 + $0xc8] sm:$0xff] }
 0x588   : > { %v3221_v6 = vpop.f32.mrf.mxu1 }
 0x589   : > { %v3376_v56 = vmax.f32 %v3344_v31, 0.0  ;;  %v3222_v40 = vadd.f32 %v3221_v6, %v3109_v8  ;;  %v3121_v8 = vadd.f32 %v3120_v26, %v3008_v10 }
 0x58b   : > { %3408 = vst [vmem:[%s6563_s30 + $0xa8] sm:$0xff] %v3376_v56  ;;  %v3277_v51 = vmul.f32 %v6542_v37, %v3222_v40  ;;  %v3011_v40 = vadd.f32 %v3010_v55, %v2898_v45  ;;  %v3126_v36 = vpop.f32.mrf.mxu0 }
 0x58d   : > { %v3313_v43 = vadd.f32 %v6547_v15, %v3277_v51  ;;  %v3013_v51 = vpop.f32.mrf.mxu3 }
 0x58e   : > { %v3014_v7 = vadd.f32 %v3013_v51, %v2901_v20 }
 0x58f   : > { %v3345_v28 = vadd.f32 %v3996_v48, %v3313_v43  ;;  %v4000_v48 = vld [vmem:[%s4326_s13 + $0xd0] sm:$0xff] }
 0x590   : > { %v3224_v46 = vpop.f32.mrf.mxu1 }
 0x591   : > { %v3377_v4 = vmax.f32 %v3345_v28, 0.0  ;;  %v3225_v1 = vadd.f32 %v3224_v46, %v3112_v23  ;;  %v3124_v23 = vadd.f32 %v3123_v61, %v3011_v40  ;;  %v2903_v46 = vpop.f32.mrf.mxu2  ;;  %v2797_v61 = vadd.f32 %v7470_v42, %v7469_v63 }
 0x593   : > { %3409 = vst [vmem:[%s6563_s30 + $0xb0] sm:$0xff] %v3377_v4  ;;  %v3278_v27 = vmul.f32 %v6542_v37, %v3225_v1 }
 0x595   : > { %v3314_v53 = vadd.f32 %v6547_v15, %v3278_v27  ;;  %v7465_v27 = vld [vmem:[#allocation23_spill] sm:$0xff] }
 0x596   : > { %v2791_v22 = vadd.f32 %v7466_v35, %v7465_v27 }
 0x597   : > { %v3346_v47 = vadd.f32 %v3997_v52, %v3314_v53  ;;  %v3016_v53 = vpop.f32.mrf.mxu3  ;;  %v4001_v52 = vld [vmem:[%s4326_s13 + $0xd8] sm:$0xff] }
 0x598   : > { %v3227_v38 = vpop.f32.mrf.mxu1  ;;  %v2904_v34 = vadd.f32 %v2903_v46, %v2791_v22  ;;  %v4005_v46 = vld [vmem:[%s4326_s13 + $0xf8] sm:$0xff] }
 0x599   : > { %v3378_v3 = vmax.f32 %v3346_v47, 0.0  ;;  %v3228_v13 = vadd.f32 %v3227_v38, %v3115_v25  ;;  %v3127_v25 = vadd.f32 %v3126_v36, %v3014_v7  ;;  %v2906_v57 = vpop.f32.mrf.mxu2 }
 0x59a   : > { %v3017_v26 = vadd.f32 %v3016_v53, %v2904_v34  ;;  %v2907_v0 = vadd.f32 %v2906_v57, %v2794_v29 }
 0x59b   : > { %3410 = vst [vmem:[%s6563_s30 + $0xb8] sm:$0xff] %v3378_v3  ;;  %v3279_v49 = vmul.f32 %v6542_v37, %v3228_v13  ;;  %v3129_v13 = vpop.f32.mrf.mxu0 }
 0x59d   : > { %v3315_v17 = vadd.f32 %v6547_v15, %v3279_v49 }
 0x59f   : > { %v3347_v60 = vadd.f32 %v3998_v21, %v3315_v17  ;;  %v3019_v17 = vpop.f32.mrf.mxu3  ;;  %v4002_v21 = vld [vmem:[%s4326_s13 + $0xe0] sm:$0xff] }
 0x5a0   : > { %v3230_v16 = vpop.f32.mrf.mxu1  ;;  %v3020_v10 = vadd.f32 %v3019_v17, %v2907_v0 }
 0x5a1   : > { %v3379_v2 = vmax.f32 %v3347_v60, 0.0  ;;  %v3231_v58 = vadd.f32 %v3230_v16, %v3118_v18  ;;  %v3130_v18 = vadd.f32 %v3129_v13, %v3017_v26  ;;  %v2909_v19 = vpop.f32.mrf.mxu2 }
 0x5a2   : > { %v2910_v45 = vadd.f32 %v2909_v19, %v2797_v61 }
 0x5a3   : > { %3411 = vst [vmem:[%s6563_s30 + $0xc0] sm:$0xff] %v3379_v2  ;;  %v3280_v14 = vmul.f32 %v6542_v37, %v3231_v58  ;;  %v3132_v55 = vpop.f32.mrf.mxu0 }
 0x5a4   : > { %v3133_v50 = vadd.f32 %v3132_v55, %v3020_v10 }
 0x5a5   : > { %v3316_v11 = vadd.f32 %v6547_v15, %v3280_v14 }
 0x5a7   : > { %v3348_v31 = vadd.f32 %v3999_v59, %v3316_v11  ;;  %v4003_v59 = vld [vmem:[%s4326_s13 + $0xe8] sm:$0xff] }
 0x5a8   : > { %v3233_v39 = vpop.f32.mrf.mxu1 }
 0x5a9   : > { %v3380_v6 = vmax.f32 %v3348_v31, 0.0  ;;  %v3234_v56 = vadd.f32 %v3233_v39, %v3121_v8  ;;  %v3022_v8 = vpop.f32.mrf.mxu3 }
 0x5aa   : > { %v3023_v40 = vadd.f32 %v3022_v8, %v2910_v45 }
 0x5ab   : > { %3412 = vst [vmem:[%s6563_s30 + $0xc8] sm:$0xff] %v3380_v6  ;;  %v3281_v9 = vmul.f32 %v6542_v37, %v3234_v56  ;;  %v3135_v51 = vpop.f32.mrf.mxu0 }
 0x5ac   : > { %v3136_v54 = vadd.f32 %v3135_v51, %v3023_v40 }
 0x5ad   : > { %v3317_v43 = vadd.f32 %v6547_v15, %v3281_v9 }
 0x5af   : > { %v3349_v28 = vadd.f32 %v4000_v48, %v3317_v43 }
 0x5b0   : > { %v3236_v12 = vpop.f32.mrf.mxu1 }
 0x5b1   : > { %v3381_v4 = vmax.f32 %v3349_v28, 0.0  ;;  %v3237_v1 = vadd.f32 %v3236_v12, %v3124_v23 }
 0x5b3   : > { %3413 = vst [vmem:[%s6563_s30 + $0xd0] sm:$0xff] %v3381_v4  ;;  %v3282_v30 = vmul.f32 %v6542_v37, %v3237_v1 }
 0x5b5   : > { %v3318_v32 = vadd.f32 %v6547_v15, %v3282_v30 }
 0x5b7   : > { %v3350_v47 = vadd.f32 %v4001_v52, %v3318_v32 }
 0x5b8   : > { %v3239_v44 = vpop.f32.mrf.mxu1 }
 0x5b9   : > { %v3382_v38 = vmax.f32 %v3350_v47, 0.0  ;;  %v3240_v3 = vadd.f32 %v3239_v44, %v3127_v25 }
 0x5bb   : > { %3414 = vst [vmem:[%s6563_s30 + $0xd8] sm:$0xff] %v3382_v38  ;;  %v3283_v49 = vmul.f32 %v6542_v37, %v3240_v3 }
 0x5bd   : > { %v3319_v62 = vadd.f32 %v6547_v15, %v3283_v49 }
 0x5bf   : > { %v3351_v60 = vadd.f32 %v4002_v21, %v3319_v62 }
 0x5c0   : > { %v3242_v16 = vpop.f32.mrf.mxu1 }
 0x5c1   : > { %v3383_v2 = vmax.f32 %v3351_v60, 0.0  ;;  %v3243_v58 = vadd.f32 %v3242_v16, %v3130_v18 }
 0x5c3   : > { %3415 = vst [vmem:[%s6563_s30 + $0xe0] sm:$0xff] %v3383_v2  ;;  %v3284_v14 = vmul.f32 %v6542_v37, %v3243_v58 }
 0x5c5   : > { %v3320_v11 = vadd.f32 %v6547_v15, %v3284_v14 }
 0x5c7   : > { %v3352_v31 = vadd.f32 %v4003_v59, %v3320_v11 }
 0x5c8   : > { %v3245_v39 = vpop.f32.mrf.mxu1 }
 0x5c9   : > { %v3384_v6 = vmax.f32 %v3352_v31, 0.0  ;;  %v3246_v56 = vadd.f32 %v3245_v39, %v3133_v50 }
 0x5cb   : > { %3416 = vst [vmem:[%s6563_s30 + $0xe8] sm:$0xff] %v3384_v6  ;;  %v3285_v9 = vmul.f32 %v6542_v37, %v3246_v56 }
 0x5cd   : > { %v3321_v33 = vadd.f32 %v6547_v15, %v3285_v9 }
 0x5cf   : > { %v3353_v43 = vadd.f32 %v4004_v24, %v3321_v33 }
 0x5d0   : > { %v3248_v36 = vpop.f32.mrf.mxu1 }
 0x5d1   : > { %v3385_v20 = vmax.f32 %v3353_v43, 0.0  ;;  %v3249_v48 = vadd.f32 %v3248_v36, %v3136_v54 }
 0x5d3   : > { %3417 = vst [vmem:[%s6563_s30 + $0xf0] sm:$0xff] %v3385_v20  ;;  %v3286_v28 = vmul.f32 %v6542_v37, %v3249_v48 }
 0x5d5   : > { %v3322_v23 = vadd.f32 %v6547_v15, %v3286_v28 }
 0x5d7   : > { %v3354_v12 = vadd.f32 %v4005_v46, %v3322_v23 }
 0x5d9   : > { %v3386_v4 = vmax.f32 %v3354_v12, 0.0 }
 0x5db   : > { %3418 = vst [vmem:[%s6563_s30 + $0xf8] sm:$0xff] %v3386_v4 }
 0x5dc   : > { %4123 = shalt.err (!%p4120_p10)
}
 0x5dd   : > { %s4173_s14 = smov 128   ;;  %s4174_s13 = smov 8  }
 0x5de   : > { %3877 = dma.vmem_to_hbm [thread:$0]  (%p4287_p3), %s3433_s29, 4096, %s3435_s23, %s3420_s28, %s4173_s14, %s4173_s14, %s4174_s13  }
 0x5df PF: > { %s3449_s30 = sand.u32 1, %s4154_s24   ;;  %p7471_p12 = scmp.ge.s32.totalorder %s4166_s27, 2 }
 0x5e0   : > { %s3450_s12 = scalar_lea.sflag [#allocation4], %s3449_s30 }
 0x5e1   : > { %p3891_p13 = pnand %p7471_p12, %p4250_p6 }
 0x5e3   : > { %p3892_p0 = pneg %p3891_p13 }
 0x5e5   : > { %4149 = dma.done.wait (%p3892_p0), %s3450_s12, 4096  }
 0x5e6   : > { %4151 = vsyncadd (%p3892_p0), %s3450_s12, 4294963200  ;;  %p21_p5 = scmp.ge.s32.totalorder %s4277_s22, 4   ;;  %s7472_s24 = smov %s4158_s25 }
 0x5e7   : > { %s7473_s25 = smov %s4162_s26  ;;  %s7474_s26 = smov %s4293_s10 }
 0x5e8   : > { %s7475_s27 = smov %s4277_s22  ;;  %23 = sbr.rel (!%p21_p5) target bundleno = 8 (0x8), region = 101 }
 0x5ed   :  { %3456 = vsyncpa [#allocation3], 1 }
 0x5ee   :  { %3458 = vsyncpa [#allocation3 + $0x1], 1 }
 0x5ef   :  { %3459 = vsyncpa [#allocation6], 1 }
 0x5f0   :  { %3460 = vsyncpa [#allocation4], 1 }
 0x5f1   :  { %3462 = vsyncpa [#allocation4 + $0x1], 1 }

</bundles_post_ra>
